<compile_context>
chip_gen: v5e
topology: v5e:2x2
jax: 0.10.0
libtpu: 0.0.40
codegen_flags: <defaults>
</compile_context>

<pallas_src>
import functools
import math

import jax
import jax.numpy as jnp
from jax import lax
from jax.experimental import pallas as pl
from jax.experimental.pallas import tpu as pltpu


# ---------------------------------------------------------------------------
# Host-side (trace-time) parameter folding helpers
# ---------------------------------------------------------------------------
def bn_fold(gamma, beta, mean, var, eps=1e-5):
    inv = gamma / jnp.sqrt(var + eps)
    return inv, beta - mean * inv


def _fold_conv3x3_2x2(w_oihw, scale):
    """PyTorch (Co, Ci, 3, 3) conv weight + per-Co BN scale ->
    (3, 3, 4*Ci, 4*Co) weight acting on row+column parity-folded maps.

    A logical (2H, 2W, C) map is stored as (H, W, 4C) with channel index
    (u*2 + v)*C + c  (u = row parity, v = column parity).  A 3x3 pad=1 conv
    over the full-resolution map then becomes 9 shifted matmuls over the
    folded, 1-pixel-halo-padded map using this weight.
    """
    co, ci = w_oihw.shape[0], w_oihw.shape[1]
    w = jnp.transpose(w_oihw, (2, 3, 1, 0)) * scale              # (3,3,Ci,Co) HWIO
    wf = jnp.zeros((3, 3, 2, 2, ci, 2, 2, co), jnp.float32)
    for di in range(-1, 2):
        for dj in range(-1, 2):
            for u_in in range(2):
                for v_in in range(2):
                    for u_out in range(2):
                        for v_out in range(2):
                            dr = 2 * di + u_in - u_out
                            dc = 2 * dj + v_in - v_out
                            if -1 <= dr <= 1 and -1 <= dc <= 1:
                                wf = wf.at[di + 1, dj + 1, u_in, v_in, :,
                                           u_out, v_out, :].set(w[dr + 1, dc + 1])
    return wf.reshape(3, 3, 4 * ci, 4 * co)


def _pick_row_block(h, w, max_rows=1024):
    """Largest halving of the folded row count with rb * W <= max_rows."""
    rb = h
    while rb > 1 and rb * w > max_rows and rb % 2 == 0:
        rb //= 2
    return rb


# ---------------------------------------------------------------------------
# Fused Pallas kernel: whole DecoderBlock forward for one batch image
# ---------------------------------------------------------------------------
def _decoder_block_kernel(*refs, H, W, U, Co, has_skip, rb):
    if has_skip:
        (x_ref, skip_ref, w_up_ref, b_up_ref, w_sk_ref,
         w1_ref, sh1_ref, w2_ref, sh2_ref,
         o_ref, cat_pad, y1_pad) = refs
    else:
        (x_ref, w_up_ref, b_up_ref,
         w1_ref, sh1_ref, w2_ref, sh2_ref,
         o_ref, cat_pad, y1_pad) = refs
        skip_ref = w_sk_ref = None

    f32, bf16 = jnp.float32, jnp.bfloat16
    C1 = 4 * Co

    # ---- zero only the 1-pixel halo perimeter (interior is fully rewritten
    # every step).  Done every step so "parallel" batch semantics stay correct.
    for pad in (cat_pad, y1_pad):
        C = pad.shape[-1]
        pad[0:1, :, :] = jnp.zeros((1, W + 2, C), bf16)
        pad[H + 1:H + 2, :, :] = jnp.zeros((1, W + 2, C), bf16)
        pad[:, 0:1, :] = jnp.zeros((H + 2, 1, C), bf16)
        pad[:, W + 1:W + 2, :] = jnp.zeros((H + 2, 1, C), bf16)

    # ---- ConvTranspose2d(k=2, s=2): ONE matmul whose N axis is the
    # (u, v, o)-folded output channel; one contiguous store (no interleave).
    x_flat = x_ref[0].reshape(H * W, -1)                          # (H*W, Cin) bf16
    up = jnp.dot(x_flat, w_up_ref[...], preferred_element_type=f32) + b_up_ref[...]
    cat_pad[1:H + 1, 1:W + 1, 0:4 * U] = up.astype(bf16).reshape(H, W, 4 * U)

    # ---- 1x1 skip projection (no bias): one matmul per row parity, written
    # straight into the combined scratch (the concat is eliminated).
    if has_skip:
        w_sk = w_sk_ref[...]
        for u in range(2):
            s_u = skip_ref[0, :, u, :, :].reshape(H * W, -1)      # (H*W, 2Cs) bf16
            sp = jnp.dot(s_u, w_sk, preferred_element_type=f32)
            lo = 4 * U + u * 2 * U
            cat_pad[1:H + 1, 1:W + 1, lo:lo + 2 * U] = (
                sp.astype(bf16).reshape(H, W, 2 * U))

    # ---- 3x3 pad=1 conv + BN shift + ReLU: 9 shifted bf16 matmuls over the
    # folded, halo-padded scratch, row-blocked so the f32 accumulator stays
    # register/VMEM-resident.
    def conv3x3_bn_relu(src_pad, w_all, shift, store):
        for r0 in range(0, H, rb):
            nr = min(rb, H - r0)
            acc = None
            for dh in range(3):
                for dc in range(3):
                    patch = src_pad[r0 + dh:r0 + dh + nr, dc:dc + W, :]
                    d = jnp.dot(patch.reshape(nr * W, -1), w_all[dh, dc],
                                preferred_element_type=f32)
                    acc = d if acc is None else acc + d
            store(r0, nr, jnp.maximum(acc + shift, 0.0))

    # conv1 -> y1_pad interior (bf16, folded layout)
    def store_y1(r0, nr, y):
        y1_pad[1 + r0:1 + r0 + nr, 1:W + 1, :] = y.astype(bf16).reshape(nr, W, C1)

    conv3x3_bn_relu(cat_pad, w1_ref[...], sh1_ref[...], store_y1)

    # conv2 -> output; the (u, v, co) channel fold splits into the two row-
    # parity planes of the rank-5 output view (host unfold is a free reshape).
    def store_out(r0, nr, y):
        y = y.astype(o_ref.dtype).reshape(nr, W, C1)
        o_ref[0, r0:r0 + nr, 0, :, :] = y[:, :, :2 * Co]
        o_ref[0, r0:r0 + nr, 1, :, :] = y[:, :, 2 * Co:]

    conv3x3_bn_relu(y1_pad, w2_ref[...], sh2_ref[...], store_out)


# ---------------------------------------------------------------------------
# Wrapper: parameter folding + pallas_call
# ---------------------------------------------------------------------------
def decoder_block_forward(p, x_nhwc, skip_nhwc=None, out_dtype=jnp.float32):
    n, h, w, cin = x_nhwc.shape
    U = p["up_w"].shape[1]
    co = p["conv1_w"].shape[0]
    has_skip = skip_nhwc is not None and p.get("skip_w") is not None
    bf16, f32 = jnp.bfloat16, jnp.float32

    # --- fold & repack parameters (trace-time, tiny) ---
    # ConvTranspose2d weight (Cin, U, 2, 2) -> (Cin, 4U), columns ordered (u, v, o)
    w_up = jnp.transpose(p["up_w"], (0, 2, 3, 1)).reshape(cin, 4 * U).astype(bf16)
    b_up = jnp.tile(p["up_b"], 4).reshape(1, 4 * U).astype(f32)
    s1, sh1 = bn_fold(*p["bn1"])
    s2, sh2 = bn_fold(*p["bn2"])
    w1 = _fold_conv3x3_2x2(p["conv1_w"][:, :U], s1)
    w2 = _fold_conv3x3_2x2(p["conv2_w"], s2).astype(bf16)
    sh1_f = jnp.tile(sh1, 4).reshape(1, 4 * co).astype(f32)
    sh2_f = jnp.tile(sh2, 4).reshape(1, 4 * co).astype(f32)

    x_bf = x_nhwc.astype(bf16)
    rb = _pick_row_block(h, w)
    kernel = functools.partial(_decoder_block_kernel, H=h, W=w, U=U, Co=co,
                               has_skip=has_skip, rb=rb)

    def _img_spec(shape_rest):
        nd = len(shape_rest)
        return pl.BlockSpec((1,) + tuple(shape_rest),
                            lambda i, _nd=nd: (i,) + (0,) * _nd)

    def _const_spec(a):
        nd = a.ndim
        return pl.BlockSpec(a.shape, lambda i, _nd=nd: (0,) * _nd)

    if has_skip:
        assert skip_nhwc.shape[1:3] == (2 * h, 2 * w), skip_nhwc.shape
        # TODO(synk): bilinear F.interpolate path for mismatched skip spatial
        # sizes is not implemented (not exercised by this configuration).
        cs = skip_nhwc.shape[3]
        # Row+column parity fold of the skip is a FREE row-major reshape.
        skip_f = skip_nhwc.reshape(n, h, 2, w, 2 * cs).astype(bf16)
        w_sk = jnp.kron(jnp.eye(2, dtype=f32),
                        p["skip_w"][:, :, 0, 0].T).astype(bf16)   # (2Cs, 2U)
        # conv1 weight K layout: [upsampled 4U | skip-projected 4U]
        w1 = jnp.concatenate(
            [w1, _fold_conv3x3_2x2(p["conv1_w"][:, U:], s1)], axis=2).astype(bf16)
        c_cat = 8 * U
        inputs = (x_bf, skip_f, w_up, b_up, w_sk, w1, sh1_f, w2, sh2_f)
        in_specs = ([_img_spec((h, w, cin)), _img_spec((h, 2, w, 2 * cs))]
                    + [_const_spec(a) for a in inputs[2:]])
        consts = inputs[2:]
    else:
        w1 = w1.astype(bf16)
        c_cat = 4 * U
        inputs = (x_bf, w_up, b_up, w1, sh1_f, w2, sh2_f)
        in_specs = [_img_spec((h, w, cin))] + [_const_spec(a) for a in inputs[1:]]
        consts = inputs[1:]

    scratch = [pltpu.VMEM((h + 2, w + 2, c_cat), bf16),        # up | skip (folded)
               pltpu.VMEM((h + 2, w + 2, 4 * co), bf16)]       # conv1 output

    # Explicit VMEM budget only when the per-step footprint approaches the
    # default scoped limit (keeps the default at small/test sizes).
    def _nbytes(shape, dtype):
        return int(math.prod(shape)) * jnp.dtype(dtype).itemsize

    blk = (_nbytes((1, h, w, cin), bf16)
           + _nbytes((1, h, 2, w, 2 * co), out_dtype)
           + (_nbytes((1, h, 2, w, 2 * cs), bf16) if has_skip else 0)
           + sum(_nbytes(a.shape, a.dtype) for a in consts))
    vmem_est = 2 * blk + sum(_nbytes(s.shape, s.dtype) for s in scratch)
    cp = dict(dimension_semantics=("parallel",))
    if vmem_est > 32 * 1024 * 1024:
        cp["vmem_limit_bytes"] = int(min(vmem_est * 3 // 2, 100 * 1024 * 1024))

    out5 = pl.pallas_call(
        kernel,
        out_shape=jax.ShapeDtypeStruct((n, h, 2, w, 2 * co), out_dtype),
        grid_spec=pltpu.PrefetchScalarGridSpec(
            num_scalar_prefetch=0,
            grid=(n,),
            in_specs=in_specs,
            out_specs=pl.BlockSpec((1, h, 2, w, 2 * co),
                                   lambda i: (i, 0, 0, 0, 0)),
            scratch_shapes=scratch),
        compiler_params=pltpu.CompilerParams(**cp),
    )(*inputs)

    # Unfold both parities out of the channel/parity axes: FREE row-major reshape.
    return out5.reshape(n, 2 * h, 2 * w, co)


# ---------------------------------------------------------------------------
# Deterministic parameter init (PyTorch weight-shape conventions)
# ---------------------------------------------------------------------------
def init_params(key, in_channels, skip_channels, out_channels):
    up_ch = in_channels // 2
    ks = jax.random.split(key, 5)
    p = {}
    # ConvTranspose2d weight: (Cin, Cout, kH, kW), bias: (Cout,)
    p["up_w"] = 0.1 * jax.random.normal(ks[0], (in_channels, up_ch, 2, 2), jnp.float32)
    p["up_b"] = 0.1 * jax.random.normal(ks[1], (up_ch,), jnp.float32)
    if skip_channels is not None and skip_channels > 0:
        # Conv2d 1x1 weight: (Cout, Cin, 1, 1), bias=False
        p["skip_w"] = 0.1 * jax.random.normal(ks[2], (up_ch, skip_channels, 1, 1),
                                              jnp.float32)
        conv_in = 2 * up_ch
    else:
        p["skip_w"] = None
        conv_in = up_ch
    p["conv1_w"] = 0.1 * jax.random.normal(ks[3], (out_channels, conv_in, 3, 3),
                                           jnp.float32)
    p["conv2_w"] = 0.1 * jax.random.normal(ks[4], (out_channels, out_channels, 3, 3),
                                           jnp.float32)
    # BatchNorm2d eval-mode stats: (gamma, beta, running_mean, running_var)
    ar = jnp.arange(out_channels, dtype=jnp.float32)
    p["bn1"] = (1.0 + 0.1 * ar, 0.05 * ar, 0.01 * ar, 1.0 + 0.02 * ar)
    p["bn2"] = (1.0 - 0.05 * ar, -0.02 * ar, 0.03 * ar, 1.0 + 0.01 * ar)
    return p


# ---------------------------------------------------------------------------
# Pure-JAX reference mirroring the kernel's precision policy
# (bf16 operands feeding every matmul/conv, f32 accumulation & epilogues)
# ---------------------------------------------------------------------------
def reference_forward(p, x_nhwc, skip_nhwc=None):
    bf16, f32 = jnp.bfloat16, jnp.float32
    q = lambda a: a.astype(bf16).astype(f32)
    n, h, w, cin = x_nhwc.shape
    U = p["up_w"].shape[1]

    # ConvTranspose2d(k=2,s=2): out[n, 2h+u, 2w+v, o] = sum_i x[n,h,w,i] W[i,o,u,v] + b
    r = jnp.einsum("nhwi,iouv->nhuwvo", q(x_nhwc), q(p["up_w"]))
    x_up = r.reshape(n, 2 * h, 2 * w, U) + p["up_b"]

    dn = ("NHWC", "HWIO", "NHWC")
    if skip_nhwc is not None and p.get("skip_w") is not None:
        w_sk = q(jnp.transpose(p["skip_w"], (2, 3, 1, 0)))
        skip_proj = lax.conv_general_dilated(q(skip_nhwc), w_sk, (1, 1), "VALID",
                                             dimension_numbers=dn)
        x_cat = jnp.concatenate([x_up, skip_proj], axis=-1)
    else:
        x_cat = x_up

    def conv_bn_relu(xin, w_oihw, bn):
        s, sh = bn_fold(*bn)
        w_hwio = q(jnp.transpose(w_oihw, (2, 3, 1, 0)) * s)
        y = lax.conv_general_dilated(q(xin), w_hwio, (1, 1), ((1, 1), (1, 1)),
                                     dimension_numbers=dn)
        return jnp.maximum(y + sh, 0.0)

    y1 = conv_bn_relu(x_cat, p["conv1_w"], p["bn1"])
    return conv_bn_relu(y1, p["conv2_w"], p["bn2"])


if __name__ == "__main__":
    in_channels, skip_channels, out_channels = 8, 4, 8
    N, H, W = 2, 8, 8                      # upsampled spatial = 16x16

    key = jax.random.PRNGKey(0)
    kp, kx, ks = jax.random.split(key, 3)
    params = init_params(kp, in_channels, skip_channels, out_channels)

    # Inputs in kernel layout (NHWC).  PyTorch NCHW equivalents:
    #   x_from_prev_decoder: (2, 8, 8, 8), skip_from_encoder: (2, 4, 16, 16)
    x = jax.random.normal(kx, (N, H, W, in_channels), jnp.float32)
    skip = jax.random.normal(ks, (N, 2 * H, 2 * W, skip_channels), jnp.float32)

    out = jax.block_until_ready(jax.jit(decoder_block_forward)(params, x, skip))
    ref = jax.block_until_ready(reference_forward(params, x, skip))

    assert out.shape == (N, 2 * H, 2 * W, out_channels), out.shape
    err = float(jnp.max(jnp.abs(out - ref)))
    assert err < 2e-3, f"max abs diff vs reference: {err}"

    print("KERNEL_OK")
</pallas_src>

<mosaic_0001>
module attributes {stable_mosaic.version = 11 : i64} {
  func.func @_decoder_block_kernel(%arg0: i32, %arg1: memref<1x8x8x8xbf16, #tpu.memory_space<vmem>>, %arg2: memref<1x8x2x8x8xbf16, #tpu.memory_space<vmem>>, %arg3: memref<8x16xbf16, #tpu.memory_space<vmem>>, %arg4: memref<1x16xf32, #tpu.memory_space<vmem>>, %arg5: memref<8x8xbf16, #tpu.memory_space<vmem>>, %arg6: memref<3x3x32x32xbf16, #tpu.memory_space<vmem>>, %arg7: memref<1x32xf32, #tpu.memory_space<vmem>>, %arg8: memref<3x3x32x32xbf16, #tpu.memory_space<vmem>>, %arg9: memref<1x32xf32, #tpu.memory_space<vmem>>, %arg10: memref<1x8x2x8x16xf32, #tpu.memory_space<vmem>>, %arg11: memref<10x10x32xbf16, #tpu.memory_space<vmem>>, %arg12: memref<10x10x32xbf16, #tpu.memory_space<vmem>>) attributes {dimension_semantics = [#tpu.dimension_semantics<parallel>], iteration_bounds = array<i64: 2>, scalar_prefetch = 0 : i64, scratch_operands = 2 : i64, tpu.core_type = #tpu.core_type<tc>, window_params = [{transform_indices = @transform_0, window_bounds = array<i64: 1, 8, 8, 8>}, {transform_indices = @transform_1, window_bounds = array<i64: 1, 8, 2, 8, 8>}, {pipeline_mode = #tpu.pipeline_mode<synchronous>, transform_indices = @transform_2, window_bounds = array<i64: 8, 16>}, {pipeline_mode = #tpu.pipeline_mode<synchronous>, transform_indices = @transform_3, window_bounds = array<i64: 1, 16>}, {pipeline_mode = #tpu.pipeline_mode<synchronous>, transform_indices = @transform_4, window_bounds = array<i64: 8, 8>}, {pipeline_mode = #tpu.pipeline_mode<synchronous>, transform_indices = @transform_5, window_bounds = array<i64: 3, 3, 32, 32>}, {pipeline_mode = #tpu.pipeline_mode<synchronous>, transform_indices = @transform_6, window_bounds = array<i64: 1, 32>}, {pipeline_mode = #tpu.pipeline_mode<synchronous>, transform_indices = @transform_7, window_bounds = array<i64: 3, 3, 32, 32>}, {pipeline_mode = #tpu.pipeline_mode<synchronous>, transform_indices = @transform_8, window_bounds = array<i64: 1, 32>}, {transform_indices = @transform_9, window_bounds = array<i64: 1, 8, 2, 8, 16>}]} {
    %cst = arith.constant 0.000000e+00 : bf16
    %0 = vector.broadcast %cst : bf16 to vector<1x10x32xbf16>
    %c0 = arith.constant 0 : index
    %c0_0 = arith.constant 0 : index
    %c0_1 = arith.constant 0 : index
    %1 = vector.load %arg11[%c0, %c0_0, %c0_1] : memref<10x10x32xbf16, #tpu.memory_space<vmem>>, vector<1x10x32xbf16>
    tpu.vector_store %arg11[%c0, %c0_0, %c0_1], %0 {strides = array<i32>} : memref<10x10x32xbf16, #tpu.memory_space<vmem>>, vector<1x10x32xbf16>,
    %cst_2 = arith.constant 0.000000e+00 : bf16
    %2 = vector.broadcast %cst_2 : bf16 to vector<1x10x32xbf16>
    %c9 = arith.constant 9 : index
    %c0_3 = arith.constant 0 : index
    %c0_4 = arith.constant 0 : index
    %3 = vector.load %arg11[%c9, %c0_3, %c0_4] : memref<10x10x32xbf16, #tpu.memory_space<vmem>>, vector<1x10x32xbf16>
    tpu.vector_store %arg11[%c9, %c0_3, %c0_4], %2 {strides = array<i32>} : memref<10x10x32xbf16, #tpu.memory_space<vmem>>, vector<1x10x32xbf16>,
    %cst_5 = arith.constant 0.000000e+00 : bf16
    %4 = vector.broadcast %cst_5 : bf16 to vector<10x1x32xbf16>
    %c0_6 = arith.constant 0 : index
    %c0_7 = arith.constant 0 : index
    %c0_8 = arith.constant 0 : index
    %5 = vector.load %arg11[%c0_6, %c0_7, %c0_8] : memref<10x10x32xbf16, #tpu.memory_space<vmem>>, vector<10x1x32xbf16>
    tpu.vector_store %arg11[%c0_6, %c0_7, %c0_8], %4 {strides = array<i32>} : memref<10x10x32xbf16, #tpu.memory_space<vmem>>, vector<10x1x32xbf16>,
    %cst_9 = arith.constant 0.000000e+00 : bf16
    %6 = vector.broadcast %cst_9 : bf16 to vector<10x1x32xbf16>
    %c0_10 = arith.constant 0 : index
    %c9_11 = arith.constant 9 : index
    %c0_12 = arith.constant 0 : index
    %7 = vector.load %arg11[%c0_10, %c9_11, %c0_12] : memref<10x10x32xbf16, #tpu.memory_space<vmem>>, vector<10x1x32xbf16>
    tpu.vector_store %arg11[%c0_10, %c9_11, %c0_12], %6 {strides = array<i32>} : memref<10x10x32xbf16, #tpu.memory_space<vmem>>, vector<10x1x32xbf16>,
    %cst_13 = arith.constant 0.000000e+00 : bf16
    %8 = vector.broadcast %cst_13 : bf16 to vector<1x10x32xbf16>
    %c0_14 = arith.constant 0 : index
    %c0_15 = arith.constant 0 : index
    %c0_16 = arith.constant 0 : index
    %9 = vector.load %arg12[%c0_14, %c0_15, %c0_16] : memref<10x10x32xbf16, #tpu.memory_space<vmem>>, vector<1x10x32xbf16>
    tpu.vector_store %arg12[%c0_14, %c0_15, %c0_16], %8 {strides = array<i32>} : memref<10x10x32xbf16, #tpu.memory_space<vmem>>, vector<1x10x32xbf16>,
    %cst_17 = arith.constant 0.000000e+00 : bf16
    %10 = vector.broadcast %cst_17 : bf16 to vector<1x10x32xbf16>
    %c9_18 = arith.constant 9 : index
    %c0_19 = arith.constant 0 : index
    %c0_20 = arith.constant 0 : index
    %11 = vector.load %arg12[%c9_18, %c0_19, %c0_20] : memref<10x10x32xbf16, #tpu.memory_space<vmem>>, vector<1x10x32xbf16>
    tpu.vector_store %arg12[%c9_18, %c0_19, %c0_20], %10 {strides = array<i32>} : memref<10x10x32xbf16, #tpu.memory_space<vmem>>, vector<1x10x32xbf16>,
    %cst_21 = arith.constant 0.000000e+00 : bf16
    %12 = vector.broadcast %cst_21 : bf16 to vector<10x1x32xbf16>
    %c0_22 = arith.constant 0 : index
    %c0_23 = arith.constant 0 : index
    %c0_24 = arith.constant 0 : index
    %13 = vector.load %arg12[%c0_22, %c0_23, %c0_24] : memref<10x10x32xbf16, #tpu.memory_space<vmem>>, vector<10x1x32xbf16>
    tpu.vector_store %arg12[%c0_22, %c0_23, %c0_24], %12 {strides = array<i32>} : memref<10x10x32xbf16, #tpu.memory_space<vmem>>, vector<10x1x32xbf16>,
    %cst_25 = arith.constant 0.000000e+00 : bf16
    %14 = vector.broadcast %cst_25 : bf16 to vector<10x1x32xbf16>
    %c0_26 = arith.constant 0 : index
    %c9_27 = arith.constant 9 : index
    %c0_28 = arith.constant 0 : index
    %15 = vector.load %arg12[%c0_26, %c9_27, %c0_28] : memref<10x10x32xbf16, #tpu.memory_space<vmem>>, vector<10x1x32xbf16>
    tpu.vector_store %arg12[%c0_26, %c9_27, %c0_28], %14 {strides = array<i32>} : memref<10x10x32xbf16, #tpu.memory_space<vmem>>, vector<10x1x32xbf16>,
    %c0_29 = arith.constant 0 : index
    %c0_30 = arith.constant 0 : index
    %c0_31 = arith.constant 0 : index
    %c0_32 = arith.constant 0 : index
    %16 = vector.load %arg1[%c0_29, %c0_30, %c0_31, %c0_32] : memref<1x8x8x8xbf16, #tpu.memory_space<vmem>>, vector<1x8x8x8xbf16>
    %17 = vector.shape_cast %16 : vector<1x8x8x8xbf16> to vector<8x8x8xbf16>
    %18 = vector.shape_cast %17 : vector<8x8x8xbf16> to vector<64x8xbf16>
    %c0_33 = arith.constant 0 : index
    %c0_34 = arith.constant 0 : index
    %19 = vector.load %arg3[%c0_33, %c0_34] : memref<8x16xbf16, #tpu.memory_space<vmem>>, vector<8x16xbf16>
    %cst_35 = arith.constant dense<0.000000e+00> : vector<64x16xf32>
    %20 = tpu.matmul %18, %19, %cst_35 {dimension_numbers = #tpu.dot_dimension_numbers<[1], [0], [0], [1], [0, 0, 1, 1], [], []>} : vector<64x8xbf16>, vector<8x16xbf16>, vector<64x16xf32> -> vector<64x16xf32>
    %c0_36 = arith.constant 0 : index
    %c0_37 = arith.constant 0 : index
    %21 = vector.load %arg4[%c0_36, %c0_37] : memref<1x16xf32, #tpu.memory_space<vmem>>, vector<1x16xf32>
    %22 = vector.broadcast %21 : vector<1x16xf32> to vector<64x16xf32>
    %23 = arith.addf %20, %22 : vector<64x16xf32>
    %24 = arith.truncf %23 : vector<64x16xf32> to vector<64x16xbf16>
    %25 = vector.shape_cast %24 : vector<64x16xbf16> to vector<8x8x16xbf16>
    %c1 = arith.constant 1 : index
    %c1_38 = arith.constant 1 : index
    %c0_39 = arith.constant 0 : index
    %26 = vector.load %arg11[%c1, %c1_38, %c0_39] : memref<10x10x32xbf16, #tpu.memory_space<vmem>>, vector<8x8x16xbf16>
    tpu.vector_store %arg11[%c1, %c1_38, %c0_39], %25 {strides = array<i32>} : memref<10x10x32xbf16, #tpu.memory_space<vmem>>, vector<8x8x16xbf16>,
    %c0_40 = arith.constant 0 : index
    %c0_41 = arith.constant 0 : index
    %27 = vector.load %arg5[%c0_40, %c0_41] : memref<8x8xbf16, #tpu.memory_space<vmem>>, vector<8x8xbf16>
    %c0_42 = arith.constant 0 : index
    %c0_43 = arith.constant 0 : index
    %c0_44 = arith.constant 0 : index
    %c0_45 = arith.constant 0 : index
    %c0_46 = arith.constant 0 : index
    %28 = vector.load %arg2[%c0_42, %c0_43, %c0_44, %c0_45, %c0_46] : memref<1x8x2x8x8xbf16, #tpu.memory_space<vmem>>, vector<1x8x1x8x8xbf16>
    %29 = vector.shape_cast %28 : vector<1x8x1x8x8xbf16> to vector<8x8x8xbf16>
    %30 = vector.shape_cast %29 : vector<8x8x8xbf16> to vector<64x8xbf16>
    %cst_47 = arith.constant dense<0.000000e+00> : vector<64x8xf32>
    %31 = tpu.matmul %30, %27, %cst_47 {dimension_numbers = #tpu.dot_dimension_numbers<[1], [0], [0], [1], [0, 0, 1, 1], [], []>} : vector<64x8xbf16>, vector<8x8xbf16>, vector<64x8xf32> -> vector<64x8xf32>
    %32 = arith.truncf %31 : vector<64x8xf32> to vector<64x8xbf16>
    %33 = vector.shape_cast %32 : vector<64x8xbf16> to vector<8x8x8xbf16>
    %c1_48 = arith.constant 1 : index
    %c1_49 = arith.constant 1 : index
    %c16 = arith.constant 16 : index
    %34 = vector.load %arg11[%c1_48, %c1_49, %c16] : memref<10x10x32xbf16, #tpu.memory_space<vmem>>, vector<8x8x8xbf16>
    tpu.vector_store %arg11[%c1_48, %c1_49, %c16], %33 {strides = array<i32>} : memref<10x10x32xbf16, #tpu.memory_space<vmem>>, vector<8x8x8xbf16>,
    %c0_50 = arith.constant 0 : index
    %c0_51 = arith.constant 0 : index
    %c1_52 = arith.constant 1 : index
    %c0_53 = arith.constant 0 : index
    %c0_54 = arith.constant 0 : index
    %35 = vector.load %arg2[%c0_50, %c0_51, %c1_52, %c0_53, %c0_54] : memref<1x8x2x8x8xbf16, #tpu.memory_space<vmem>>, vector<1x8x1x8x8xbf16>
    %36 = vector.shape_cast %35 : vector<1x8x1x8x8xbf16> to vector<8x8x8xbf16>
    %37 = vector.shape_cast %36 : vector<8x8x8xbf16> to vector<64x8xbf16>
    %cst_55 = arith.constant dense<0.000000e+00> : vector<64x8xf32>
    %38 = tpu.matmul %37, %27, %cst_55 {dimension_numbers = #tpu.dot_dimension_numbers<[1], [0], [0], [1], [0, 0, 1, 1], [], []>} : vector<64x8xbf16>, vector<8x8xbf16>, vector<64x8xf32> -> vector<64x8xf32>
    %39 = arith.truncf %38 : vector<64x8xf32> to vector<64x8xbf16>
    %40 = vector.shape_cast %39 : vector<64x8xbf16> to vector<8x8x8xbf16>
    %c1_56 = arith.constant 1 : index
    %c1_57 = arith.constant 1 : index
    %c24 = arith.constant 24 : index
    %41 = vector.load %arg11[%c1_56, %c1_57, %c24] : memref<10x10x32xbf16, #tpu.memory_space<vmem>>, vector<8x8x8xbf16>
    tpu.vector_store %arg11[%c1_56, %c1_57, %c24], %40 {strides = array<i32>} : memref<10x10x32xbf16, #tpu.memory_space<vmem>>, vector<8x8x8xbf16>,
    %c0_58 = arith.constant 0 : index
    %c0_59 = arith.constant 0 : index
    %c0_60 = arith.constant 0 : index
    %c0_61 = arith.constant 0 : index
    %42 = vector.load %arg6[%c0_58, %c0_59, %c0_60, %c0_61] : memref<3x3x32x32xbf16, #tpu.memory_space<vmem>>, vector<3x3x32x32xbf16>
    %c0_62 = arith.constant 0 : index
    %c0_63 = arith.constant 0 : index
    %43 = vector.load %arg7[%c0_62, %c0_63] : memref<1x32xf32, #tpu.memory_space<vmem>>, vector<1x32xf32>
    %c0_64 = arith.constant 0 : index
    %c0_65 = arith.constant 0 : index
    %c0_66 = arith.constant 0 : index
    %44 = vector.load %arg11[%c0_64, %c0_65, %c0_66] : memref<10x10x32xbf16, #tpu.memory_space<vmem>>, vector<8x8x32xbf16>
    %45 = vector.shape_cast %44 : vector<8x8x32xbf16> to vector<64x32xbf16>
    %46 = vector.extract_strided_slice %42 {offsets = [0, 0, 0, 0], sizes = [1, 1, 32, 32], strides = [1, 1, 1, 1]} : vector<3x3x32x32xbf16> to vector<1x1x32x32xbf16>
    %47 = vector.shape_cast %46 : vector<1x1x32x32xbf16> to vector<32x32xbf16>
    %cst_67 = arith.constant dense<0.000000e+00> : vector<64x32xf32>
    %48 = tpu.matmul %45, %47, %cst_67 {dimension_numbers = #tpu.dot_dimension_numbers<[1], [0], [0], [1], [0, 0, 1, 1], [], []>} : vector<64x32xbf16>, vector<32x32xbf16>, vector<64x32xf32> -> vector<64x32xf32>
    %c0_68 = arith.constant 0 : index
    %c1_69 = arith.constant 1 : index
    %c0_70 = arith.constant 0 : index
    %49 = vector.load %arg11[%c0_68, %c1_69, %c0_70] : memref<10x10x32xbf16, #tpu.memory_space<vmem>>, vector<8x8x32xbf16>
    %50 = vector.shape_cast %49 : vector<8x8x32xbf16> to vector<64x32xbf16>
    %51 = vector.extract_strided_slice %42 {offsets = [0, 1, 0, 0], sizes = [1, 1, 32, 32], strides = [1, 1, 1, 1]} : vector<3x3x32x32xbf16> to vector<1x1x32x32xbf16>
    %52 = vector.shape_cast %51 : vector<1x1x32x32xbf16> to vector<32x32xbf16>
    %cst_71 = arith.constant dense<0.000000e+00> : vector<64x32xf32>
    %53 = tpu.matmul %50, %52, %cst_71 {dimension_numbers = #tpu.dot_dimension_numbers<[1], [0], [0], [1], [0, 0, 1, 1], [], []>} : vector<64x32xbf16>, vector<32x32xbf16>, vector<64x32xf32> -> vector<64x32xf32>
    %54 = arith.addf %48, %53 : vector<64x32xf32>
    %c0_72 = arith.constant 0 : index
    %c2 = arith.constant 2 : index
    %c0_73 = arith.constant 0 : index
    %55 = vector.load %arg11[%c0_72, %c2, %c0_73] : memref<10x10x32xbf16, #tpu.memory_space<vmem>>, vector<8x8x32xbf16>
    %56 = vector.shape_cast %55 : vector<8x8x32xbf16> to vector<64x32xbf16>
    %57 = vector.extract_strided_slice %42 {offsets = [0, 2, 0, 0], sizes = [1, 1, 32, 32], strides = [1, 1, 1, 1]} : vector<3x3x32x32xbf16> to vector<1x1x32x32xbf16>
    %58 = vector.shape_cast %57 : vector<1x1x32x32xbf16> to vector<32x32xbf16>
    %cst_74 = arith.constant dense<0.000000e+00> : vector<64x32xf32>
    %59 = tpu.matmul %56, %58, %cst_74 {dimension_numbers = #tpu.dot_dimension_numbers<[1], [0], [0], [1], [0, 0, 1, 1], [], []>} : vector<64x32xbf16>, vector<32x32xbf16>, vector<64x32xf32> -> vector<64x32xf32>
    %60 = arith.addf %54, %59 : vector<64x32xf32>
    %c1_75 = arith.constant 1 : index
    %c0_76 = arith.constant 0 : index
    %c0_77 = arith.constant 0 : index
    %61 = vector.load %arg11[%c1_75, %c0_76, %c0_77] : memref<10x10x32xbf16, #tpu.memory_space<vmem>>, vector<8x8x32xbf16>
    %62 = vector.shape_cast %61 : vector<8x8x32xbf16> to vector<64x32xbf16>
    %63 = vector.extract_strided_slice %42 {offsets = [1, 0, 0, 0], sizes = [1, 1, 32, 32], strides = [1, 1, 1, 1]} : vector<3x3x32x32xbf16> to vector<1x1x32x32xbf16>
    %64 = vector.shape_cast %63 : vector<1x1x32x32xbf16> to vector<32x32xbf16>
    %cst_78 = arith.constant dense<0.000000e+00> : vector<64x32xf32>
    %65 = tpu.matmul %62, %64, %cst_78 {dimension_numbers = #tpu.dot_dimension_numbers<[1], [0], [0], [1], [0, 0, 1, 1], [], []>} : vector<64x32xbf16>, vector<32x32xbf16>, vector<64x32xf32> -> vector<64x32xf32>
    %66 = arith.addf %60, %65 : vector<64x32xf32>
    %c1_79 = arith.constant 1 : index
    %c1_80 = arith.constant 1 : index
    %c0_81 = arith.constant 0 : index
    %67 = vector.load %arg11[%c1_79, %c1_80, %c0_81] : memref<10x10x32xbf16, #tpu.memory_space<vmem>>, vector<8x8x32xbf16>
    %68 = vector.shape_cast %67 : vector<8x8x32xbf16> to vector<64x32xbf16>
    %69 = vector.extract_strided_slice %42 {offsets = [1, 1, 0, 0], sizes = [1, 1, 32, 32], strides = [1, 1, 1, 1]} : vector<3x3x32x32xbf16> to vector<1x1x32x32xbf16>
    %70 = vector.shape_cast %69 : vector<1x1x32x32xbf16> to vector<32x32xbf16>
    %cst_82 = arith.constant dense<0.000000e+00> : vector<64x32xf32>
    %71 = tpu.matmul %68, %70, %cst_82 {dimension_numbers = #tpu.dot_dimension_numbers<[1], [0], [0], [1], [0, 0, 1, 1], [], []>} : vector<64x32xbf16>, vector<32x32xbf16>, vector<64x32xf32> -> vector<64x32xf32>
    %72 = arith.addf %66, %71 : vector<64x32xf32>
    %c1_83 = arith.constant 1 : index
    %c2_84 = arith.constant 2 : index
    %c0_85 = arith.constant 0 : index
    %73 = vector.load %arg11[%c1_83, %c2_84, %c0_85] : memref<10x10x32xbf16, #tpu.memory_space<vmem>>, vector<8x8x32xbf16>
    %74 = vector.shape_cast %73 : vector<8x8x32xbf16> to vector<64x32xbf16>
    %75 = vector.extract_strided_slice %42 {offsets = [1, 2, 0, 0], sizes = [1, 1, 32, 32], strides = [1, 1, 1, 1]} : vector<3x3x32x32xbf16> to vector<1x1x32x32xbf16>
    %76 = vector.shape_cast %75 : vector<1x1x32x32xbf16> to vector<32x32xbf16>
    %cst_86 = arith.constant dense<0.000000e+00> : vector<64x32xf32>
    %77 = tpu.matmul %74, %76, %cst_86 {dimension_numbers = #tpu.dot_dimension_numbers<[1], [0], [0], [1], [0, 0, 1, 1], [], []>} : vector<64x32xbf16>, vector<32x32xbf16>, vector<64x32xf32> -> vector<64x32xf32>
    %78 = arith.addf %72, %77 : vector<64x32xf32>
    %c2_87 = arith.constant 2 : index
    %c0_88 = arith.constant 0 : index
    %c0_89 = arith.constant 0 : index
    %79 = vector.load %arg11[%c2_87, %c0_88, %c0_89] : memref<10x10x32xbf16, #tpu.memory_space<vmem>>, vector<8x8x32xbf16>
    %80 = vector.shape_cast %79 : vector<8x8x32xbf16> to vector<64x32xbf16>
    %81 = vector.extract_strided_slice %42 {offsets = [2, 0, 0, 0], sizes = [1, 1, 32, 32], strides = [1, 1, 1, 1]} : vector<3x3x32x32xbf16> to vector<1x1x32x32xbf16>
    %82 = vector.shape_cast %81 : vector<1x1x32x32xbf16> to vector<32x32xbf16>
    %cst_90 = arith.constant dense<0.000000e+00> : vector<64x32xf32>
    %83 = tpu.matmul %80, %82, %cst_90 {dimension_numbers = #tpu.dot_dimension_numbers<[1], [0], [0], [1], [0, 0, 1, 1], [], []>} : vector<64x32xbf16>, vector<32x32xbf16>, vector<64x32xf32> -> vector<64x32xf32>
    %84 = arith.addf %78, %83 : vector<64x32xf32>
    %c2_91 = arith.constant 2 : index
    %c1_92 = arith.constant 1 : index
    %c0_93 = arith.constant 0 : index
    %85 = vector.load %arg11[%c2_91, %c1_92, %c0_93] : memref<10x10x32xbf16, #tpu.memory_space<vmem>>, vector<8x8x32xbf16>
    %86 = vector.shape_cast %85 : vector<8x8x32xbf16> to vector<64x32xbf16>
    %87 = vector.extract_strided_slice %42 {offsets = [2, 1, 0, 0], sizes = [1, 1, 32, 32], strides = [1, 1, 1, 1]} : vector<3x3x32x32xbf16> to vector<1x1x32x32xbf16>
    %88 = vector.shape_cast %87 : vector<1x1x32x32xbf16> to vector<32x32xbf16>
    %cst_94 = arith.constant dense<0.000000e+00> : vector<64x32xf32>
    %89 = tpu.matmul %86, %88, %cst_94 {dimension_numbers = #tpu.dot_dimension_numbers<[1], [0], [0], [1], [0, 0, 1, 1], [], []>} : vector<64x32xbf16>, vector<32x32xbf16>, vector<64x32xf32> -> vector<64x32xf32>
    %90 = arith.addf %84, %89 : vector<64x32xf32>
    %c2_95 = arith.constant 2 : index
    %c2_96 = arith.constant 2 : index
    %c0_97 = arith.constant 0 : index
    %91 = vector.load %arg11[%c2_95, %c2_96, %c0_97] : memref<10x10x32xbf16, #tpu.memory_space<vmem>>, vector<8x8x32xbf16>
    %92 = vector.shape_cast %91 : vector<8x8x32xbf16> to vector<64x32xbf16>
    %93 = vector.extract_strided_slice %42 {offsets = [2, 2, 0, 0], sizes = [1, 1, 32, 32], strides = [1, 1, 1, 1]} : vector<3x3x32x32xbf16> to vector<1x1x32x32xbf16>
    %94 = vector.shape_cast %93 : vector<1x1x32x32xbf16> to vector<32x32xbf16>
    %cst_98 = arith.constant dense<0.000000e+00> : vector<64x32xf32>
    %95 = tpu.matmul %92, %94, %cst_98 {dimension_numbers = #tpu.dot_dimension_numbers<[1], [0], [0], [1], [0, 0, 1, 1], [], []>} : vector<64x32xbf16>, vector<32x32xbf16>, vector<64x32xf32> -> vector<64x32xf32>
    %96 = arith.addf %90, %95 : vector<64x32xf32>
    %97 = vector.broadcast %43 : vector<1x32xf32> to vector<64x32xf32>
    %98 = arith.addf %96, %97 : vector<64x32xf32>
    %cst_99 = arith.constant 0.000000e+00 : f32
    %99 = vector.broadcast %cst_99 : f32 to vector<64x32xf32>
    %100 = arith.maximumf %98, %99 : vector<64x32xf32>
    %101 = arith.truncf %100 : vector<64x32xf32> to vector<64x32xbf16>
    %102 = vector.shape_cast %101 : vector<64x32xbf16> to vector<8x8x32xbf16>
    %c1_100 = arith.constant 1 : index
    %c1_101 = arith.constant 1 : index
    %c0_102 = arith.constant 0 : index
    %103 = vector.load %arg12[%c1_100, %c1_101, %c0_102] : memref<10x10x32xbf16, #tpu.memory_space<vmem>>, vector<8x8x32xbf16>
    tpu.vector_store %arg12[%c1_100, %c1_101, %c0_102], %102 {strides = array<i32>} : memref<10x10x32xbf16, #tpu.memory_space<vmem>>, vector<8x8x32xbf16>,
    %c0_103 = arith.constant 0 : index
    %c0_104 = arith.constant 0 : index
    %c0_105 = arith.constant 0 : index
    %c0_106 = arith.constant 0 : index
    %104 = vector.load %arg8[%c0_103, %c0_104, %c0_105, %c0_106] : memref<3x3x32x32xbf16, #tpu.memory_space<vmem>>, vector<3x3x32x32xbf16>
    %c0_107 = arith.constant 0 : index
    %c0_108 = arith.constant 0 : index
    %105 = vector.load %arg9[%c0_107, %c0_108] : memref<1x32xf32, #tpu.memory_space<vmem>>, vector<1x32xf32>
    %c0_109 = arith.constant 0 : index
    %c0_110 = arith.constant 0 : index
    %c0_111 = arith.constant 0 : index
    %106 = vector.load %arg12[%c0_109, %c0_110, %c0_111] : memref<10x10x32xbf16, #tpu.memory_space<vmem>>, vector<8x8x32xbf16>
    %107 = vector.shape_cast %106 : vector<8x8x32xbf16> to vector<64x32xbf16>
    %108 = vector.extract_strided_slice %104 {offsets = [0, 0, 0, 0], sizes = [1, 1, 32, 32], strides = [1, 1, 1, 1]} : vector<3x3x32x32xbf16> to vector<1x1x32x32xbf16>
    %109 = vector.shape_cast %108 : vector<1x1x32x32xbf16> to vector<32x32xbf16>
    %cst_112 = arith.constant dense<0.000000e+00> : vector<64x32xf32>
    %110 = tpu.matmul %107, %109, %cst_112 {dimension_numbers = #tpu.dot_dimension_numbers<[1], [0], [0], [1], [0, 0, 1, 1], [], []>} : vector<64x32xbf16>, vector<32x32xbf16>, vector<64x32xf32> -> vector<64x32xf32>
    %c0_113 = arith.constant 0 : index
    %c1_114 = arith.constant 1 : index
    %c0_115 = arith.constant 0 : index
    %111 = vector.load %arg12[%c0_113, %c1_114, %c0_115] : memref<10x10x32xbf16, #tpu.memory_space<vmem>>, vector<8x8x32xbf16>
    %112 = vector.shape_cast %111 : vector<8x8x32xbf16> to vector<64x32xbf16>
    %113 = vector.extract_strided_slice %104 {offsets = [0, 1, 0, 0], sizes = [1, 1, 32, 32], strides = [1, 1, 1, 1]} : vector<3x3x32x32xbf16> to vector<1x1x32x32xbf16>
    %114 = vector.shape_cast %113 : vector<1x1x32x32xbf16> to vector<32x32xbf16>
    %cst_116 = arith.constant dense<0.000000e+00> : vector<64x32xf32>
    %115 = tpu.matmul %112, %114, %cst_116 {dimension_numbers = #tpu.dot_dimension_numbers<[1], [0], [0], [1], [0, 0, 1, 1], [], []>} : vector<64x32xbf16>, vector<32x32xbf16>, vector<64x32xf32> -> vector<64x32xf32>
    %116 = arith.addf %110, %115 : vector<64x32xf32>
    %c0_117 = arith.constant 0 : index
    %c2_118 = arith.constant 2 : index
    %c0_119 = arith.constant 0 : index
    %117 = vector.load %arg12[%c0_117, %c2_118, %c0_119] : memref<10x10x32xbf16, #tpu.memory_space<vmem>>, vector<8x8x32xbf16>
    %118 = vector.shape_cast %117 : vector<8x8x32xbf16> to vector<64x32xbf16>
    %119 = vector.extract_strided_slice %104 {offsets = [0, 2, 0, 0], sizes = [1, 1, 32, 32], strides = [1, 1, 1, 1]} : vector<3x3x32x32xbf16> to vector<1x1x32x32xbf16>
    %120 = vector.shape_cast %119 : vector<1x1x32x32xbf16> to vector<32x32xbf16>
    %cst_120 = arith.constant dense<0.000000e+00> : vector<64x32xf32>
    %121 = tpu.matmul %118, %120, %cst_120 {dimension_numbers = #tpu.dot_dimension_numbers<[1], [0], [0], [1], [0, 0, 1, 1], [], []>} : vector<64x32xbf16>, vector<32x32xbf16>, vector<64x32xf32> -> vector<64x32xf32>
    %122 = arith.addf %116, %121 : vector<64x32xf32>
    %c1_121 = arith.constant 1 : index
    %c0_122 = arith.constant 0 : index
    %c0_123 = arith.constant 0 : index
    %123 = vector.load %arg12[%c1_121, %c0_122, %c0_123] : memref<10x10x32xbf16, #tpu.memory_space<vmem>>, vector<8x8x32xbf16>
    %124 = vector.shape_cast %123 : vector<8x8x32xbf16> to vector<64x32xbf16>
    %125 = vector.extract_strided_slice %104 {offsets = [1, 0, 0, 0], sizes = [1, 1, 32, 32], strides = [1, 1, 1, 1]} : vector<3x3x32x32xbf16> to vector<1x1x32x32xbf16>
    %126 = vector.shape_cast %125 : vector<1x1x32x32xbf16> to vector<32x32xbf16>
    %cst_124 = arith.constant dense<0.000000e+00> : vector<64x32xf32>
    %127 = tpu.matmul %124, %126, %cst_124 {dimension_numbers = #tpu.dot_dimension_numbers<[1], [0], [0], [1], [0, 0, 1, 1], [], []>} : vector<64x32xbf16>, vector<32x32xbf16>, vector<64x32xf32> -> vector<64x32xf32>
    %128 = arith.addf %122, %127 : vector<64x32xf32>
    %c1_125 = arith.constant 1 : index
    %c1_126 = arith.constant 1 : index
    %c0_127 = arith.constant 0 : index
    %129 = vector.load %arg12[%c1_125, %c1_126, %c0_127] : memref<10x10x32xbf16, #tpu.memory_space<vmem>>, vector<8x8x32xbf16>
    %130 = vector.shape_cast %129 : vector<8x8x32xbf16> to vector<64x32xbf16>
    %131 = vector.extract_strided_slice %104 {offsets = [1, 1, 0, 0], sizes = [1, 1, 32, 32], strides = [1, 1, 1, 1]} : vector<3x3x32x32xbf16> to vector<1x1x32x32xbf16>
    %132 = vector.shape_cast %131 : vector<1x1x32x32xbf16> to vector<32x32xbf16>
    %cst_128 = arith.constant dense<0.000000e+00> : vector<64x32xf32>
    %133 = tpu.matmul %130, %132, %cst_128 {dimension_numbers = #tpu.dot_dimension_numbers<[1], [0], [0], [1], [0, 0, 1, 1], [], []>} : vector<64x32xbf16>, vector<32x32xbf16>, vector<64x32xf32> -> vector<64x32xf32>
    %134 = arith.addf %128, %133 : vector<64x32xf32>
    %c1_129 = arith.constant 1 : index
    %c2_130 = arith.constant 2 : index
    %c0_131 = arith.constant 0 : index
    %135 = vector.load %arg12[%c1_129, %c2_130, %c0_131] : memref<10x10x32xbf16, #tpu.memory_space<vmem>>, vector<8x8x32xbf16>
    %136 = vector.shape_cast %135 : vector<8x8x32xbf16> to vector<64x32xbf16>
    %137 = vector.extract_strided_slice %104 {offsets = [1, 2, 0, 0], sizes = [1, 1, 32, 32], strides = [1, 1, 1, 1]} : vector<3x3x32x32xbf16> to vector<1x1x32x32xbf16>
    %138 = vector.shape_cast %137 : vector<1x1x32x32xbf16> to vector<32x32xbf16>
    %cst_132 = arith.constant dense<0.000000e+00> : vector<64x32xf32>
    %139 = tpu.matmul %136, %138, %cst_132 {dimension_numbers = #tpu.dot_dimension_numbers<[1], [0], [0], [1], [0, 0, 1, 1], [], []>} : vector<64x32xbf16>, vector<32x32xbf16>, vector<64x32xf32> -> vector<64x32xf32>
    %140 = arith.addf %134, %139 : vector<64x32xf32>
    %c2_133 = arith.constant 2 : index
    %c0_134 = arith.constant 0 : index
    %c0_135 = arith.constant 0 : index
    %141 = vector.load %arg12[%c2_133, %c0_134, %c0_135] : memref<10x10x32xbf16, #tpu.memory_space<vmem>>, vector<8x8x32xbf16>
    %142 = vector.shape_cast %141 : vector<8x8x32xbf16> to vector<64x32xbf16>
    %143 = vector.extract_strided_slice %104 {offsets = [2, 0, 0, 0], sizes = [1, 1, 32, 32], strides = [1, 1, 1, 1]} : vector<3x3x32x32xbf16> to vector<1x1x32x32xbf16>
    %144 = vector.shape_cast %143 : vector<1x1x32x32xbf16> to vector<32x32xbf16>
    %cst_136 = arith.constant dense<0.000000e+00> : vector<64x32xf32>
    %145 = tpu.matmul %142, %144, %cst_136 {dimension_numbers = #tpu.dot_dimension_numbers<[1], [0], [0], [1], [0, 0, 1, 1], [], []>} : vector<64x32xbf16>, vector<32x32xbf16>, vector<64x32xf32> -> vector<64x32xf32>
    %146 = arith.addf %140, %145 : vector<64x32xf32>
    %c2_137 = arith.constant 2 : index
    %c1_138 = arith.constant 1 : index
    %c0_139 = arith.constant 0 : index
    %147 = vector.load %arg12[%c2_137, %c1_138, %c0_139] : memref<10x10x32xbf16, #tpu.memory_space<vmem>>, vector<8x8x32xbf16>
    %148 = vector.shape_cast %147 : vector<8x8x32xbf16> to vector<64x32xbf16>
    %149 = vector.extract_strided_slice %104 {offsets = [2, 1, 0, 0], sizes = [1, 1, 32, 32], strides = [1, 1, 1, 1]} : vector<3x3x32x32xbf16> to vector<1x1x32x32xbf16>
    %150 = vector.shape_cast %149 : vector<1x1x32x32xbf16> to vector<32x32xbf16>
    %cst_140 = arith.constant dense<0.000000e+00> : vector<64x32xf32>
    %151 = tpu.matmul %148, %150, %cst_140 {dimension_numbers = #tpu.dot_dimension_numbers<[1], [0], [0], [1], [0, 0, 1, 1], [], []>} : vector<64x32xbf16>, vector<32x32xbf16>, vector<64x32xf32> -> vector<64x32xf32>
    %152 = arith.addf %146, %151 : vector<64x32xf32>
    %c2_141 = arith.constant 2 : index
    %c2_142 = arith.constant 2 : index
    %c0_143 = arith.constant 0 : index
    %153 = vector.load %arg12[%c2_141, %c2_142, %c0_143] : memref<10x10x32xbf16, #tpu.memory_space<vmem>>, vector<8x8x32xbf16>
    %154 = vector.shape_cast %153 : vector<8x8x32xbf16> to vector<64x32xbf16>
    %155 = vector.extract_strided_slice %104 {offsets = [2, 2, 0, 0], sizes = [1, 1, 32, 32], strides = [1, 1, 1, 1]} : vector<3x3x32x32xbf16> to vector<1x1x32x32xbf16>
    %156 = vector.shape_cast %155 : vector<1x1x32x32xbf16> to vector<32x32xbf16>
    %cst_144 = arith.constant dense<0.000000e+00> : vector<64x32xf32>
    %157 = tpu.matmul %154, %156, %cst_144 {dimension_numbers = #tpu.dot_dimension_numbers<[1], [0], [0], [1], [0, 0, 1, 1], [], []>} : vector<64x32xbf16>, vector<32x32xbf16>, vector<64x32xf32> -> vector<64x32xf32>
    %158 = arith.addf %152, %157 : vector<64x32xf32>
    %159 = vector.broadcast %105 : vector<1x32xf32> to vector<64x32xf32>
    %160 = arith.addf %158, %159 : vector<64x32xf32>
    %cst_145 = arith.constant 0.000000e+00 : f32
    %161 = vector.broadcast %cst_145 : f32 to vector<64x32xf32>
    %162 = arith.maximumf %160, %161 : vector<64x32xf32>
    %163 = vector.shape_cast %162 : vector<64x32xf32> to vector<8x8x32xf32>
    %164 = vector.extract_strided_slice %163 {offsets = [0, 0, 0], sizes = [8, 8, 16], strides = [1, 1, 1]} : vector<8x8x32xf32> to vector<8x8x16xf32>
    %c0_146 = arith.constant 0 : index
    %c0_147 = arith.constant 0 : index
    %c0_148 = arith.constant 0 : index
    %c0_149 = arith.constant 0 : index
    %c0_150 = arith.constant 0 : index
    %165 = vector.load %arg10[%c0_146, %c0_147, %c0_148, %c0_149, %c0_150] : memref<1x8x2x8x16xf32, #tpu.memory_space<vmem>>, vector<1x8x1x8x16xf32>
    %166 = vector.shape_cast %165 : vector<1x8x1x8x16xf32> to vector<8x8x16xf32>
    %167 = vector.shape_cast %164 : vector<8x8x16xf32> to vector<1x8x1x8x16xf32>
    tpu.vector_store %arg10[%c0_146, %c0_147, %c0_148, %c0_149, %c0_150], %167 {strides = array<i32>} : memref<1x8x2x8x16xf32, #tpu.memory_space<vmem>>, vector<1x8x1x8x16xf32>,
    %168 = vector.extract_strided_slice %163 {offsets = [0, 0, 16], sizes = [8, 8, 16], strides = [1, 1, 1]} : vector<8x8x32xf32> to vector<8x8x16xf32>
    %c0_151 = arith.constant 0 : index
    %c0_152 = arith.constant 0 : index
    %c1_153 = arith.constant 1 : index
    %c0_154 = arith.constant 0 : index
    %c0_155 = arith.constant 0 : index
    %169 = vector.load %arg10[%c0_151, %c0_152, %c1_153, %c0_154, %c0_155] : memref<1x8x2x8x16xf32, #tpu.memory_space<vmem>>, vector<1x8x1x8x16xf32>
    %170 = vector.shape_cast %169 : vector<1x8x1x8x16xf32> to vector<8x8x16xf32>
    %171 = vector.shape_cast %168 : vector<8x8x16xf32> to vector<1x8x1x8x16xf32>
    tpu.vector_store %arg10[%c0_151, %c0_152, %c1_153, %c0_154, %c0_155], %171 {strides = array<i32>} : memref<1x8x2x8x16xf32, #tpu.memory_space<vmem>>, vector<1x8x1x8x16xf32>,
    return
  }
  func.func @transform_0(%arg0: i32) -> (i32, i32, i32, i32) {
    %c0_i32 = arith.constant 0 : i32
    %c0_i32_0 = arith.constant 0 : i32
    %c0_i32_1 = arith.constant 0 : i32
    %c0_i32_2 = arith.constant 0 : i32
    return %arg0, %c0_i32, %c0_i32_0, %c0_i32_1 : i32, i32, i32, i32
  }
  func.func @transform_1(%arg0: i32) -> (i32, i32, i32, i32, i32) {
    %c0_i32 = arith.constant 0 : i32
    %c0_i32_0 = arith.constant 0 : i32
    %c0_i32_1 = arith.constant 0 : i32
    %c0_i32_2 = arith.constant 0 : i32
    %c0_i32_3 = arith.constant 0 : i32
    return %arg0, %c0_i32, %c0_i32_0, %c0_i32_1, %c0_i32_2 : i32, i32, i32, i32, i32
  }
  func.func @transform_2(%arg0: i32) -> (i32, i32) {
    %c0_i32 = arith.constant 0 : i32
    %c0_i32_0 = arith.constant 0 : i32
    %c0_i32_1 = arith.constant 0 : i32
    return %c0_i32, %c0_i32_0 : i32, i32
  }
  func.func @transform_3(%arg0: i32) -> (i32, i32) {
    %c0_i32 = arith.constant 0 : i32
    %c0_i32_0 = arith.constant 0 : i32
    %c0_i32_1 = arith.constant 0 : i32
    return %c0_i32, %c0_i32_0 : i32, i32
  }
  func.func @transform_4(%arg0: i32) -> (i32, i32) {
    %c0_i32 = arith.constant 0 : i32
    %c0_i32_0 = arith.constant 0 : i32
    %c0_i32_1 = arith.constant 0 : i32
    return %c0_i32, %c0_i32_0 : i32, i32
  }
  func.func @transform_5(%arg0: i32) -> (i32, i32, i32, i32) {
    %c0_i32 = arith.constant 0 : i32
    %c0_i32_0 = arith.constant 0 : i32
    %c0_i32_1 = arith.constant 0 : i32
    %c0_i32_2 = arith.constant 0 : i32
    %c0_i32_3 = arith.constant 0 : i32
    return %c0_i32, %c0_i32_0, %c0_i32_1, %c0_i32_2 : i32, i32, i32, i32
  }
  func.func @transform_6(%arg0: i32) -> (i32, i32) {
    %c0_i32 = arith.constant 0 : i32
    %c0_i32_0 = arith.constant 0 : i32
    %c0_i32_1 = arith.constant 0 : i32
    return %c0_i32, %c0_i32_0 : i32, i32
  }
  func.func @transform_7(%arg0: i32) -> (i32, i32, i32, i32) {
    %c0_i32 = arith.constant 0 : i32
    %c0_i32_0 = arith.constant 0 : i32
    %c0_i32_1 = arith.constant 0 : i32
    %c0_i32_2 = arith.constant 0 : i32
    %c0_i32_3 = arith.constant 0 : i32
    return %c0_i32, %c0_i32_0, %c0_i32_1, %c0_i32_2 : i32, i32, i32, i32
  }
  func.func @transform_8(%arg0: i32) -> (i32, i32) {
    %c0_i32 = arith.constant 0 : i32
    %c0_i32_0 = arith.constant 0 : i32
    %c0_i32_1 = arith.constant 0 : i32
    return %c0_i32, %c0_i32_0 : i32, i32
  }
  func.func @transform_9(%arg0: i32) -> (i32, i32, i32, i32, i32) {
    %c0_i32 = arith.constant 0 : i32
    %c0_i32_0 = arith.constant 0 : i32
    %c0_i32_1 = arith.constant 0 : i32
    %c0_i32_2 = arith.constant 0 : i32
    %c0_i32_3 = arith.constant 0 : i32
    return %arg0, %c0_i32, %c0_i32_0, %c0_i32_1, %c0_i32_2 : i32, i32, i32, i32, i32
  }
}

</mosaic_0001>

<bundles_post_ra>
// kernel: tile.23
= control target key start
LH: loop header
LB: loop body
LE: loop exit
PB: predicated region body
PF: predicated region fallthrough
CT: control target
= control target key end

     0   :  { %s22_s0 = inlined_call_operand.vmem [shape: f32[8], index: 0, kind: input, shape index: {}]   ;;  %s23_s1 = inlined_call_operand.vmem [shape: f32[4,8], index: 1, kind: output, shape index: {}]  }
   0x1   :  { %v4_v0 = vld [vmem:[%s22_s0] ss:$0 sm:$0xff] }
   0x2   :  { %5 = vst [vmem:[%s23_s1] sm:$0xf] %v4_v0 }

// kernel: tile.24
= control target key start
LH: loop header
LB: loop body
LE: loop exit
PB: predicated region body
PF: predicated region fallthrough
CT: control target
= control target key end

     0   :  { %s37_s8 = smov 8   ;;  %s38_s9 = smov 16   ;;  %vm7_vm0 = vcmask 64512   ;;  %vm13_vm1 = vcmask 261312   ;;  %vm19_vm2 = vcmask 195712   ;;  %vm25_vm3 = vcmask 130112   ;;  %s55_s0 = inlined_call_operand.vmem [shape: f32[4,8], index: 0, kind: input, shape index: {}]   ;;  %s56_s1 = inlined_call_operand.vmem [shape: f32[1,32], index: 1, kind: output, shape index: {}]  }
   0x1   :  { %v4_v0 = vld [vmem:[%s55_s0] sm:$0xf]  ;;  %s36_s0 = smov 24  }
   0x2   :  { %5 = vst [vmem:[#allocation1] sm:$0xf] %v4_v0 }
   0x9   :  { %v10_v1 = vld [vmem:[#allocation1 + $0x3] sm:$0x1]   ;;  %v22_v2 = vld [vmem:[#allocation1 + $0x1] sm:$0x1]   ;;  %v16_v3 = vld [vmem:[#allocation1 + $0x2] sm:$0x1]  }
   0xa   :  { %11 = vrot.lane.b32.xlu0 %v10_v1, %s36_s0  ;;  %23 = vrot.lane.b32.xlu1 %v22_v2, %s37_s8  ;;  %v6_v4 = vld [vmem:[#allocation1] sm:$0x1]  }
   0xb   :  { %8 = vst.msk [vmem:[#allocation0] sm:$0x1] %vm7_vm0, %v6_v4  }
  0x12   :  { %17 = vrot.lane.b32.xlu0 %v16_v3, %s38_s9 }
  0x7c   :  { %v12_v5 = vpop.permute.xlu0 %11   ;;  %v24_v6 = vpop.permute.xlu1 %23  }
  0x7d   :  { %14 = vst.msk [vmem:[#allocation0] sm:$0x1] %vm13_vm1, %v12_v5  }
  0x84   :  { %v18_v7 = vpop.permute.xlu0 %17  }
  0x85   :  { %20 = vst.msk [vmem:[#allocation0] sm:$0x1] %vm19_vm2, %v18_v7  }
  0x86   :  { %26 = vst.msk [vmem:[#allocation0] sm:$0x1] %vm25_vm3, %v24_v6  }
  0x8d   :  { %v29_v8 = vld [vmem:[#allocation0] sm:$0x1] }
  0x8e   :  { %32 = vst [vmem:[%s56_s1] sm:$0x1] %v29_v8 }

// kernel: tile.18
= control target key start
LH: loop header
LB: loop body
LE: loop exit
PB: predicated region body
PF: predicated region fallthrough
CT: control target
= control target key end

     0   :  { %s22_s0 = inlined_call_operand.vmem [shape: f32[4], index: 0, kind: input, shape index: {}]   ;;  %s23_s1 = inlined_call_operand.vmem [shape: f32[4,4], index: 1, kind: output, shape index: {}]  }
   0x1   :  { %v4_v0 = vld [vmem:[%s22_s0] ss:$0 sm:$0xff] }
   0x2   :  { %5 = vst [vmem:[%s23_s1] sm:$0xf] %v4_v0 }

// kernel: tile.19
= control target key start
LH: loop header
LB: loop body
LE: loop exit
PB: predicated region body
PF: predicated region fallthrough
CT: control target
= control target key end

     0   :  { %s37_s8 = smov 4   ;;  %s38_s9 = smov 8   ;;  %vm7_vm0 = vcmask 31744   ;;  %vm13_vm1 = vcmask 130144   ;;  %vm19_vm2 = vcmask 97344   ;;  %vm25_vm3 = vcmask 64544   ;;  %s55_s0 = inlined_call_operand.vmem [shape: f32[4,4], index: 0, kind: input, shape index: {}]   ;;  %s56_s1 = inlined_call_operand.vmem [shape: f32[1,16], index: 1, kind: output, shape index: {}]  }
   0x1   :  { %v4_v0 = vld [vmem:[%s55_s0] sm:$0xf]  ;;  %s36_s0 = smov 12  }
   0x2   :  { %5 = vst [vmem:[#allocation1] sm:$0xf] %v4_v0 }
   0x9   :  { %v10_v1 = vld [vmem:[#allocation1 + $0x3] sm:$0x1]   ;;  %v22_v2 = vld [vmem:[#allocation1 + $0x1] sm:$0x1]   ;;  %v16_v3 = vld [vmem:[#allocation1 + $0x2] sm:$0x1]  }
   0xa   :  { %11 = vrot.lane.b32.xlu0 %v10_v1, %s36_s0  ;;  %23 = vrot.lane.b32.xlu1 %v22_v2, %s37_s8  ;;  %v6_v4 = vld [vmem:[#allocation1] sm:$0x1]  }
   0xb   :  { %8 = vst.msk [vmem:[#allocation0] sm:$0x1] %vm7_vm0, %v6_v4  }
  0x12   :  { %17 = vrot.lane.b32.xlu0 %v16_v3, %s38_s9 }
  0x7c   :  { %v12_v5 = vpop.permute.xlu0 %11   ;;  %v24_v6 = vpop.permute.xlu1 %23  }
  0x7d   :  { %14 = vst.msk [vmem:[#allocation0] sm:$0x1] %vm13_vm1, %v12_v5  }
  0x84   :  { %v18_v7 = vpop.permute.xlu0 %17  }
  0x85   :  { %20 = vst.msk [vmem:[#allocation0] sm:$0x1] %vm19_vm2, %v18_v7  }
  0x86   :  { %26 = vst.msk [vmem:[#allocation0] sm:$0x1] %vm25_vm3, %v24_v6  }
  0x8d   :  { %v29_v8 = vld [vmem:[#allocation0] sm:$0x1] }
  0x8e   :  { %32 = vst [vmem:[%s56_s1] sm:$0x1] %v29_v8 }

// kernel: decoder_block_forward.1
= control target key start
LH: loop header
LB: loop body
LE: loop exit
PB: predicated region body
PF: predicated region fallthrough
CT: control target
= control target key end

     0   :  { %s4645_s30 = smov 0   ;;  %s5804_s0 = inlined_call_operand.vmem [shape: bf16[2,8,8,8], index: 0, kind: input, shape index: {}]   ;;  %s5805_s1 = inlined_call_operand.vmem [shape: bf16[2,8,2,8,8], index: 1, kind: input, shape index: {}]   ;;  %s5806_s2 = inlined_call_operand.vmem [shape: bf16[8,16], index: 2, kind: input, shape index: {}]   ;;  %s5807_s3 = inlined_call_operand.vmem [shape: f32[1,16], index: 3, kind: input, shape index: {}]   ;;  %s5808_s4 = inlined_call_operand.vmem [shape: bf16[8,8], index: 4, kind: input, shape index: {}]   ;;  %s5809_s5 = inlined_call_operand.vmem [shape: bf16[3,3,32,32], index: 5, kind: input, shape index: {}]   ;;  %s5810_s6 = inlined_call_operand.vmem [shape: f32[1,32], index: 6, kind: input, shape index: {}]   ;;  %s5811_s7 = inlined_call_operand.vmem [shape: bf16[3,3,32,32], index: 7, kind: input, shape index: {}]   ;;  %s5812_s8 = inlined_call_operand.vmem [shape: f32[1,32], index: 8, kind: input, shape index: {}]   ;;  %s5813_s9 = inlined_call_operand.vmem [shape: f32[2,8,2,8,16], index: 9, kind: output, shape index: {}]  }
   0x1 LB: > { %s4041_s10 = sadd.s32 4294967295, %s4589_s30   ;;  %p4045_p0 = scmp.ge.s32.totalorder %s4589_s30, 1  ;;  %s4589_s30 = sphi %s4645_s30, %s19_s30  }
   0x2   : > { %p297_p1 = scmp.lt.s32.totalorder %s4589_s30, 3 }
   0x4   : > { %p298_p2 = pnand %p4045_p0, %p297_p1 }
   0x5   : > { %p338_p3 = scmp.lt.s32.totalorder (!%p298_p2), %s4041_s10, 1  ;;  %s4591_s25 = smov (!%p298_p2), 16  }
   0x6   : > { %301 = sbr.rel (%p298_p2) target bundleno = 1059 (0x423), region = 56  ;;  %s4592_s26 = smov (!%p298_p2), 24  }
   0xb   : > { %v499_v0 = vld [vmem:[%s5806_s2] sm:$0xf]  ;;  %vm537_vm0 = vcmask 1043456   ;;  %s5837_s10 = smov (!%p338_p3, %s4041_s10), 1  ;;  %vm524_vm1 = vcmask 64512   ;;  %vm356_vm2 = vcmask 253952  }
   0xc   : > { %v539_v1 = vsel %vm537_vm0, %v499_v0, 0  ;;  %v711_v2 = vld [vmem:[%s5808_s4] sm:$0xf]  ;;  %s4490_s15 = sshll.u32 %s5837_s10, 5  ;;  %s4491_s19 = sshll.u32 %s5837_s10, 6  ;;  %vm659_vm7 = vcmask 125952  }
   0xd   : > { %4565 = vmatpush.bf16.msra.mxu1 %v539_v1  ;;  %4566 = vmatpush.bf16.msra.mxu2 %v539_v1  ;;  %v753_v3 = vsel %vm537_vm0, %v711_v2, 0  ;;  %s4665_s18 = scalar_lea.vmem %s5804_s0, %s4490_s15  ;;  %s4675_s22 = scalar_lea.vmem %s5805_s1, %s4491_s19  ;;  %vm362_vm3 = vsmask.f32 256  ;;  %v373_v19 = vld [vmem:[#allocation2 + $0x18] sm:$0x1]  ;;  %vm664_vm8 = vcmask 122880  }
   0xe   : > { %548 = vmatpush.bf16.msra.mxu0 %v539_v1  ;;  %4567 = vmatpush.bf16.msra.mxu3 %v539_v1  ;;  %v4494_v4 = vld [vmem:[%s4665_s18 + $0x8] sm:$0xff]  ;;  %v4495_v5 = vld [vmem:[%s4665_s18 + $0x10] sm:$0xff]  ;;  %v4074_v6 = vld [vmem:[%s4675_s22] sm:$0xf]  ;;  %vm394_vm4 = vsmask.f32 7938 }
   0xf   : > { %v4497_v7 = vld [vmem:[%s4675_s22 + $0x4] sm:$0xf0]  ;;  %v4102_v8 = vld [vmem:[%s4675_s22 + $0x4] sm:$0xf]  ;;  %v4501_v9 = vld [vmem:[%s4675_s22 + $0x8] sm:$0xf0] }
  0x10   : > { %4069 = vmatmul.msk.bf16.vlgmr.msra.gmra.mxu1 %vm524_vm1, %v4494_v4  ;;  %4070 = vmatmul.msk.bf16.vlgmr.msra.gmra.mxu2 %vm524_vm1, %v4495_v5  ;;  %v4075_v10 = vor.u32 %v4497_v7, %v4074_v6  ;;  %v4103_v11 = vor.u32 %v4501_v9, %v4102_v8  ;;  %v4078_v12 = vld [vmem:[%s4675_s22 + $0x10] sm:$0xf]  ;;  %v4498_v13 = vld [vmem:[%s4675_s22 + $0x14] sm:$0xf0]  ;;  %v4106_v14 = vld [vmem:[%s4675_s22 + $0x14] sm:$0xf] }
  0x11   : > { %1004 = vmatpush.bf16.msrb.mxu2 %v753_v3  ;;  %762 = vmatpush.bf16.msrb.mxu1 %v753_v3  ;;  %v4502_v15 = vld [vmem:[%s4675_s22 + $0x18] sm:$0xf0]  ;;  %v4079_v16 = vor.u32 %v4498_v13, %v4078_v12  ;;  %v4493_v18 = vld [vmem:[%s4665_s18] sm:$0xff]  ;;  %vm4693_vm5 = vmand %vm356_vm2, %vm362_vm3  ;;  %vm354_vm11 = vcmask 257024   ;;  %vm904_vm12 = vcmask 191616   ;;  %vm1146_vm14 = vcmask 257216  }
  0x12   : > { %v4107_v17 = vor.u32 %v4502_v15, %v4106_v14  ;;  %4068 = vmatmul.msk.bf16.vlgmr.msra.gmra.mxu0 %vm524_vm1, %v4493_v18  ;;  %v405_v21 = vld [vmem:[#allocation2 + $0x1c] sm:$0x1]  ;;  %v374_v22 = vsel %vm4693_vm5, 0, %v373_v19  ;;  %vm4701_vm6 = vmand %vm356_vm2, %vm394_vm4  ;;  %v4082_v25 = vld [vmem:[%s4675_s22 + $0x20] sm:$0xf]  ;;  %vm909_vm0 = vcmask 188544  }
  0x13   : > { %375 = vst [vmem:[#allocation2 + $0x18] sm:$0x1] %v374_v22  ;;  %v406_v24 = vsel %vm4701_vm6, 0, %v405_v21  ;;  %v4499_v26 = vld [vmem:[%s4675_s22 + $0x24] sm:$0xf0]  ;;  %v4496_v49 = vld [vmem:[%s4665_s18 + $0x18] sm:$0xff]  ;;  %vm4740_vm9 = vmand %vm659_vm7, %vm394_vm4 }
  0x14   : > { %407 = vst [vmem:[#allocation2 + $0x1c] sm:$0x1] %v406_v24  ;;  %v4110_v27 = vld [vmem:[%s4675_s22 + $0x24] sm:$0xf]  ;;  %v4503_v28 = vld [vmem:[%s4675_s22 + $0x28] sm:$0xf0]  ;;  %v4083_v29 = vor.u32 %v4499_v26, %v4082_v25  ;;  %4071 = vmatmul.msk.bf16.vlgmr.msra.gmra.mxu3 %vm524_vm1, %v4496_v49  ;;  %vm4746_vm10 = vmand %vm664_vm8, %vm362_vm3 }
  0x15   : > { %v4111_v30 = vor.u32 %v4503_v28, %v4110_v27  ;;  %v4086_v31 = vld [vmem:[%s4675_s22 + $0x30] sm:$0xf]  ;;  %v4500_v32 = vld [vmem:[%s4675_s22 + $0x34] sm:$0xf0]  ;;  %v4114_v33 = vld [vmem:[%s4675_s22 + $0x34] sm:$0xf] }
  0x16   : > { %v4504_v34 = vld [vmem:[%s4675_s22 + $0x38] sm:$0xf0]  ;;  %v4087_v35 = vor.u32 %v4500_v32, %v4086_v31  ;;  %v379_v37 = vld [vmem:[#allocation2 + $0x28] sm:$0x1]  ;;  %v411_v38 = vld [vmem:[#allocation2 + $0x2c] sm:$0x1] }
  0x17   : > { %v4115_v36 = vor.u32 %v4504_v34, %v4114_v33  ;;  %v380_v39 = vsel %vm4693_vm5, 0, %v379_v37  ;;  %v412_v40 = vsel %vm4701_vm6, 0, %v411_v38  ;;  %v376_v41 = vld [vmem:[#allocation2 + $0x20] sm:$0x1]  ;;  %v408_v42 = vld [vmem:[#allocation2 + $0x24] sm:$0x1]  ;;  %vm4835_vm13 = vmand %vm904_vm12, %vm394_vm4 }
  0x18   : > { %381 = vst [vmem:[#allocation2 + $0x28] sm:$0x1] %v380_v39  ;;  %v377_v43 = vsel %vm4693_vm5, 0, %v376_v41  ;;  %v409_v44 = vsel %vm4701_vm6, 0, %v408_v42  ;;  %v382_v45 = vld [vmem:[#allocation2 + $0x30] sm:$0x1]  ;;  %vm4855_vm15 = vmand %vm1146_vm14, %vm394_vm4 }
  0x19   : > { %413 = vst [vmem:[#allocation2 + $0x2c] sm:$0x1] %v412_v40  ;;  %v414_v46 = vld [vmem:[#allocation2 + $0x34] sm:$0x1]  ;;  %v383_v47 = vsel %vm4693_vm5, 0, %v382_v45  ;;  %vm1390_vm8 = vcmask 261120  }
  0x1a   : > { %378 = vst [vmem:[#allocation2 + $0x20] sm:$0x1] %v377_v43  ;;  %v415_v48 = vsel %vm4701_vm6, 0, %v414_v46  ;;  %v4735_v50 = vld [vmem:[%s5807_s3] ss:$0 sm:$0xff]  ;;  %vm1529_vm12 = vcmask 1042432  }
  0x1b   : > { %410 = vst [vmem:[#allocation2 + $0x24] sm:$0x1] %v409_v44  ;;  %v675_v61 = vld [vmem:[#allocation2 + $0x18] sm:$0xf]  ;;  %v678_v62 = vld [vmem:[#allocation2 + $0x1c] sm:$0x1] }
  0x1c   : > { %384 = vst [vmem:[#allocation2 + $0x30] sm:$0x1] %v383_v47  ;;  %vm1530_vm14 = vcmask 1046532   ;;  %s4492_s27 = sshll.u32 %s5837_s10, 7  ;;  %s4594_s10 = smov 112  }
  0x1d   : > { %416 = vst [vmem:[#allocation2 + $0x34] sm:$0x1] %v415_v48  ;;  %s5731_s11 = scalar_lea.vmem %s5813_s9, %s4492_s27 }
  0x20   : > { %4088 = vmatmul.msk.bf16.vlgmr.msrb.gmra.mxu1 %vm524_vm1, %v4075_v10  ;;  %4116 = vmatmul.msk.bf16.vlgmr.msrb.gmra.mxu2 %vm524_vm1, %v4103_v11  ;;  %v687_v10 = vld [vmem:[#allocation2 + $0x28] sm:$0xf]  ;;  %v690_v11 = vld [vmem:[#allocation2 + $0x2c] sm:$0x1] }
  0x21   : > { %v681_v24 = vld [vmem:[#allocation2 + $0x20] sm:$0xf] }
  0x22   : > { %v684_v25 = vld [vmem:[#allocation2 + $0x24] sm:$0x1] }
  0x23   : > { %v693_v38 = vld [vmem:[#allocation2 + $0x30] sm:$0xf] }
  0x24   : > { %v696_v39 = vld [vmem:[#allocation2 + $0x34] sm:$0x1] }
  0x30   : > { %4089 = vmatmul.msk.bf16.gmra.mxu1 %vm524_vm1, %v4079_v16  ;;  %4117 = vmatmul.msk.bf16.gmra.mxu2 %vm524_vm1, %v4107_v17 }
  0x40   : > { %4090 = vmatmul.msk.bf16.gmra.mxu1 %vm524_vm1, %v4083_v29  ;;  %4118 = vmatmul.msk.bf16.gmra.mxu2 %vm524_vm1, %v4111_v30 }
  0x50   : > { %4091 = vmatmul.msk.bf16.gmra.mxu1 %vm524_vm1, %v4087_v35  ;;  %4119 = vmatmul.msk.bf16.gmra.mxu2 %vm524_vm1, %v4115_v36  ;;  %vm4882_vm1 = vmand %vm909_vm0, %vm362_vm3  ;;  %vm1251_vm0 = vsmask.f32 3328 }
  0x8d   : > { %v555_v51 = vpop.f32.mrf.mxu1 }
  0x8e   : > { %v556_v52 = vadd.f32 %v4735_v50, %v555_v51 }
  0x90   : > { %v572_v53 = vpack.c.bf16 %v556_v52, %v556_v52 }
  0x92   : > { %v595_v54 = vshrl.u32 %v572_v53, 16  ;;  %v598_v55 = vshll.u32 %v572_v53, 16 }
  0x93   : > { %v560_v56 = vpop.f32.mrf.mxu2 }
  0x94   : > { %v597_v57 = vrot.slane %v595_v54, 7  ;;  %v561_v59 = vadd.f32 %v4735_v50, %v560_v56 }
  0x95   : > { %v557_v63 = vpop.f32.mrf.mxu1 }
  0x96   : > { %v600_v0 = vor.u32 %v598_v55, %v597_v57  ;;  %v601_v1 = vrot.slane %v597_v57, 4  ;;  %v574_v2 = vpack.c.bf16 %v561_v59, %v561_v59  ;;  %v558_v3 = vadd.f32 %v4735_v50, %v557_v63 }
  0x98   : > { %v676_v4 = vsel %vm4740_vm9, %v600_v0, %v675_v61  ;;  %v679_v5 = vsel %vm4746_vm10, %v601_v1, %v678_v62  ;;  %v611_v6 = vshrl.u32 %v574_v2, 16  ;;  %v573_v7 = vpack.c.bf16 %v558_v3, %v558_v3 }
  0x99   : > { %677 = vst [vmem:[#allocation2 + $0x18] sm:$0xf] %v676_v4  ;;  %v614_v9 = vshll.u32 %v574_v2, 16 }
  0x9a   : > { %680 = vst [vmem:[#allocation2 + $0x1c] sm:$0x1] %v679_v5  ;;  %v613_v8 = vrot.slane %v611_v6, 7  ;;  %v603_v12 = vshrl.u32 %v573_v7, 16  ;;  %v606_v18 = vshll.u32 %v573_v7, 16 }
  0x9b   : > { %v562_v13 = vpop.f32.mrf.mxu2 }
  0x9c   : > { %v616_v14 = vor.u32 %v614_v9, %v613_v8  ;;  %v617_v15 = vrot.slane %v613_v8, 4  ;;  %v563_v16 = vadd.f32 %v4735_v50, %v562_v13  ;;  %v605_v17 = vrot.slane %v603_v12, 7 }
  0x9d   : > { %v764_v19 = vpop.f32.mrf.mxu1 }
  0x9e   : > { %v688_v21 = vsel %vm4740_vm9, %v616_v14, %v687_v10  ;;  %v691_v22 = vsel %vm4746_vm10, %v617_v15, %v690_v11  ;;  %v575_v26 = vpack.c.bf16 %v563_v16, %v563_v16  ;;  %v784_v27 = vpack.c.bf16 %v764_v19, %v764_v19 }
  0x9f   : > { %689 = vst [vmem:[#allocation2 + $0x28] sm:$0xf] %v688_v21  ;;  %v608_v28 = vor.u32 %v606_v18, %v605_v17  ;;  %v609_v29 = vrot.slane %v605_v17, 4 }
  0xa0   : > { %692 = vst [vmem:[#allocation2 + $0x2c] sm:$0x1] %v691_v22  ;;  %v619_v30 = vshrl.u32 %v575_v26, 16  ;;  %v793_v31 = vshrl.u32 %v784_v27, 16  ;;  %v796_v32 = vshll.u32 %v784_v27, 16  ;;  %v622_v36 = vshll.u32 %v575_v26, 16 }
  0xa1   : > { %v682_v33 = vsel %vm4740_vm9, %v608_v28, %v681_v24  ;;  %v685_v34 = vsel %vm4746_vm10, %v609_v29, %v684_v25 }
  0xa2   : > { %683 = vst [vmem:[#allocation2 + $0x20] sm:$0xf] %v682_v33  ;;  %v621_v35 = vrot.slane %v619_v30, 7  ;;  %v795_v37 = vrot.slane %v793_v31, 7 }
  0xa3   : > { %686 = vst [vmem:[#allocation2 + $0x24] sm:$0x1] %v685_v34  ;;  %v1006_v40 = vpop.f32.mrf.mxu2 }
  0xa4   : > { %v624_v41 = vor.u32 %v622_v36, %v621_v35  ;;  %v625_v42 = vrot.slane %v621_v35, 4  ;;  %v1026_v43 = vpack.c.bf16 %v1006_v40, %v1006_v40  ;;  %v798_v44 = vor.u32 %v796_v32, %v795_v37 }
  0xa5   : > { %v766_v45 = vpop.f32.mrf.mxu1  ;;  %v799_v61 = vrot.slane %v795_v37, 4 }
  0xa6   : > { %v694_v46 = vsel %vm4740_vm9, %v624_v41, %v693_v38  ;;  %v697_v47 = vsel %vm4746_vm10, %v625_v42, %v696_v39  ;;  %v1035_v48 = vshrl.u32 %v1026_v43, 16  ;;  %856 = vrot.lane.b32.xlu0 %v798_v44, %s4591_s25  ;;  %v785_v49 = vpack.c.bf16 %v766_v45, %v766_v45  ;;  %v367_v42 = vld [vmem:[#allocation2 + $0x8] sm:$0x1]  ;;  %v550_v44 = vpop.f32.mrf.mxu0 }
  0xa7   : > { %695 = vst [vmem:[#allocation2 + $0x30] sm:$0xf] %v694_v46  ;;  %v1038_v52 = vshll.u32 %v1026_v43, 16  ;;  %v399_v43 = vld [vmem:[#allocation2 + $0xc] sm:$0x1] }
  0xa8   : > { %698 = vst [vmem:[#allocation2 + $0x34] sm:$0x1] %v697_v47  ;;  %v1037_v51 = vrot.slane %v1035_v48, 7  ;;  %v801_v53 = vshrl.u32 %v785_v49, 16  ;;  %v804_v57 = vshll.u32 %v785_v49, 16  ;;  %v368_v47 = vsel %vm4693_vm5, 0, %v367_v42 }
  0xa9   : > { %v400_v48 = vsel %vm4701_vm6, 0, %v399_v43  ;;  %v551_v49 = vadd.f32 %v4735_v50, %v550_v44  ;;  %369 = vst [vmem:[#allocation2 + $0x8] sm:$0x1] %v368_v47 }
  0xaa   : > { %v1040_v54 = vor.u32 %v1038_v52, %v1037_v51  ;;  %v803_v56 = vrot.slane %v801_v53, 7  ;;  %v1041_v3 = vrot.slane %v1037_v51, 4  ;;  %401 = vst [vmem:[#allocation2 + $0xc] sm:$0x1] %v400_v48 }
  0xab   : > { %v1008_v55 = vpop.f32.mrf.mxu2 }
  0xac   : > { %v1027_v59 = vpack.c.bf16 %v1008_v55, %v1008_v55  ;;  %1098 = vrot.lane.b32.xlu1 %v1040_v54, %s4592_s26  ;;  %v806_v63 = vor.u32 %v804_v57, %v803_v56  ;;  %v807_v7 = vrot.slane %v803_v56, 4  ;;  %v570_v55 = vpack.c.bf16 %v551_v49, %v551_v49 }
  0xad   : > { %v769_v62 = vpop.f32.mrf.mxu1 }
  0xae   : > { %v1043_v0 = vshrl.u32 %v1027_v59, 16  ;;  %858 = vrot.lane.b32.xlu0 %v799_v61, %s4591_s25  ;;  %860 = vrot.lane.b32.xlu2 %v806_v63, %s4591_s25  ;;  %v786_v2 = vpack.c.bf16 %v769_v62, %v769_v62  ;;  %v1046_v4 = vshll.u32 %v1027_v59, 16  ;;  %v579_v61 = vshrl.u32 %v570_v55, 16 }
  0xaf   : > { %v582_v62 = vshll.u32 %v570_v55, 16 }
  0xb0   : > { %v1045_v1 = vrot.slane %v1043_v0, 7  ;;  %v809_v8 = vshrl.u32 %v786_v2, 16  ;;  %v812_v16 = vshll.u32 %v786_v2, 16  ;;  %v581_v2 = vrot.slane %v579_v61, 7 }
  0xb2   : > { %v1048_v10 = vor.u32 %v1046_v4, %v1045_v1  ;;  %v811_v15 = vrot.slane %v809_v8, 7  ;;  %v1049_v17 = vrot.slane %v1045_v1, 4  ;;  %v584_v8 = vor.u32 %v582_v62, %v581_v2 }
  0xb3   : > { %v1011_v5 = vpop.f32.mrf.mxu2 }
  0xb4   : > { %v1028_v6 = vpack.c.bf16 %v1011_v5, %v1011_v5  ;;  %1100 = vrot.lane.b32.xlu1 %v1041_v3, %s4592_s26  ;;  %v814_v22 = vor.u32 %v812_v16, %v811_v15  ;;  %v815_v29 = vrot.slane %v811_v15, 4  ;;  %v370_v5 = vld [vmem:[#allocation2 + $0x10] sm:$0x1]  ;;  %v666_v15 = vld [vmem:[#allocation2 + $0xc] sm:$0x1] }
  0xb5   : > { %v771_v9 = vpop.f32.mrf.mxu1 }
  0xb6   : > { %v1051_v11 = vshrl.u32 %v1028_v6, 16  ;;  %v1054_v12 = vshll.u32 %v1028_v6, 16  ;;  %862 = vrot.lane.b32.xlu0 %v807_v7, %s4591_s25  ;;  %1102 = vrot.lane.b32.xlu2 %v1048_v10, %s4592_s26  ;;  %v787_v14 = vpack.c.bf16 %v771_v9, %v771_v9  ;;  %v402_v6 = vld [vmem:[#allocation2 + $0x14] sm:$0x1]  ;;  %v552_v7 = vpop.f32.mrf.mxu0  ;;  %v585_v9 = vrot.slane %v581_v2, 4 }
  0xb7   : > { %v661_v10 = vld [vmem:[#allocation2 + $0x8] sm:$0xf]  ;;  %v553_v16 = vadd.f32 %v4735_v50, %v552_v7 }
  0xb8   : > { %v1053_v13 = vrot.slane %v1051_v11, 7  ;;  %v817_v19 = vshrl.u32 %v787_v14, 16  ;;  %v820_v27 = vshll.u32 %v787_v14, 16  ;;  %v371_v11 = vsel %vm4693_vm5, 0, %v370_v5  ;;  %v4506_v5 = vld [vmem:[%s5809_s5 + $0x8] sm:$0xff] }
  0xb9   : > { %372 = vst [vmem:[#allocation2 + $0x10] sm:$0x1] %v371_v11  ;;  %1482 = vmatpush.bf16.msrb.mxu0 %v4506_v5 }
  0xba   : > { %v1056_v18 = vor.u32 %v1054_v12, %v1053_v13  ;;  %v819_v26 = vrot.slane %v817_v19, 7  ;;  %v1057_v32 = vrot.slane %v1053_v13, 4  ;;  %v403_v12 = vsel %vm4701_vm6, 0, %v402_v6  ;;  %v4512_v6 = vld [vmem:[%s5809_s5 + $0x38] sm:$0xff] }
  0xbb   : > { %v1013_v24 = vpop.f32.mrf.mxu2  ;;  %404 = vst [vmem:[#allocation2 + $0x14] sm:$0x1] %v403_v12  ;;  %1695 = vmatpush.bf16.msra.mxu2 %v4512_v6 }
  0xbc   : > { %1104 = vrot.lane.b32.xlu1 %v1049_v17, %s4592_s26  ;;  %v822_v30 = vor.u32 %v820_v27, %v819_v26  ;;  %v1029_v33 = vpack.c.bf16 %v1013_v24, %v1013_v24  ;;  %v823_v46 = vrot.slane %v819_v26, 4  ;;  %v662_v17 = vsel %vm4740_vm9, %v584_v8, %v661_v10 }
  0xbd   : > { %v774_v21 = vpop.f32.mrf.mxu1  ;;  %663 = vst [vmem:[#allocation2 + $0x8] sm:$0xf] %v662_v17  ;;  %v417_v17 = vld [vmem:[#allocation2 + $0x3c] sm:$0x1] }
  0xbe   : > { %v788_v25 = vpack.c.bf16 %v774_v21, %v774_v21  ;;  %1106 = vrot.lane.b32.xlu0 %v1056_v18, %s4592_s26  ;;  %864 = vrot.lane.b32.xlu2 %v814_v22, %s4591_s25  ;;  %v1059_v38 = vshrl.u32 %v1029_v33, 16  ;;  %v1062_v56 = vshll.u32 %v1029_v33, 16  ;;  %v667_v18 = vsel %vm4746_vm10, %v585_v9, %v666_v15 }
  0xbf   : > { %v571_v22 = vpack.c.bf16 %v553_v16, %v553_v16  ;;  %668 = vst [vmem:[#allocation2 + $0xc] sm:$0x1] %v667_v18  ;;  %v385_v16 = vld [vmem:[#allocation2 + $0x38] sm:$0x1] }
  0xc0   : > { %v825_v28 = vshrl.u32 %v788_v25, 16  ;;  %v828_v35 = vshll.u32 %v788_v25, 16  ;;  %v1061_v51 = vrot.slane %v1059_v38, 7  ;;  %v669_v33 = vld [vmem:[#allocation2 + $0x10] sm:$0xf]  ;;  %v386_v18 = vsel %vm4693_vm5, 0, %v385_v16 }
  0xc1   : > { %v587_v26 = vshrl.u32 %v571_v22, 16  ;;  %387 = vst [vmem:[#allocation2 + $0x38] sm:$0x1] %v386_v18 }
  0xc2   : > { %v827_v34 = vrot.slane %v825_v28, 7  ;;  %v1064_v0 = vor.u32 %v1062_v56, %v1061_v51  ;;  %v1065_v4 = vrot.slane %v1061_v51, 4 }
  0xc3   : > { %v1016_v36 = vpop.f32.mrf.mxu2 }
  0xc4   : > { %866 = vrot.lane.b32.xlu1 %v815_v29, %s4591_s25  ;;  %v1030_v37 = vpack.c.bf16 %v1016_v36, %v1016_v36  ;;  %v830_v39 = vor.u32 %v828_v35, %v827_v34  ;;  %v831_v41 = vrot.slane %v827_v34, 4  ;;  %v590_v29 = vshll.u32 %v571_v22, 16  ;;  %v565_v22 = vpop.f32.mrf.mxu3 }
  0xc5   : > { %v776_v31 = vpop.f32.mrf.mxu1 }
  0xc6   : > { %868 = vrot.lane.b32.xlu0 %v822_v30, %s4591_s25  ;;  %1108 = vrot.lane.b32.xlu2 %v1057_v32, %s4592_s26  ;;  %v1067_v40 = vshrl.u32 %v1030_v37, 16  ;;  %v1070_v54 = vshll.u32 %v1030_v37, 16  ;;  %v789_v57 = vpack.c.bf16 %v776_v31, %v776_v31  ;;  %v589_v31 = vrot.slane %v587_v26, 7  ;;  %v672_v37 = vld [vmem:[#allocation2 + $0x14] sm:$0x1] }
  0xc8   : > { %v1069_v53 = vrot.slane %v1067_v40, 7  ;;  %v833_v3 = vshrl.u32 %v789_v57, 16  ;;  %v836_v27 = vshll.u32 %v789_v57, 16  ;;  %v592_v35 = vor.u32 %v590_v29, %v589_v31 }
  0xc9   : > { %v593_v36 = vrot.slane %v589_v31, 4 }
  0xca   : > { %v1072_v1 = vor.u32 %v1070_v54, %v1069_v53  ;;  %v1073_v21 = vrot.slane %v1069_v53, 4  ;;  %v835_v24 = vrot.slane %v833_v3, 7  ;;  %v670_v40 = vsel %vm4740_vm9, %v592_v35, %v669_v33  ;;  %v4508_v33 = vld [vmem:[%s5809_s5 + $0x18] sm:$0xff]  ;;  %v906_v35 = vld [vmem:[#allocation2 + $0x8] sm:$0xf] }
  0xcb   : > { %v1018_v59 = vpop.f32.mrf.mxu2  ;;  %671 = vst [vmem:[#allocation2 + $0x10] sm:$0xf] %v670_v40  ;;  %1409 = vmatpush.bf16.msrb.mxu3 %v4508_v33  ;;  %v4509_v40 = vld [vmem:[%s5809_s5 + $0x20] sm:$0xff] }
  0xcc   : > { %872 = vrot.lane.b32.xlu1 %v830_v39, %s4591_s25  ;;  %v1031_v19 = vpack.c.bf16 %v1018_v59, %v1018_v59  ;;  %v838_v32 = vor.u32 %v836_v27, %v835_v24  ;;  %v839_v43 = vrot.slane %v835_v24, 4  ;;  %v566_v24 = vadd.f32 %v4735_v50, %v565_v22 }
  0xcd   : > { %v779_v45 = vpop.f32.mrf.mxu1 }
  0xce   : > { %v790_v52 = vpack.c.bf16 %v779_v45, %v779_v45  ;;  %874 = vrot.lane.b32.xlu0 %v831_v41, %s4591_s25  ;;  %870 = vrot.lane.b32.xlu2 %v823_v46, %s4591_s25  ;;  %v1075_v30 = vshrl.u32 %v1031_v19, 16  ;;  %v1078_v39 = vshll.u32 %v1031_v19, 16  ;;  %v673_v41 = vsel %vm4746_vm10, %v593_v36, %v672_v37  ;;  %v699_v36 = vld [vmem:[#allocation2 + $0x38] sm:$0xf] }
  0xcf   : > { %674 = vst [vmem:[#allocation2 + $0x14] sm:$0x1] %v673_v41  ;;  %v418_v19 = vsel %vm4701_vm6, 0, %v417_v17  ;;  %v576_v27 = vpack.c.bf16 %v566_v24, %v566_v24 }
  0xd0   : > { %v841_v63 = vshrl.u32 %v790_v52, 16  ;;  %v844_v14 = vshll.u32 %v790_v52, 16  ;;  %v1077_v38 = vrot.slane %v1075_v30, 7  ;;  %419 = vst [vmem:[#allocation2 + $0x3c] sm:$0x1] %v418_v19 }
  0xd1   : > { %v627_v30 = vshrl.u32 %v576_v27, 16  ;;  %v630_v31 = vshll.u32 %v576_v27, 16  ;;  %v4514_v27 = vld [vmem:[%s5809_s5 + $0x48] sm:$0xff] }
  0xd2   : > { %v843_v13 = vrot.slane %v841_v63, 7  ;;  %v1080_v45 = vor.u32 %v1078_v39, %v1077_v38  ;;  %v1081_v57 = vrot.slane %v1077_v38, 4  ;;  %v914_v10 = vld [vmem:[#allocation2 + $0x10] sm:$0xf] }
  0xd3   : > { %v1021_v28 = vpop.f32.mrf.mxu2 }
  0xd4   : > { %1110 = vrot.lane.b32.xlu1 %v1064_v0, %s4592_s26  ;;  %v846_v25 = vor.u32 %v844_v14, %v843_v13  ;;  %v1032_v34 = vpack.c.bf16 %v1021_v28, %v1021_v28  ;;  %v847_v47 = vrot.slane %v843_v13, 4  ;;  %v4505_v13 = vld [vmem:[%s5809_s5] sm:$0xff]  ;;  %v4511_v14 = vld [vmem:[%s5809_s5 + $0x30] sm:$0xff] }
  0xd5   : > { %v781_v44 = vpop.f32.mrf.mxu1  ;;  %1483 = vmatpush.bf16.msrb.mxu0 %v4505_v13  ;;  %1696 = vmatpush.bf16.msra.mxu2 %v4511_v14  ;;  %v929_v13 = vld [vmem:[#allocation2 + $0x24] sm:$0x1] }
  0xd6   : > { %1112 = vrot.lane.b32.xlu0 %v1065_v4, %s4592_s26  ;;  %1114 = vrot.lane.b32.xlu2 %v1072_v1, %s4592_s26  ;;  %v1083_v42 = vshrl.u32 %v1032_v34, 16  ;;  %v791_v48 = vpack.c.bf16 %v781_v44, %v781_v44  ;;  %v1086_v51 = vshll.u32 %v1032_v34, 16  ;;  %v4593_v4 = vmov 0   ;;  %v920_v44 = vld [vmem:[#allocation2 + $0x18] sm:$0xf] }
  0xd7   : > { %355 = vst.msk [vmem:[#allocation2] sm:$0xf] %vm354_vm11, %v4593_v4  ;;  %v629_v34 = vrot.slane %v627_v30, 7  ;;  %v702_v39 = vld [vmem:[#allocation2 + $0x3c] sm:$0x1] }
  0xd8   : > { %v1085_v49 = vrot.slane %v1083_v42, 7  ;;  %v849_v53 = vshrl.u32 %v791_v48, 16  ;;  %v852_v61 = vshll.u32 %v791_v48, 16  ;;  %357 = vst.msk [vmem:[#allocation2 + $0x4] sm:$0x1] %vm356_vm2, %v4593_v4 }
  0xd9   : > { %359 = vst.msk [vmem:[#allocation2 + $0x48] sm:$0xf] %vm354_vm11, %v4593_v4  ;;  %v632_v37 = vor.u32 %v630_v31, %v629_v34  ;;  %v633_v38 = vrot.slane %v629_v34, 4 }
  0xda   : > { %v1088_v54 = vor.u32 %v1086_v51, %v1085_v49  ;;  %v1089_v56 = vrot.slane %v1085_v49, 4  ;;  %v851_v59 = vrot.slane %v849_v53, 7  ;;  %360 = vst.msk [vmem:[#allocation2 + $0x4c] sm:$0x1] %vm356_vm2, %v4593_v4  ;;  %v567_v53 = vpop.f32.mrf.mxu3 }
  0xdb   : > { %v1023_v46 = vpop.f32.mrf.mxu2  ;;  %426 = vst.msk [vmem:[#allocation3] sm:$0xf] %vm354_vm11, %v4593_v4  ;;  %v703_v48 = vsel %vm4746_vm10, %v633_v38, %v702_v39 }
  0xdc   : > { %1116 = vrot.lane.b32.xlu1 %v1073_v21, %s4592_s26  ;;  %v1033_v52 = vpack.c.bf16 %v1023_v46, %v1023_v46  ;;  %v854_v0 = vor.u32 %v852_v61, %v851_v59  ;;  %v855_v2 = vrot.slane %v851_v59, 4  ;;  %427 = vst.msk [vmem:[#allocation3 + $0x4] sm:$0x1] %vm356_vm2, %v4593_v4  ;;  %v4507_v46 = vld [vmem:[%s5809_s5 + $0x10] sm:$0xff] }
  0xdd   : > { %429 = vst.msk [vmem:[#allocation3 + $0x48] sm:$0xf] %vm354_vm11, %v4593_v4  ;;  %1410 = vmatpush.bf16.msrb.mxu3 %v4507_v46 }
  0xde   : > { %880 = vrot.lane.b32.xlu0 %v846_v25, %s4591_s25  ;;  %876 = vrot.lane.b32.xlu2 %v838_v32, %s4591_s25  ;;  %v1091_v55 = vshrl.u32 %v1033_v52, 16  ;;  %v1094_v63 = vshll.u32 %v1033_v52, 16  ;;  %v364_v7 = vld [vmem:[#allocation2] sm:$0x1]  ;;  %430 = vst.msk [vmem:[#allocation3 + $0x4c] sm:$0x1] %vm356_vm2, %v4593_v4 }
  0xdf   : > { %v365_v8 = vsel %vm4693_vm5, 0, %v364_v7  ;;  %v396_v15 = vld [vmem:[#allocation2 + $0x4] sm:$0x1]  ;;  %v4510_v32 = vld [vmem:[%s5809_s5 + $0x28] sm:$0xff]  ;;  %704 = vst [vmem:[#allocation2 + $0x3c] sm:$0x1] %v703_v48 }
  0xe0   : > { %v1093_v62 = vrot.slane %v1091_v55, 7  ;;  %366 = vst [vmem:[#allocation2] sm:$0x1] %v365_v8  ;;  %v397_v21 = vsel %vm4701_vm6, 0, %v396_v15  ;;  %1606 = vmatpush.bf16.msra.mxu1 %v4510_v32  ;;  %v911_v52 = vld [vmem:[#allocation2 + $0xc] sm:$0x1] }
  0xe1   : > { %398 = vst [vmem:[#allocation2 + $0x4] sm:$0x1] %v397_v21  ;;  %vm1151_vm2 = vcmask 254144   ;;  %v917_v7 = vld [vmem:[#allocation2 + $0x14] sm:$0x1]  ;;  %1896 = vmatpush.bf16.msra.mxu3 %v4514_v27 }
  0xe2   : > { %v1096_v1 = vor.u32 %v1094_v63, %v1093_v62  ;;  %v1097_v3 = vrot.slane %v1093_v62, 4  ;;  %v388_v63 = vld [vmem:[#allocation2 + $0x40] sm:$0x1]  ;;  %vm4898_vm7 = vmand %vm1151_vm2, %vm362_vm3  ;;  %v1505_v14 = vld [vmem:[#allocation2] sm:$0xe] }
  0xe3   : > { %v4160_v38 = vrot.slane %v1505_v14, 9  ;;  %vm1252_vm3 = vsmask.f32 7440  ;;  %vm4915_vm2 = vmor %vm1529_vm12, %vm1530_vm14 }
  0xe4   : > { %878 = vrot.lane.b32.xlu1 %v839_v43, %s4591_s25  ;;  %1607 = vmatpush.bf16.msra.mxu1 %v4509_v40  ;;  %vm4925_vm12 = vmor %vm1251_vm0, %vm1252_vm3 }
  0xe6   : > { %1118 = vrot.lane.b32.xlu0 %v1080_v45, %s4592_s26  ;;  %882 = vrot.lane.b32.xlu2 %v847_v47, %s4591_s25  ;;  %v700_v45 = vsel %vm4740_vm9, %v632_v37, %v699_v36 }
  0xe7   : > { %701 = vst [vmem:[#allocation2 + $0x38] sm:$0xf] %v700_v45  ;;  %v1235_v55 = vld [vmem:[#allocation2] sm:$0xf] }
  0xe8   : > { %v1258_v4 = vshll.u32 %v1235_v55, 16  ;;  %v4134_v8 = vld [vmem:[#allocation2] sm:$0xf]  ;;  %v1243_v18 = vld [vmem:[#allocation2 + $0x4] sm:$0x1] }
  0xe9   : > { %v1264_v37 = vshll.u32 %v1243_v18, 16  ;;  %v1534_v39 = vrot.slane %v1243_v18, 5  ;;  %v926_v18 = vld [vmem:[#allocation2 + $0x20] sm:$0xf] }
  0xea   : > { %v1260_v16 = vrot.slane %v1258_v4, 5 }
  0xeb   : > { %v1535_v60 = vsel %vm4915_vm2, %v4160_v38, %v1534_v39  ;;  %v935_v38 = vld [vmem:[#allocation2 + $0x2c] sm:$0x1] }
  0xec   : > { %1122 = vrot.lane.b32.xlu1 %v1088_v54, %s4592_s26 }
  0xee   : > { %1124 = vrot.lane.b32.xlu0 %v1089_v56, %s4592_s26  ;;  %1120 = vrot.lane.b32.xlu2 %v1081_v57, %s4592_s26  ;;  %v420_v56 = vld [vmem:[#allocation2 + $0x44] sm:$0x1]  ;;  %v568_v57 = vadd.f32 %v4735_v50, %v567_v53  ;;  %v1255_v50 = vshrl.u32 %v1235_v55, 16  ;;  %v1266_v53 = vrot.slane %v1264_v37, 5 }
  0xf0   : > { %v1257_v15 = vrot.slane %v1255_v50, 4 }
  0xf2   : > { %v1261_v36 = vor.u32 %v1260_v16, %v1257_v15 }
  0xf4   : > { %884 = vrot.lane.b32.xlu1 %v854_v0, %s4591_s25 }
  0xf6   : > { %1126 = vrot.lane.b32.xlu0 %v1096_v1, %s4592_s26  ;;  %886 = vrot.lane.b32.xlu2 %v855_v2, %s4591_s25  ;;  %v389_v1 = vsel %vm4693_vm5, 0, %v388_v63  ;;  %v421_v2 = vsel %vm4701_vm6, 0, %v420_v56 }
  0xf7   : > { %390 = vst [vmem:[#allocation2 + $0x40] sm:$0x1] %v389_v1 }
  0xf8   : > { %422 = vst [vmem:[#allocation2 + $0x44] sm:$0x1] %v421_v2 }
  0xfc   : > { %1128 = vrot.lane.b32.xlu1 %v1097_v3, %s4592_s26  ;;  %v577_v3 = vpack.c.bf16 %v568_v57, %v568_v57 }
  0xfe   : > { %v635_v5 = vshrl.u32 %v577_v3, 16 }
 0x108   : > { %v861_v11 = vpop.permute.xlu2 %860 }
 0x109   : > { %v915_v12 = vsel %vm4835_vm13, %v861_v11, %v914_v10  ;;  %v637_v10 = vrot.slane %v635_v5, 7  ;;  %v638_v11 = vshll.u32 %v577_v3, 16  ;;  %v1564_v5 = vunpack.c.l.b16 %v1535_v60  ;;  %v4513_v60 = vld [vmem:[%s5809_s5 + $0x40] sm:$0xff] }
 0x10a   : > { %916 = vst [vmem:[#allocation2 + $0x10] sm:$0xf] %v915_v12  ;;  %1897 = vmatpush.bf16.msra.mxu3 %v4513_v60 }
 0x10b   : > { %v640_v32 = vor.u32 %v638_v11, %v637_v10  ;;  %v923_v11 = vld [vmem:[#allocation2 + $0x1c] sm:$0x1] }
 0x110   : > { %v1103_v26 = vpop.permute.xlu2 %1102 }
 0x111   : > { %v1156_v28 = vld [vmem:[#allocation2 + $0x10] sm:$0xf] }
 0x112   : > { %v1157_v29 = vsel %vm4855_vm15, %v1103_v26, %v1156_v28  ;;  %v641_v26 = vrot.slane %v637_v10, 4 }
 0x113   : > { %1158 = vst [vmem:[#allocation2 + $0x10] sm:$0xf] %v1157_v29 }
 0x118   : > { %v857_v41 = vpop.permute.xlu0 %856  ;;  %v865_v43 = vpop.permute.xlu2 %864 }
 0x119   : > { %v907_v42 = vsel %vm4835_vm13, %v857_v41, %v906_v35  ;;  %v921_v47 = vsel %vm4835_vm13, %v865_v43, %v920_v44  ;;  %v708_v43 = vld [vmem:[#allocation2 + $0x44] sm:$0x1] }
 0x11a   : > { %908 = vst [vmem:[#allocation2 + $0x8] sm:$0xf] %v907_v42  ;;  %v4527_v24 = vld [vmem:[#allocation2 + $0xc] sm:$0xf0]  ;;  %v705_v42 = vld [vmem:[#allocation2 + $0x40] sm:$0xf] }
 0x11b   : > { %922 = vst [vmem:[#allocation2 + $0x18] sm:$0xf] %v921_v47  ;;  %v706_v48 = vsel %vm4740_vm9, %v640_v32, %v705_v42  ;;  %v4138_v27 = vld [vmem:[#allocation2 + $0x10] sm:$0xf]  ;;  %vm5333_vm9 = vmand %vm354_vm11, %vm394_vm4  ;;  %vm3924_vm4 = vcmask 130048  }
 0x11c   : > { %707 = vst [vmem:[#allocation2 + $0x40] sm:$0xf] %v706_v48 }
 0x11e   : > { %v1099_v49 = vpop.permute.xlu1 %1098 }
 0x120   : > { %v859_v54 = vpop.permute.xlu0 %858  ;;  %v4889_v62 = vpop.permute.xlu2 %1108 }
 0x121   : > { %v1148_v59 = vld [vmem:[#allocation2 + $0x8] sm:$0xf]  ;;  %v912_v61 = vsel %vm4882_vm1, %v859_v54, %v911_v52  ;;  %v1262_v52 = vrot.slane %v1261_v36, 4 }
 0x122   : > { %v1149_v0 = vsel %vm4855_vm15, %v1099_v49, %v1148_v59  ;;  %913 = vst [vmem:[#allocation2 + $0xc] sm:$0x1] %v912_v61  ;;  %v709_v49 = vsel %vm4746_vm10, %v641_v26, %v708_v43  ;;  %v1162_v55 = vld [vmem:[#allocation2 + $0x18] sm:$0xf]  ;;  %v932_v36 = vld [vmem:[#allocation2 + $0x28] sm:$0xf] }
 0x123   : > { %1150 = vst [vmem:[#allocation2 + $0x8] sm:$0xf] %v1149_v0  ;;  %v1267_v50 = vsel %vm4925_vm12, %v1262_v52, %v1266_v53 }
 0x124   : > { %710 = vst [vmem:[#allocation2 + $0x44] sm:$0x1] %v709_v49  ;;  %v1366_v14 = vunpack.c.l.b16 %v1267_v50 }
 0x126   : > { %v1101_v6 = vpop.permute.xlu1 %1100 }
 0x128   : > { %v863_v17 = vpop.permute.xlu0 %862  ;;  %v871_v22 = vpop.permute.xlu2 %870 }
 0x129   : > { %v1153_v19 = vld [vmem:[#allocation2 + $0xc] sm:$0x1]  ;;  %v918_v21 = vsel %vm4882_vm1, %v863_v17, %v917_v7  ;;  %v930_v29 = vsel %vm4882_vm1, %v871_v22, %v929_v13 }
 0x12a   : > { %v1154_v28 = vsel %vm4898_vm7, %v1101_v6, %v1153_v19  ;;  %919 = vst [vmem:[#allocation2 + $0x14] sm:$0x1] %v918_v21  ;;  %v4523_v30 = vld [vmem:[#allocation2 + $0x4] sm:$0xf0]  ;;  %v938_v19 = vld [vmem:[#allocation2 + $0x30] sm:$0xf] }
 0x12b   : > { %v4182_v31 = vld [vmem:[#allocation2 + $0x8] sm:$0xf]  ;;  %1155 = vst [vmem:[#allocation2 + $0xc] sm:$0x1] %v1154_v28  ;;  %v4135_v33 = vor.u32 %v4523_v30, %v4134_v8 }
 0x12c   : > { %v4183_v34 = vor.u32 %v4527_v24, %v4182_v31  ;;  %v1236_v35 = vld [vmem:[#allocation2 + $0x8] sm:$0xf]  ;;  %931 = vst [vmem:[#allocation2 + $0x24] sm:$0x1] %v930_v29  ;;  %v1237_v29 = vld [vmem:[#allocation2 + $0x10] sm:$0xf] }
 0x12d   : > { %v1269_v40 = vshrl.u32 %v1236_v35, 16  ;;  %v1272_v41 = vshll.u32 %v1236_v35, 16  ;;  %4156 = vmatmul.msk.bf16.vlgmr.msrb.gmra.mxu0 %vm1390_vm8, %v4135_v33  ;;  %v1506_v56 = vld [vmem:[#allocation2 + $0x8] sm:$0xe]  ;;  %v1286_v35 = vshll.u32 %v1237_v29, 16 }
 0x12e   : > { %4204 = vmatmul.msk.bf16.vlgmr.msra.gmra.mxu2 %vm1390_vm8, %v4183_v34  ;;  %v1105_v44 = vpop.permute.xlu1 %1104  ;;  %v4161_v2 = vrot.slane %v1506_v56, 9  ;;  %v1283_v34 = vshrl.u32 %v1237_v29, 16 }
 0x12f   : > { %v1271_v46 = vrot.slane %v1269_v40, 4  ;;  %v1274_v47 = vrot.slane %v1272_v41, 5  ;;  %v947_v41 = vld [vmem:[#allocation2 + $0x3c] sm:$0x1]  ;;  %v1288_v49 = vrot.slane %v1286_v35, 5 }
 0x130   : > { %v1107_v54 = vpop.permute.xlu0 %1106  ;;  %v4931_v61 = vpop.permute.xlu2 %1114  ;;  %v1285_v48 = vrot.slane %v1283_v34, 4 }
 0x131   : > { %v1159_v59 = vld [vmem:[#allocation2 + $0x14] sm:$0x1]  ;;  %v1163_v58 = vsel %vm4855_vm15, %v1107_v54, %v1162_v55  ;;  %v1275_v63 = vor.u32 %v1274_v47, %v1271_v46 }
 0x132   : > { %v1160_v0 = vsel %vm4898_vm7, %v1105_v44, %v1159_v59  ;;  %1164 = vst [vmem:[#allocation2 + $0x18] sm:$0xf] %v1163_v58  ;;  %v1244_v1 = vld [vmem:[#allocation2 + $0xc] sm:$0x1]  ;;  %v1507_v58 = vld [vmem:[#allocation2 + $0x10] sm:$0xe] }
 0x133   : > { %1161 = vst [vmem:[#allocation2 + $0x14] sm:$0x1] %v1160_v0  ;;  %v1538_v3 = vrot.slane %v1244_v1, 5  ;;  %v1278_v4 = vshll.u32 %v1244_v1, 16  ;;  %v1276_v7 = vrot.slane %v1275_v63, 4 }
 0x135   : > { %v1539_v6 = vsel %vm4915_vm2, %v4161_v2, %v1538_v3  ;;  %v1280_v8 = vrot.slane %v1278_v4, 5  ;;  %v1171_v4 = vld [vmem:[#allocation2 + $0x24] sm:$0x1] }
 0x136   : > { %v867_v10 = vpop.permute.xlu1 %866  ;;  %v1565_v13 = vunpack.c.l.b16 %v1539_v6 }
 0x137   : > { %v924_v15 = vsel %vm4882_vm1, %v867_v10, %v923_v11  ;;  %v1281_v16 = vsel %vm4925_vm12, %v1276_v7, %v1280_v8 }
 0x138   : > { %925 = vst [vmem:[#allocation2 + $0x1c] sm:$0x1] %v924_v15  ;;  %v869_v17 = vpop.permute.xlu0 %868  ;;  %v1572_v21 = vpack.c.b16 %v1565_v13, %v1564_v5  ;;  %v1367_v22 = vunpack.c.l.b16 %v1281_v16  ;;  %v877_v26 = vpop.permute.xlu2 %876  ;;  %v4162_v5 = vrot.slane %v1507_v58, 9 }
 0x139   : > { %v927_v24 = vsel %vm4835_vm13, %v869_v17, %v926_v18  ;;  %v4524_v28 = vld [vmem:[#allocation2 + $0x14] sm:$0xf0]  ;;  %v939_v30 = vsel %vm4835_vm13, %v877_v26, %v938_v19 }
 0x13a   : > { %928 = vst [vmem:[#allocation2 + $0x20] sm:$0xf] %v927_v24  ;;  %4176 = vmatmul.msk.bf16.vlgmr.msra.gmra.mxu1 %vm1390_vm8, %v1572_v21  ;;  %v1374_v31 = vpack.c.b16 %v1367_v22, %v1366_v14  ;;  %v4139_v32 = vor.u32 %v4524_v28, %v4138_v27  ;;  %v1238_v33 = vld [vmem:[#allocation2 + $0x18] sm:$0xf]  ;;  %v1245_v47 = vld [vmem:[#allocation2 + $0x14] sm:$0x1] }
 0x13b   : > { %940 = vst [vmem:[#allocation2 + $0x30] sm:$0xf] %v939_v30  ;;  %v1297_v42 = vshrl.u32 %v1238_v33, 16  ;;  %v1300_v43 = vshll.u32 %v1238_v33, 16  ;;  %v1292_v55 = vshll.u32 %v1245_v47, 16  ;;  %v1542_v0 = vrot.slane %v1245_v47, 5 }
 0x13c   : > { %4128 = vmatmul.msk.bf16.vlgmr.msrb.gmra.mxu3 %vm1390_vm8, %v1374_v31  ;;  %v1508_v63 = vld [vmem:[#allocation2 + $0x18] sm:$0xe] }
 0x13d   : > { %4157 = vmatmul.msk.bf16.gmra.mxu0 %vm1390_vm8, %v4139_v32  ;;  %v1299_v56 = vrot.slane %v1297_v42, 4  ;;  %v1302_v59 = vrot.slane %v1300_v43, 5  ;;  %v1294_v6 = vrot.slane %v1292_v55, 5  ;;  %v4163_v13 = vrot.slane %v1508_v63, 9  ;;  %v944_v31 = vld [vmem:[#allocation2 + $0x38] sm:$0xf] }
 0x13e   : > { %v873_v37 = vpop.permute.xlu1 %872  ;;  %v1543_v17 = vsel %vm4915_vm2, %v4162_v5, %v1542_v0  ;;  %v953_v32 = vld [vmem:[#allocation2 + $0x44] sm:$0x1]  ;;  %v4516_v0 = vld [vmem:[%s5809_s5 + $0x58] sm:$0xff] }
 0x13f   : > { %v1165_v39 = vld [vmem:[#allocation2 + $0x1c] sm:$0x1]  ;;  %v933_v40 = vsel %vm4835_vm13, %v873_v37, %v932_v36  ;;  %v1303_v7 = vor.u32 %v1302_v59, %v1299_v56  ;;  %v1566_v26 = vunpack.c.l.b16 %v1543_v17  ;;  %v4186_v37 = vld [vmem:[#allocation2 + $0x18] sm:$0xf]  ;;  %2025 = vmatpush.bf16.msra.mxu0 %v4516_v0 }
 0x140   : > { %v1166_v44 = vsel %vm4898_vm7, %v4889_v62, %v1165_v39  ;;  %934 = vst [vmem:[#allocation2 + $0x28] sm:$0xf] %v933_v40  ;;  %v875_v46 = vpop.permute.xlu0 %874  ;;  %v883_v53 = vpop.permute.xlu2 %882  ;;  %v1289_v62 = vor.u32 %v1288_v49, %v1285_v48 }
 0x141   : > { %1167 = vst [vmem:[#allocation2 + $0x1c] sm:$0x1] %v1166_v44  ;;  %v936_v52 = vsel %vm4882_vm1, %v875_v46, %v935_v38  ;;  %v948_v54 = vsel %vm4882_vm1, %v883_v53, %v947_v41  ;;  %v1168_v2 = vld [vmem:[#allocation2 + $0x20] sm:$0xf]  ;;  %v1304_v22 = vrot.slane %v1303_v7, 4  ;;  %v4515_v7 = vld [vmem:[%s5809_s5 + $0x50] sm:$0xff] }
 0x142   : > { %937 = vst [vmem:[#allocation2 + $0x2c] sm:$0x1] %v936_v52  ;;  %v1290_v14 = vrot.slane %v1289_v62, 4 }
 0x143   : > { %949 = vst [vmem:[#allocation2 + $0x3c] sm:$0x1] %v948_v54  ;;  %2026 = vmatpush.bf16.msra.mxu0 %v4515_v7 }
 0x144   : > { %v1295_v21 = vsel %vm4925_vm12, %v1290_v14, %v1294_v6  ;;  %v1180_v14 = vld [vmem:[#allocation2 + $0x30] sm:$0xf] }
 0x145   : > { %v1368_v34 = vunpack.c.l.b16 %v1295_v21 }
 0x146   : > { %v1111_v1 = vpop.permute.xlu1 %1110 }
 0x147   : > { %v1174_v3 = vld [vmem:[#allocation2 + $0x28] sm:$0xf]  ;;  %v1169_v50 = vsel %vm4855_vm15, %v1111_v1, %v1168_v2 }
 0x148   : > { %v1175_v8 = vsel %vm4855_vm15, %v4931_v61, %v1174_v3  ;;  %1170 = vst [vmem:[#allocation2 + $0x20] sm:$0xf] %v1169_v50  ;;  %v1113_v10 = vpop.permute.xlu0 %1112  ;;  %v1246_v11 = vld [vmem:[#allocation2 + $0x1c] sm:$0x1]  ;;  %v4971_v16 = vpop.permute.xlu2 %1120  ;;  %v941_v50 = vld [vmem:[#allocation2 + $0x34] sm:$0x1] }
 0x149   : > { %1176 = vst [vmem:[#allocation2 + $0x28] sm:$0xf] %v1175_v8  ;;  %v1172_v15 = vsel %vm4898_vm7, %v1113_v10, %v1171_v4  ;;  %v1546_v18 = vrot.slane %v1246_v11, 5  ;;  %v1306_v19 = vshll.u32 %v1246_v11, 16  ;;  %v1177_v29 = vld [vmem:[#allocation2 + $0x2c] sm:$0x1] }
 0x14a   : > { %1173 = vst [vmem:[#allocation2 + $0x24] sm:$0x1] %v1172_v15 }
 0x14b   : > { %v1547_v61 = vsel %vm4915_vm2, %v4163_v13, %v1546_v18  ;;  %v1308_v24 = vrot.slane %v1306_v19, 5 }
 0x14c   : > { %v1567_v27 = vunpack.c.l.b16 %v1547_v61 }
 0x14d   : > { %v1309_v28 = vsel %vm4925_vm12, %v1304_v22, %v1308_v24 }
 0x14e   : > { %v1117_v30 = vpop.permute.xlu1 %1116  ;;  %v1573_v33 = vpack.c.b16 %v1567_v27, %v1566_v26  ;;  %v1369_v35 = vunpack.c.l.b16 %v1309_v28 }
 0x14f   : > { %v1178_v36 = vsel %vm4898_vm7, %v1117_v30, %v1177_v29  ;;  %v4528_v38 = vld [vmem:[#allocation2 + $0x1c] sm:$0xf0] }
 0x150   : > { %v4142_v39 = vld [vmem:[#allocation2 + $0x20] sm:$0xf]  ;;  %1179 = vst [vmem:[#allocation2 + $0x2c] sm:$0x1] %v1178_v36  ;;  %v881_v40 = vpop.permute.xlu0 %880  ;;  %4177 = vmatmul.msk.bf16.gmra.mxu1 %vm1390_vm8, %v1573_v33  ;;  %v1375_v41 = vpack.c.b16 %v1369_v35, %v1368_v34  ;;  %v4187_v42 = vor.u32 %v4528_v38, %v4186_v37  ;;  %v4525_v43 = vld [vmem:[#allocation2 + $0x24] sm:$0xf0]  ;;  %v887_v46 = vpop.permute.xlu2 %886 }
 0x151   : > { %v945_v44 = vsel %vm4835_vm13, %v881_v40, %v944_v31  ;;  %v4143_v47 = vor.u32 %v4525_v43, %v4142_v39  ;;  %v1247_v48 = vld [vmem:[#allocation2 + $0x24] sm:$0x1]  ;;  %v1509_v49 = vld [vmem:[#allocation2 + $0x20] sm:$0xe]  ;;  %v954_v53 = vsel %vm4882_vm1, %v887_v46, %v953_v32  ;;  %v1240_v54 = vld [vmem:[#allocation2 + $0x28] sm:$0xf] }
 0x152   : > { %v1239_v52 = vld [vmem:[#allocation2 + $0x20] sm:$0xf]  ;;  %946 = vst [vmem:[#allocation2 + $0x38] sm:$0xf] %v945_v44  ;;  %4129 = vmatmul.msk.bf16.gmra.mxu3 %vm1390_vm8, %v1375_v41  ;;  %4205 = vmatmul.msk.bf16.gmra.mxu2 %vm1390_vm8, %v4187_v42  ;;  %v1325_v59 = vshrl.u32 %v1240_v54, 16  ;;  %v1328_v58 = vshll.u32 %v1240_v54, 16 }
 0x153   : > { %v1311_v55 = vshrl.u32 %v1239_v52, 16  ;;  %955 = vst [vmem:[#allocation2 + $0x44] sm:$0x1] %v954_v53  ;;  %4158 = vmatmul.msk.bf16.gmra.mxu0 %vm1390_vm8, %v4143_v47  ;;  %v1314_v56 = vshll.u32 %v1239_v52, 16  ;;  %v1510_v62 = vld [vmem:[#allocation2 + $0x28] sm:$0xe] }
 0x154   : > { %v1550_v60 = vrot.slane %v1247_v48, 5  ;;  %v1320_v2 = vshll.u32 %v1247_v48, 16  ;;  %v1327_v3 = vrot.slane %v1325_v59, 4  ;;  %v4164_v5 = vrot.slane %v1509_v49, 9  ;;  %v4518_v31 = vld [vmem:[%s5809_s5 + $0x68] sm:$0xff]  ;;  %v4517_v36 = vld [vmem:[%s5809_s5 + $0x60] sm:$0xff] }
 0x155   : > { %v1313_v63 = vrot.slane %v1311_v55, 4  ;;  %v1316_v1 = vrot.slane %v1314_v56, 5  ;;  %v1330_v6 = vrot.slane %v1328_v58, 5  ;;  %v4165_v11 = vrot.slane %v1510_v62, 9  ;;  %2115 = vmatpush.bf16.msrb.mxu1 %v4518_v31  ;;  %v1189_v43 = vld [vmem:[#allocation2 + $0x3c] sm:$0x1] }
 0x156   : > { %v879_v4 = vpop.permute.xlu1 %878  ;;  %v1551_v17 = vsel %vm4915_vm2, %v4164_v5, %v1550_v60  ;;  %v1322_v24 = vrot.slane %v1320_v2, 5  ;;  %v5021_v46 = vld [vmem:[#allocation2 + $0x10] sm:$0xe]  ;;  %v4190_v48 = vld [vmem:[#allocation2 + $0x28] sm:$0xf]  ;;  %v4520_v55 = vld [vmem:[%s5809_s5 + $0x78] sm:$0xff] }
 0x157   : > { %v942_v8 = vsel %vm4882_vm1, %v879_v4, %v941_v50  ;;  %v1248_v10 = vld [vmem:[#allocation2 + $0x2c] sm:$0x1]  ;;  %v1317_v13 = vor.u32 %v1316_v1, %v1313_v63  ;;  %v1331_v19 = vor.u32 %v1330_v6, %v1327_v3  ;;  %v1568_v28 = vunpack.c.l.b16 %v1551_v17  ;;  %v5029_v56 = vld [vmem:[#allocation2 + $0x10] sm:$0xf]  ;;  %v950_v58 = vld [vmem:[#allocation2 + $0x40] sm:$0xf]  ;;  %2316 = vmatpush.bf16.msrb.mxu2 %v4520_v55 }
 0x158   : > { %943 = vst [vmem:[#allocation2 + $0x34] sm:$0x1] %v942_v8  ;;  %v1119_v15 = vpop.permute.xlu0 %1118  ;;  %v1554_v18 = vrot.slane %v1248_v10, 5  ;;  %v1334_v61 = vshll.u32 %v1248_v10, 16  ;;  %v4221_v59 = vrot.slane %v5021_v46, 9  ;;  %v1757_v2 = vshrl.u32 %v5029_v56, 16 }
 0x159   : > { %v1181_v21 = vsel %vm4855_vm15, %v1119_v15, %v1180_v14  ;;  %v1318_v22 = vrot.slane %v1317_v13, 4  ;;  %v1332_v26 = vrot.slane %v1331_v19, 4  ;;  %v1186_v38 = vld [vmem:[#allocation2 + $0x38] sm:$0xf]  ;;  %2116 = vmatpush.bf16.msrb.mxu1 %v4517_v36  ;;  %v1760_v3 = vshll.u32 %v5029_v56, 16  ;;  %v4522_v50 = vld [vmem:[%s5809_s5 + $0x88] sm:$0xff] }
 0x15a   : > { %1182 = vst [vmem:[#allocation2 + $0x30] sm:$0xf] %v1181_v21  ;;  %v1555_v51 = vsel %vm4915_vm2, %v4165_v11, %v1554_v18  ;;  %v1336_v27 = vrot.slane %v1334_v61, 5  ;;  %v4519_v4 = vld [vmem:[%s5809_s5 + $0x70] sm:$0xff]  ;;  %2445 = vmatpush.bf16.msrb.mxu3 %v4522_v50  ;;  %v1726_v31 = vld [vmem:[#allocation2 + $0x8] sm:$0xf] }
 0x15b   : > { %v1569_v29 = vunpack.c.l.b16 %v1555_v51  ;;  %v1323_v30 = vsel %vm4925_vm12, %v1318_v22, %v1322_v24  ;;  %v2146_v10 = vld [vmem:[#allocation2 + $0x10] sm:$0xf]  ;;  %2317 = vmatpush.bf16.msrb.mxu2 %v4519_v4 }
 0x15c   : > { %v1337_v32 = vsel %vm4925_vm12, %v1332_v26, %v1336_v27  ;;  %v1370_v34 = vunpack.c.l.b16 %v1323_v30  ;;  %v1729_v26 = vld [vmem:[#allocation2 + $0x14] sm:$0x1]  ;;  %v5046_v30 = vld [vmem:[#allocation2 + $0xc] sm:$0x1] }
 0x15d   : > { %v1574_v33 = vpack.c.b16 %v1569_v29, %v1568_v28  ;;  %v1371_v35 = vunpack.c.l.b16 %v1337_v32 }
 0x15e   : > { %v1123_v37 = vpop.permute.xlu1 %1122 }
 0x15f   : > { %v1183_v39 = vld [vmem:[#allocation2 + $0x34] sm:$0x1]  ;;  %v1187_v40 = vsel %vm4855_vm15, %v1123_v37, %v1186_v38  ;;  %v1376_v41 = vpack.c.b16 %v1371_v35, %v1370_v34  ;;  %v2163_v34 = vshrl.u32 %v2146_v10, 16  ;;  %v2166_v35 = vshll.u32 %v2146_v10, 16 }
 0x160   : > { %v1184_v42 = vsel %vm4898_vm7, %v4971_v16, %v1183_v39  ;;  %1188 = vst [vmem:[#allocation2 + $0x38] sm:$0xf] %v1187_v40  ;;  %v1125_v44 = vpop.permute.xlu0 %1124  ;;  %4178 = vmatmul.msk.bf16.gmra.mxu1 %vm1390_vm8, %v1574_v33  ;;  %v1927_v39 = vld [vmem:[#allocation2 + $0x8] sm:$0xe]  ;;  %v1957_v40 = vrot.slane %v1729_v26, 5 }
 0x161   : > { %1185 = vst [vmem:[#allocation2 + $0x34] sm:$0x1] %v1184_v42  ;;  %v1190_v47 = vsel %vm4898_vm7, %v1125_v44, %v1189_v43  ;;  %v4529_v49 = vld [vmem:[#allocation2 + $0x2c] sm:$0xf0]  ;;  %v1953_v44 = vrot.slane %v5046_v30, 5  ;;  %v4220_v12 = vrot.slane %v1927_v39, 9 }
 0x162   : > { %1191 = vst [vmem:[#allocation2 + $0x3c] sm:$0x1] %v1190_v47  ;;  %4130 = vmatmul.msk.bf16.gmra.mxu3 %vm1390_vm8, %v1376_v41  ;;  %v4191_v52 = vor.u32 %v4529_v49, %v4190_v48  ;;  %v1241_v53 = vld [vmem:[#allocation2 + $0x30] sm:$0xf]  ;;  %v1195_v41 = vld [vmem:[#allocation2 + $0x44] sm:$0x1] }
 0x163   : > { %v1339_v16 = vshrl.u32 %v1241_v53, 16  ;;  %v1342_v54 = vshll.u32 %v1241_v53, 16  ;;  %v1511_v62 = vld [vmem:[#allocation2 + $0x30] sm:$0xe]  ;;  %v1743_v47 = vshrl.u32 %v1726_v31, 16  ;;  %v1746_v48 = vshll.u32 %v1726_v31, 16 }
 0x164   : > { %4206 = vmatmul.msk.bf16.gmra.mxu2 %vm1390_vm8, %v4191_v52  ;;  %v4146_v1 = vld [vmem:[#allocation2 + $0x30] sm:$0xf]  ;;  %v4166_v14 = vrot.slane %v1511_v62, 9  ;;  %v1762_v62 = vrot.slane %v1760_v3, 5  ;;  %v5074_v31 = vld [vmem:[#allocation2 + $0x24] sm:$0x1] }
 0x165   : > { %v1341_v60 = vrot.slane %v1339_v16, 4  ;;  %v1344_v63 = vrot.slane %v1342_v54, 5  ;;  %v1745_v4 = vrot.slane %v1743_v47, 4  ;;  %v1748_v3 = vrot.slane %v1746_v48, 5 }
 0x166   : > { %v885_v0 = vpop.permute.xlu1 %884  ;;  %v1965_v47 = vrot.slane %v5074_v31, 5 }
 0x167   : > { %v951_v5 = vsel %vm4835_vm13, %v885_v0, %v950_v58  ;;  %v4526_v6 = vld [vmem:[#allocation2 + $0x34] sm:$0xf0]  ;;  %v1345_v19 = vor.u32 %v1344_v63, %v1341_v60  ;;  %v1759_v58 = vrot.slane %v1757_v2, 4  ;;  %v1958_v0 = vsel %vm4915_vm2, %v4221_v59, %v1957_v40 }
 0x168   : > { %v1512_v7 = vld [vmem:[#allocation2 + $0x38] sm:$0xe]  ;;  %952 = vst [vmem:[#allocation2 + $0x40] sm:$0xf] %v951_v5  ;;  %v4147_v11 = vor.u32 %v4526_v6, %v4146_v1  ;;  %v1249_v13 = vld [vmem:[#allocation2 + $0x34] sm:$0x1]  ;;  %v1127_v49 = vpop.permute.xlu0 %1126  ;;  %v1954_v2 = vsel %vm4915_vm2, %v4220_v12, %v1953_v44  ;;  %v1984_v10 = vunpack.c.l.b16 %v1958_v0 }
 0x169   : > { %v1242_v8 = vld [vmem:[#allocation2 + $0x38] sm:$0xf]  ;;  %v1250_v17 = vld [vmem:[#allocation2 + $0x3c] sm:$0x1]  ;;  %v1558_v18 = vrot.slane %v1249_v13, 5  ;;  %v1348_v61 = vshll.u32 %v1249_v13, 16  ;;  %v1763_v13 = vor.u32 %v1762_v62, %v1759_v58  ;;  %v1983_v46 = vunpack.c.l.b16 %v1954_v2 }
 0x16a   : > { %v1353_v15 = vshrl.u32 %v1242_v8, 16  ;;  %v1356_v21 = vshll.u32 %v1242_v8, 16  ;;  %4159 = vmatmul.msk.bf16.gmra.mxu0 %vm1390_vm8, %v4147_v11  ;;  %v4167_v9 = vrot.slane %v1512_v7, 9  ;;  %v1562_v22 = vrot.slane %v1250_v17, 5  ;;  %v2148_v60 = vld [vmem:[#allocation2 + $0x18] sm:$0xf] }
 0x16b   : > { %v1362_v51 = vshll.u32 %v1250_v17, 16  ;;  %v1559_v27 = vsel %vm4915_vm2, %v4166_v14, %v1558_v18  ;;  %v1350_v28 = vrot.slane %v1348_v61, 5  ;;  %v1346_v37 = vrot.slane %v1345_v19, 4  ;;  %v5068_v14 = vld [vmem:[#allocation2 + $0x14] sm:$0x1] }
 0x16c   : > { %v1355_v24 = vrot.slane %v1353_v15, 4  ;;  %v1358_v29 = vrot.slane %v1356_v21, 5  ;;  %v1563_v32 = vsel %vm4915_vm2, %v4167_v9, %v1562_v22  ;;  %v1570_v33 = vunpack.c.l.b16 %v1559_v27  ;;  %v5070_v17 = vld [vmem:[#allocation2 + $0x1c] sm:$0x1]  ;;  %v4194_v9 = vld [vmem:[#allocation2 + $0x38] sm:$0xf] }
 0x16d   : > { %v1571_v36 = vunpack.c.l.b16 %v1563_v32  ;;  %v1364_v43 = vrot.slane %v1362_v51, 5  ;;  %v1351_v54 = vsel %vm4925_vm12, %v1346_v37, %v1350_v28  ;;  %v2165_v1 = vrot.slane %v2163_v34, 4  ;;  %v1730_v28 = vld [vmem:[#allocation2 + $0x18] sm:$0xf]  ;;  %v4242_v44 = vld [vmem:[#allocation2 + $0x10] sm:$0xf] }
 0x16e   : > { %v1359_v38 = vor.u32 %v1358_v29, %v1355_v24  ;;  %v1129_v42 = vpop.permute.xlu1 %1128  ;;  %v1372_v50 = vunpack.c.l.b16 %v1351_v54  ;;  %v2168_v5 = vrot.slane %v2166_v35, 5  ;;  %v2177_v6 = vshrl.u32 %v2148_v60, 16  ;;  %v1732_v29 = vld [vmem:[#allocation2 + $0x20] sm:$0xf]  ;;  %v4531_v34 = vld [vmem:[#allocation2 + $0x14] sm:$0xf0] }
 0x16f   : > { %v1192_v52 = vld [vmem:[#allocation2 + $0x40] sm:$0xf]  ;;  %v1196_v53 = vsel %vm4898_vm7, %v1129_v42, %v1195_v41  ;;  %v1575_v16 = vpack.c.b16 %v1571_v36, %v1570_v33  ;;  %v2180_v7 = vshll.u32 %v2148_v60, 16  ;;  %v1766_v11 = vshll.u32 %v1729_v26, 16  ;;  %v391_v33 = vld [vmem:[#allocation2 + $0x48] sm:$0x1] }
 0x170   : > { %v1360_v55 = vrot.slane %v1359_v38, 4  ;;  %v1193_v56 = vsel %vm4855_vm15, %v1127_v49, %v1192_v52  ;;  %1197 = vst [vmem:[#allocation2 + $0x44] sm:$0x1] %v1196_v53  ;;  %v1752_v59 = vshll.u32 %v5046_v30, 16  ;;  %v1749_v15 = vor.u32 %v1748_v3, %v1745_v4  ;;  %v1731_v36 = vld [vmem:[#allocation2 + $0x1c] sm:$0x1] }
 0x171   : > { %1194 = vst [vmem:[#allocation2 + $0x40] sm:$0xf] %v1193_v56  ;;  %4179 = vmatmul.msk.bf16.gmra.mxu1 %vm1390_vm8, %v1575_v16  ;;  %v2169_v18 = vor.u32 %v2168_v5, %v2165_v1  ;;  %v2179_v19 = vrot.slane %v2177_v6, 4  ;;  %v2182_v61 = vrot.slane %v2180_v7, 5  ;;  %v1991_v21 = vpack.c.b16 %v1984_v10, %v1983_v46  ;;  %v1929_v40 = vld [vmem:[#allocation2 + $0x18] sm:$0xe] }
 0x172   : > { %v1365_v63 = vsel %vm4925_vm12, %v1360_v55, %v1364_v43  ;;  %v1768_v24 = vrot.slane %v1766_v11, 5  ;;  %v1764_v26 = vrot.slane %v1763_v13, 4  ;;  %v2172_v27 = vshll.u32 %v5068_v14, 16  ;;  %v1930_v41 = vld [vmem:[#allocation2 + $0x20] sm:$0xe] }
 0x173   : > { %v1373_v25 = vunpack.c.l.b16 %v1365_v63  ;;  %v1754_v30 = vrot.slane %v1752_v59, 5  ;;  %v2186_v32 = vshll.u32 %v5070_v17, 16  ;;  %v1750_v35 = vrot.slane %v1749_v15, 4  ;;  %v423_v63 = vld [vmem:[#allocation2 + $0x4c] sm:$0x1] }
 0x174   : > { %v2170_v37 = vrot.slane %v2169_v18, 4  ;;  %v2183_v38 = vor.u32 %v2182_v61, %v2179_v19  ;;  %v1769_v39 = vsel %vm4925_vm12, %v1764_v26, %v1768_v24  ;;  %v1785_v42 = vshrl.u32 %v1732_v29, 16  ;;  %v5098_v26 = vld [vmem:[#allocation2 + $0x2c] sm:$0x1] }
 0x175   : > { %v1377_v8 = vpack.c.b16 %v1373_v25, %v1372_v50  ;;  %v1788_v43 = vshll.u32 %v1732_v29, 16  ;;  %v2174_v48 = vrot.slane %v2172_v27, 5  ;;  %v1771_v49 = vshrl.u32 %v1730_v28, 16  ;;  %v2150_v50 = vld [vmem:[#allocation2 + $0x20] sm:$0xf] }
 0x176   : > { %v392_v52 = vsel %vm4693_vm5, 0, %v391_v33  ;;  %v1755_v53 = vsel %vm4925_vm12, %v1750_v35, %v1754_v30  ;;  %v1961_v16 = vrot.slane %v1731_v36, 5  ;;  %v2188_v54 = vrot.slane %v2186_v32, 5  ;;  %v2152_v25 = vld [vmem:[#allocation2 + $0x28] sm:$0xf]  ;;  %v4521_v27 = vld [vmem:[%s5809_s5 + $0x80] sm:$0xff] }
 0x177   : > { %4131 = vmatmul.msk.bf16.gmra.mxu3 %vm1390_vm8, %v1377_v8  ;;  %v1774_v55 = vshll.u32 %v1730_v28, 16  ;;  %393 = vst [vmem:[#allocation2 + $0x48] sm:$0x1] %v392_v52  ;;  %v4243_v56 = vor.u32 %v4531_v34, %v4242_v44  ;;  %v4222_v58 = vrot.slane %v1929_v40, 9  ;;  %v4223_v62 = vrot.slane %v1930_v41, 9 }
 0x178   : > { %v4530_v22 = vld [vmem:[#allocation2 + $0x3c] sm:$0xf0]  ;;  %v2184_v60 = vrot.slane %v2183_v38, 4  ;;  %v1855_v12 = vunpack.c.l.b16 %v1769_v39  ;;  %v1787_v0 = vrot.slane %v1785_v42, 4  ;;  %v1790_v1 = vrot.slane %v1788_v43, 5  ;;  %2446 = vmatpush.bf16.msrb.mxu3 %v4521_v27 }
 0x179   : > { %v4195_v51 = vor.u32 %v4530_v22, %v4194_v9  ;;  %v1854_v4 = vunpack.c.l.b16 %v1755_v53  ;;  %v1966_v5 = vsel %vm4915_vm2, %v4223_v62, %v1965_v47  ;;  %v2175_v2 = vsel %vm4925_vm12, %v2170_v37, %v2174_v48  ;;  %v4246_v34 = vld [vmem:[#allocation2 + $0x20] sm:$0xf]  ;;  %v4532_v38 = vld [vmem:[#allocation2 + $0x24] sm:$0xf0]  ;;  %v5103_v39 = vld [vmem:[#allocation2 + $0x24] sm:$0x1] }
 0x17a   : > { %4236 = vmatmul.msk.bf16.vlgmr.msra.gmra.mxu0 %vm1390_vm8, %v1991_v21  ;;  %v1773_v3 = vrot.slane %v1771_v49, 4  ;;  %v1962_v6 = vsel %vm4915_vm2, %v4222_v58, %v1961_v16  ;;  %v2189_v7 = vsel %vm4925_vm12, %v2184_v60, %v2188_v54  ;;  %v1776_v8 = vrot.slane %v1774_v55, 5  ;;  %v1735_v42 = vld [vmem:[#allocation2 + $0x2c] sm:$0x1]  ;;  %v1737_v43 = vld [vmem:[#allocation2 + $0x34] sm:$0x1] }
 0x17b   : > { %4207 = vmatmul.msk.bf16.gmra.mxu2 %vm1390_vm8, %v4195_v51  ;;  %v424_v10 = vsel %vm4701_vm6, 0, %v423_v63  ;;  %v2191_v11 = vshrl.u32 %v2150_v50, 16  ;;  %v2194_v13 = vshll.u32 %v2150_v50, 16  ;;  %v2205_v46 = vshrl.u32 %v2152_v25, 16  ;;  %v1734_v48 = vld [vmem:[#allocation2 + $0x28] sm:$0xf] }
 0x17c   : > { %v2208_v59 = vshll.u32 %v2152_v25, 16  ;;  %425 = vst [vmem:[#allocation2 + $0x4c] sm:$0x1] %v424_v10  ;;  %v1862_v15 = vpack.c.b16 %v1855_v12, %v1854_v4  ;;  %v1986_v18 = vunpack.c.l.b16 %v1966_v5  ;;  %v1780_v19 = vshll.u32 %v1731_v36, 16  ;;  %v1736_v49 = vld [vmem:[#allocation2 + $0x30] sm:$0xf] }
 0x17d   : > { %v1791_v61 = vor.u32 %v1790_v1, %v1787_v0  ;;  %v2275_v21 = vunpack.c.l.b16 %v2189_v7  ;;  %v1985_v9 = vunpack.c.l.b16 %v1962_v6  ;;  %v2274_v22 = vunpack.c.l.b16 %v2175_v2  ;;  %v1932_v16 = vld [vmem:[#allocation2 + $0x30] sm:$0xe]  ;;  %v2156_v50 = vld [vmem:[#allocation2 + $0x38] sm:$0xf] }
 0x17e   : > { %v1777_v24 = vor.u32 %v1776_v8, %v1773_v3  ;;  %v1794_v51 = vshll.u32 %v5074_v31, 16  ;;  %v2193_v28 = vrot.slane %v2191_v11, 4  ;;  %v2196_v29 = vrot.slane %v2194_v13, 5 }
 0x17f   : > { %v2207_v30 = vrot.slane %v2205_v46, 4  ;;  %v2210_v32 = vrot.slane %v2208_v59, 5  ;;  %v1992_v33 = vpack.c.b16 %v1986_v18, %v1985_v9  ;;  %v1782_v35 = vrot.slane %v1780_v19, 5  ;;  %v2154_v19 = vld [vmem:[#allocation2 + $0x30] sm:$0xf] }
 0x180   : > { %v1792_v36 = vrot.slane %v1791_v61, 4  ;;  %v2282_v37 = vpack.c.b16 %v2275_v21, %v2274_v22  ;;  %v2214_v31 = vshll.u32 %v5098_v26, 16  ;;  %v1778_v40 = vrot.slane %v1777_v24, 4 }
 0x181   : > { %4264 = vmatmul.msk.bf16.vlgmr.msrb.gmra.mxu1 %vm1390_vm8, %v4243_v56  ;;  %v1796_v41 = vrot.slane %v1794_v51, 5  ;;  %v2197_v44 = vor.u32 %v2196_v29, %v2193_v28  ;;  %v2211_v47 = vor.u32 %v2210_v32, %v2207_v30  ;;  %v2200_v54 = vshll.u32 %v5103_v39, 16  ;;  %v1931_v56 = vld [vmem:[#allocation2 + $0x28] sm:$0xe] }
 0x182   : > { %v1783_v52 = vsel %vm4925_vm12, %v1778_v40, %v1782_v35  ;;  %v4247_v55 = vor.u32 %v4532_v38, %v4246_v34  ;;  %v1969_v58 = vrot.slane %v1735_v42, 5  ;;  %v1973_v62 = vrot.slane %v1737_v43, 5  ;;  %v1933_v38 = vld [vmem:[#allocation2 + $0x38] sm:$0xe] }
 0x183   : > { %v1797_v53 = vsel %vm4925_vm12, %v1792_v36, %v1796_v41  ;;  %v2216_v60 = vrot.slane %v2214_v31, 5  ;;  %v1799_v63 = vshrl.u32 %v1734_v48, 16  ;;  %v1802_v12 = vshll.u32 %v1734_v48, 16  ;;  %v1934_v48 = vld [vmem:[#allocation2 + $0x40] sm:$0xe] }
 0x184   : > { %v1813_v0 = vshrl.u32 %v1736_v49, 16  ;;  %v1816_v1 = vshll.u32 %v1736_v49, 16  ;;  %v1857_v25 = vunpack.c.l.b16 %v1797_v53  ;;  %v4225_v4 = vrot.slane %v1932_v16, 9 }
 0x185   : > { %v2198_v5 = vrot.slane %v2197_v44, 4  ;;  %v2212_v2 = vrot.slane %v2211_v47, 4  ;;  %v1856_v3 = vunpack.c.l.b16 %v1783_v52  ;;  %v4224_v6 = vrot.slane %v1931_v56, 9  ;;  %v5125_v44 = vld [vmem:[#allocation2 + $0x34] sm:$0x1] }
 0x186   : > { %v2202_v7 = vrot.slane %v2200_v54, 5  ;;  %v1974_v8 = vsel %vm4915_vm2, %v4225_v4, %v1973_v62  ;;  %v2233_v11 = vshrl.u32 %v2156_v50, 16  ;;  %v2236_v13 = vshll.u32 %v2156_v50, 16  ;;  %v5129_v47 = vld [vmem:[#allocation2 + $0x44] sm:$0x1] }
 0x187   : > { %4216 = vmatmul.msk.bf16.vlgmr.msra.gmra.mxu3 %vm1390_vm8, %v1862_v15  ;;  %v2217_v10 = vsel %vm4925_vm12, %v2212_v2, %v2216_v60  ;;  %v1801_v46 = vrot.slane %v1799_v63, 4  ;;  %v1804_v59 = vrot.slane %v1802_v12, 5  ;;  %v1815_v15 = vrot.slane %v1813_v0, 4  ;;  %v4533_v56 = vld [vmem:[#allocation2 + $0x34] sm:$0xf0] }
 0x188   : > { %v1818_v18 = vrot.slane %v1816_v1, 5  ;;  %v1863_v61 = vpack.c.b16 %v1857_v25, %v1856_v3  ;;  %v1970_v21 = vsel %vm4915_vm2, %v4224_v6, %v1969_v58  ;;  %v2203_v9 = vsel %vm4925_vm12, %v2198_v5, %v2202_v7  ;;  %v1738_v25 = vld [vmem:[#allocation2 + $0x38] sm:$0xf]  ;;  %v4250_v4 = vld [vmem:[#allocation2 + $0x30] sm:$0xf] }
 0x189   : > { %v1988_v22 = vunpack.c.l.b16 %v1974_v8  ;;  %v2277_v24 = vunpack.c.l.b16 %v2217_v10  ;;  %v1808_v51 = vshll.u32 %v1735_v42, 16  ;;  %v1822_v27 = vshll.u32 %v1737_v43, 16  ;;  %v5127_v42 = vld [vmem:[#allocation2 + $0x3c] sm:$0x1]  ;;  %v2158_v8 = vld [vmem:[#allocation2 + $0x40] sm:$0xf] }
 0x18a   : > { %4237 = vmatmul.msk.bf16.gmra.mxu0 %vm1390_vm8, %v1992_v33  ;;  %v2219_v28 = vshrl.u32 %v2154_v19, 16  ;;  %v2222_v29 = vshll.u32 %v2154_v19, 16  ;;  %v2235_v30 = vrot.slane %v2233_v11, 4  ;;  %v2238_v32 = vrot.slane %v2236_v13, 5 }
 0x18b   : > { %4276 = vmatmul.msk.bf16.vlgmr.msrb.gmra.mxu2 %vm1390_vm8, %v2282_v37  ;;  %v1987_v33 = vunpack.c.l.b16 %v1970_v21  ;;  %v1805_v34 = vor.u32 %v1804_v59, %v1801_v46  ;;  %v1819_v35 = vor.u32 %v1818_v18, %v1815_v15  ;;  %v2276_v36 = vunpack.c.l.b16 %v2203_v9  ;;  %v5123_v37 = vld [vmem:[#allocation2 + $0x3c] sm:$0x1]  ;;  %v2160_v59 = vld [vmem:[#allocation2 + $0x48] sm:$0xf] }
 0x18c   : > { %v1810_v40 = vrot.slane %v1808_v51, 5  ;;  %v1824_v41 = vrot.slane %v1822_v27, 5  ;;  %v2221_v49 = vrot.slane %v2219_v28, 4  ;;  %v2224_v52 = vrot.slane %v2222_v29, 5 }
 0x18d   : > { %v1993_v31 = vpack.c.b16 %v1988_v22, %v1987_v33  ;;  %v2283_v43 = vpack.c.b16 %v2277_v24, %v2276_v36  ;;  %v2239_v53 = vor.u32 %v2238_v32, %v2235_v30  ;;  %v1806_v16 = vrot.slane %v1805_v34, 4 }
 0x18e   : > { %v1820_v54 = vrot.slane %v1819_v35, 4  ;;  %v4226_v58 = vrot.slane %v1933_v38, 9  ;;  %v1977_v62 = vrot.slane %v5123_v37, 5  ;;  %v2228_v60 = vshll.u32 %v5125_v44, 16 }
 0x18f   : > { %v2242_v63 = vshll.u32 %v5127_v42, 16  ;;  %v1811_v12 = vsel %vm4925_vm12, %v1806_v16, %v1810_v40  ;;  %v4227_v1 = vrot.slane %v1934_v48, 9  ;;  %v1981_v50 = vrot.slane %v5129_v47, 5 }
 0x190   : > { %v1825_v0 = vsel %vm4925_vm12, %v1820_v54, %v1824_v41  ;;  %v2225_v5 = vor.u32 %v2224_v52, %v2221_v49  ;;  %v2240_v2 = vrot.slane %v2239_v53, 4  ;;  %v4251_v7 = vor.u32 %v4533_v56, %v4250_v4 }
 0x191   : > { %4265 = vmatmul.msk.bf16.gmra.mxu1 %vm1390_vm8, %v4247_v55  ;;  %v1740_v55 = vld [vmem:[#allocation2 + $0x40] sm:$0xf]  ;;  %v1978_v10 = vsel %vm4915_vm2, %v4226_v58, %v1977_v62  ;;  %v2244_v11 = vrot.slane %v2242_v63, 5  ;;  %v1827_v13 = vshrl.u32 %v1738_v25, 16  ;;  %v1830_v46 = vshll.u32 %v1738_v25, 16 }
 0x192   : > { %v1841_v3 = vshrl.u32 %v1740_v55, 16  ;;  %v1844_v6 = vshll.u32 %v1740_v55, 16  ;;  %v1858_v15 = vunpack.c.l.b16 %v1811_v12  ;;  %v1859_v18 = vunpack.c.l.b16 %v1825_v0  ;;  %v5153_v58 = vld [vmem:[#allocation2 + $0x44] sm:$0x1]  ;;  %v5155_v62 = vld [vmem:[#allocation2 + $0x4c] sm:$0x1] }
 0x193   : > { %v1982_v19 = vsel %vm4915_vm2, %v4227_v1, %v1981_v50  ;;  %v2226_v21 = vrot.slane %v2225_v5, 4  ;;  %v2245_v9 = vsel %vm4925_vm12, %v2240_v2, %v2244_v11  ;;  %v2247_v51 = vshrl.u32 %v2158_v8, 16  ;;  %v4534_v50 = vld [vmem:[#allocation2 + $0x44] sm:$0xf0] }
 0x194   : > { %v1843_v22 = vrot.slane %v1841_v3, 4  ;;  %v1846_v24 = vrot.slane %v1844_v6, 5  ;;  %v2250_v27 = vshll.u32 %v2158_v8, 16  ;;  %v2261_v28 = vshrl.u32 %v2160_v59, 16 }
 0x195   : > { %v2264_v29 = vshll.u32 %v2160_v59, 16  ;;  %v1829_v30 = vrot.slane %v1827_v13, 4  ;;  %v1832_v32 = vrot.slane %v1830_v46, 5  ;;  %v1864_v33 = vpack.c.b16 %v1859_v18, %v1858_v15 }
 0x196   : > { %v1990_v34 = vunpack.c.l.b16 %v1982_v19  ;;  %v1989_v36 = vunpack.c.l.b16 %v1978_v10  ;;  %v2279_v38 = vunpack.c.l.b16 %v2245_v9  ;;  %v2249_v40 = vrot.slane %v2247_v51, 4  ;;  %v2348_v19 = vld [vmem:[#allocation2 + $0x18] sm:$0xe]  ;;  %v2347_v9 = vld [vmem:[#allocation2 + $0x10] sm:$0xe] }
 0x197   : > { %4217 = vmatmul.msk.bf16.gmra.mxu3 %vm1390_vm8, %v1863_v61  ;;  %v2230_v61 = vrot.slane %v2228_v60, 5  ;;  %v2252_v41 = vrot.slane %v2250_v27, 5  ;;  %v2266_v48 = vrot.slane %v2264_v29, 5  ;;  %v1833_v52 = vor.u32 %v1832_v32, %v1829_v30 }
 0x198   : > { %v1850_v53 = vshll.u32 %v5129_v47, 16  ;;  %v1994_v16 = vpack.c.b16 %v1990_v34, %v1989_v36  ;;  %v1836_v55 = vshll.u32 %v5123_v37, 16  ;;  %v2270_v12 = vshll.u32 %v5155_v62, 16  ;;  %v4254_v47 = vld [vmem:[#allocation2 + $0x40] sm:$0xf] }
 0x199   : > { %v2231_v35 = vsel %vm4925_vm12, %v2226_v21, %v2230_v61  ;;  %v2253_v60 = vor.u32 %v2252_v41, %v2249_v40  ;;  %v1834_v0 = vrot.slane %v1833_v52, 4  ;;  %v2256_v25 = vshll.u32 %v5153_v58, 16 }
 0x19a   : > { %4238 = vmatmul.msk.bf16.gmra.mxu0 %vm1390_vm8, %v1993_v31  ;;  %v1847_v31 = vor.u32 %v1846_v24, %v1843_v22  ;;  %v2278_v49 = vunpack.c.l.b16 %v2231_v35  ;;  %v1852_v1 = vrot.slane %v1850_v53, 5  ;;  %v1838_v37 = vrot.slane %v1836_v55, 5  ;;  %v2349_v35 = vld [vmem:[#allocation2 + $0x20] sm:$0xe]  ;;  %v2352_v53 = vld [vmem:[#allocation2 + $0x38] sm:$0xe] }
 0x19b   : > { %4277 = vmatmul.msk.bf16.gmra.mxu2 %vm1390_vm8, %v2283_v43  ;;  %v2263_v43 = vrot.slane %v2261_v28, 4  ;;  %v2254_v5 = vrot.slane %v2253_v60, 4  ;;  %v2272_v3 = vrot.slane %v2270_v12, 5  ;;  %v4255_v6 = vor.u32 %v4534_v50, %v4254_v47 }
 0x19c   : > { %v2284_v54 = vpack.c.b16 %v2279_v38, %v2278_v49  ;;  %v1848_v56 = vrot.slane %v1847_v31, 4  ;;  %v2258_v10 = vrot.slane %v2256_v25, 5  ;;  %v2377_v21 = vrot.slane %v5070_v17, 5  ;;  %v2350_v17 = vld [vmem:[#allocation2 + $0x28] sm:$0xe] }
 0x19d   : > { %v2267_v63 = vor.u32 %v2266_v48, %v2263_v43  ;;  %v2373_v22 = vrot.slane %v5068_v14, 5  ;;  %v4281_v24 = vrot.slane %v2348_v19, 9  ;;  %v4280_v51 = vrot.slane %v2347_v9, 9  ;;  %v2354_v25 = vld [vmem:[#allocation2 + $0x48] sm:$0xe] }
 0x19e   : > { %v1853_v4 = vsel %vm4925_vm12, %v1848_v56, %v1852_v1  ;;  %v2259_v13 = vsel %vm4925_vm12, %v2254_v5, %v2258_v10  ;;  %v2385_v34 = vrot.slane %v5098_v26, 5  ;;  %v2381_v14 = vrot.slane %v5103_v39, 5  ;;  %v2351_v26 = vld [vmem:[#allocation2 + $0x30] sm:$0xe] }
 0x19f   : > { %v2268_v2 = vrot.slane %v2267_v63, 4  ;;  %v1861_v8 = vunpack.c.l.b16 %v1853_v4  ;;  %v2280_v15 = vunpack.c.l.b16 %v2259_v13  ;;  %v2378_v27 = vsel %vm4915_vm2, %v4281_v24, %v2377_v21 }
 0x1a0   : > { %v2374_v28 = vsel %vm4915_vm2, %v4280_v51, %v2373_v22  ;;  %v2404_v29 = vunpack.c.l.b16 %v2378_v27  ;;  %v4283_v36 = vrot.slane %v2350_v17, 9  ;;  %v4282_v31 = vrot.slane %v2349_v35, 9 }
 0x1a1   : > { %4266 = vmatmul.msk.bf16.gmra.mxu1 %vm1390_vm8, %v4251_v7  ;;  %v1839_v7 = vsel %vm4925_vm12, %v1834_v0, %v1838_v37  ;;  %v2273_v46 = vsel %vm4925_vm12, %v2268_v2, %v2272_v3  ;;  %v2403_v30 = vunpack.c.l.b16 %v2374_v28  ;;  %v2389_v39 = vrot.slane %v5125_v44, 5  ;;  %v2353_v44 = vld [vmem:[#allocation2 + $0x40] sm:$0xe]  ;;  %v4538_v28 = vld [vmem:[%s5811_s7 + $0x18] sm:$0xff] }
 0x1a2   : > { %v1860_v11 = vunpack.c.l.b16 %v1839_v7  ;;  %v2281_v18 = vunpack.c.l.b16 %v2273_v46  ;;  %v2386_v40 = vsel %vm4915_vm2, %v4283_v36, %v2385_v34  ;;  %v2382_v41 = vsel %vm4915_vm2, %v4282_v31, %v2381_v14  ;;  %2841 = vmatpush.bf16.msrb.mxu0 %v4538_v28  ;;  %v440_v28 = vld [vmem:[#allocation3 + $0x18] sm:$0x1] }
 0x1a3   : > { %v2406_v43 = vunpack.c.l.b16 %v2386_v40  ;;  %v2405_v48 = vunpack.c.l.b16 %v2382_v41  ;;  %v4285_v55 = vrot.slane %v2352_v53, 9  ;;  %v4286_v4 = vrot.slane %v2353_v44, 9 }
 0x1a4   : > { %v1865_v59 = vpack.c.b16 %v1861_v8, %v1860_v11  ;;  %v2285_v61 = vpack.c.b16 %v2281_v18, %v2280_v15  ;;  %v2397_v5 = vrot.slane %v5153_v58, 5  ;;  %v4287_v2 = vrot.slane %v2354_v25, 9 }
 0x1a5   : > { %v2412_v49 = vpack.c.b16 %v2406_v43, %v2405_v48  ;;  %v2401_v3 = vrot.slane %v5155_v62, 5  ;;  %v434_v48 = vld [vmem:[#allocation3 + $0x8] sm:$0x1] }
 0x1a6   : > { %v2398_v8 = vsel %vm4915_vm2, %v4286_v4, %v2397_v5  ;;  %v435_v53 = vsel %vm4693_vm5, 0, %v434_v48  ;;  %v470_v48 = vld [vmem:[#allocation3 + $0x1c] sm:$0x1] }
 0x1a7   : > { %4218 = vmatmul.msk.bf16.gmra.mxu3 %vm1390_vm8, %v1864_v33  ;;  %v2411_v33 = vpack.c.b16 %v2404_v29, %v2403_v30  ;;  %v2402_v10 = vsel %vm4915_vm2, %v4287_v2, %v2401_v3  ;;  %v2409_v11 = vunpack.c.l.b16 %v2398_v8  ;;  %436 = vst [vmem:[#allocation3 + $0x8] sm:$0x1] %v435_v53  ;;  %v4537_v2 = vld [vmem:[%s5811_s7 + $0x10] sm:$0xff]  ;;  %v437_v3 = vld [vmem:[#allocation3 + $0x10] sm:$0x1] }
 0x1a8   : > { %v2410_v13 = vunpack.c.l.b16 %v2402_v10  ;;  %v467_v8 = vld [vmem:[#allocation3 + $0x14] sm:$0x1]  ;;  %v438_v10 = vsel %vm4693_vm5, 0, %v437_v3  ;;  %2842 = vmatpush.bf16.msrb.mxu0 %v4537_v2  ;;  %v473_v3 = vld [vmem:[#allocation3 + $0x24] sm:$0x1] }
 0x1a9   : > { %439 = vst [vmem:[#allocation3 + $0x10] sm:$0x1] %v438_v10 }
 0x1aa   : > { %4239 = vmatmul.msk.bf16.gmra.mxu0 %vm1390_vm8, %v1994_v16  ;;  %v2393_v16 = vrot.slane %v5127_v42, 5  ;;  %v1485_v12 = vpop.f32.mrf.mxu0  ;;  %v2414_v58 = vpack.c.b16 %v2410_v13, %v2409_v11 }
 0x1ab   : > { %4278 = vmatmul.msk.bf16.gmra.mxu2 %vm1390_vm8, %v2284_v54  ;;  %v4284_v54 = vrot.slane %v2351_v26, 9 }
 0x1ac   : > { %v2394_v63 = vsel %vm4915_vm2, %v4285_v55, %v2393_v16 }
 0x1ad   : > { %v2390_v60 = vsel %vm4915_vm2, %v4284_v54, %v2389_v39  ;;  %v2408_v1 = vunpack.c.l.b16 %v2394_v63 }
 0x1ae   : > { %v2407_v0 = vunpack.c.l.b16 %v2390_v60 }
 0x1b0   : > { %v2413_v50 = vpack.c.b16 %v2408_v1, %v2407_v0 }
 0x1b1   : > { %4267 = vmatmul.msk.bf16.gmra.mxu1 %vm1390_vm8, %v4255_v6  ;;  %v1698_v6 = vpop.f32.mrf.mxu2 }
 0x1b2   : > { %v1487_v37 = vpop.f32.mrf.mxu0 }
 0x1b7   : > { %4219 = vmatmul.msk.bf16.gmra.mxu3 %vm1390_vm8, %v1865_v59  ;;  %v1609_v47 = vpop.f32.mrf.mxu1 }
 0x1b9   : > { %v1700_v15 = vpop.f32.mrf.mxu2 }
 0x1ba   : > { %v1490_v59 = vpop.f32.mrf.mxu0 }
 0x1bb   : > { %4279 = vmatmul.msk.bf16.gmra.mxu2 %vm1390_vm8, %v2285_v61 }
 0x1bf   : > { %v5178_v32 = vpop.f32.mrf.mxu3  ;;  %v1611_v7 = vpop.f32.mrf.mxu1 }
 0x1c0   : > { %v1486_v63 = vadd.f32 %v1485_v12, %v5178_v32  ;;  %v468_v32 = vsel %vm4701_vm6, 0, %v467_v8 }
 0x1c1   : > { %469 = vst [vmem:[#allocation3 + $0x14] sm:$0x1] %v468_v32 }
 0x1c2   : > { %v5216_v19 = vpop.f32.mrf.mxu0 }
 0x1c7   : > { %4296 = vmatmul.msk.bf16.vlgmr.msrb.gmra.mxu3 %vm1390_vm8, %v2411_v33  ;;  %v5183_v38 = vpop.f32.mrf.mxu3 }
 0x1c8   : > { %v1488_v25 = vadd.f32 %v1487_v37, %v5183_v38 }
 0x1cd   : > { %v5211_v18 = vpop.f32.mrf.mxu1 }
 0x1d0   : > { %v5224_v22 = vpop.f32.mrf.mxu0 }
 0x1d5   : > { %v5189_v52 = vpop.f32.mrf.mxu3  ;;  %v5218_v61 = vpop.f32.mrf.mxu2 }
 0x1d6   : > { %v5220_v21 = vpop.f32.mrf.mxu1  ;;  %v1491_v11 = vadd.f32 %v1490_v59, %v5189_v52 }
 0x1d7   : > { %4297 = vmatmul.msk.bf16.gmra.mxu3 %vm1390_vm8, %v2412_v49  ;;  %v464_v49 = vld [vmem:[#allocation3 + $0xc] sm:$0x1] }
 0x1d8   : > { %v5233_v29 = vpop.f32.mrf.mxu0  ;;  %v465_v39 = vsel %vm4701_vm6, 0, %v464_v49  ;;  %v441_v49 = vsel %vm4693_vm5, 0, %v440_v28 }
 0x1d9   : > { %466 = vst [vmem:[#allocation3 + $0xc] sm:$0x1] %v465_v39 }
 0x1da   : > { %442 = vst [vmem:[#allocation3 + $0x18] sm:$0x1] %v441_v49 }
 0x1dd   : > { %v5194_v56 = vpop.f32.mrf.mxu3  ;;  %v5226_v24 = vpop.f32.mrf.mxu2 }
 0x1de   : > { %v5228_v51 = vpop.f32.mrf.mxu1  ;;  %v1493_v52 = vadd.f32 %v5216_v19, %v5194_v56  ;;  %v4536_v56 = vld [vmem:[%s5811_s7 + $0x8] sm:$0xff]  ;;  %v443_v19 = vld [vmem:[#allocation3 + $0x20] sm:$0x1] }
 0x1df   : > { %v444_v2 = vsel %vm4693_vm5, 0, %v443_v19  ;;  %2914 = vmatpush.bf16.msra.mxu1 %v4536_v56 }
 0x1e0   : > { %445 = vst [vmem:[#allocation3 + $0x20] sm:$0x1] %v444_v2 }
 0x1e5   : > { %v5201_v42 = vpop.f32.mrf.mxu3 }
 0x1e6   : > { %v5237_v17 = vpop.f32.mrf.mxu1 }
 0x1e7   : > { %4298 = vmatmul.msk.bf16.gmra.mxu3 %vm1390_vm8, %v2413_v50  ;;  %v5235_v30 = vpop.f32.mrf.mxu2  ;;  %v5239_v34 = vpop.f32.mrf.mxu0  ;;  %v1629_v50 = vadd.f32 %v1609_v47, %v1486_v63  ;;  %v1630_v47 = vadd.f32 %v1611_v7, %v1488_v25  ;;  %v1631_v7 = vadd.f32 %v5211_v18, %v1491_v11  ;;  %v5289_v25 = vld [vmem:[%s5810_s6] ss:$0 sm:$0xff] }
 0x1e9   : > { %v1718_v5 = vadd.f32 %v1698_v6, %v1629_v50 }
 0x1ed   : > { %v5209_v46 = vpop.f32.mrf.mxu3 }
 0x1ee   : > { %v5245_v36 = vpop.f32.mrf.mxu1  ;;  %v1498_v11 = vadd.f32 %v5233_v29, %v5209_v46  ;;  %v2586_v29 = vld [vmem:[#allocation3 + $0x8] sm:$0xf] }
 0x1ef   : > { %v5241_v35 = vpop.f32.mrf.mxu2  ;;  %v5247_v31 = vpop.f32.mrf.mxu0 }
 0x1f6   : > { %v5253_v43 = vpop.f32.mrf.mxu1 }
 0x1f7   : > { %4299 = vmatmul.msk.bf16.gmra.mxu3 %vm1390_vm8, %v2414_v58  ;;  %v2028_v16 = vpop.f32.mrf.mxu0  ;;  %v1719_v58 = vadd.f32 %v1700_v15, %v1630_v47 }
 0x1fa   : > { %v5214_v62 = vpop.f32.mrf.mxu3 }
 0x1fe   : > { %v5249_v40 = vpop.f32.mrf.mxu2  ;;  %v2118_v55 = vpop.f32.mrf.mxu1 }
 0x1ff   : > { %v2030_v0 = vpop.f32.mrf.mxu0 }
 0x202   : > { %v5222_v9 = vpop.f32.mrf.mxu3 }
 0x206   : > { %v5261_v54 = vpop.f32.mrf.mxu2  ;;  %v2120_v4 = vpop.f32.mrf.mxu1 }
 0x207   : > { %v2033_v38 = vpop.f32.mrf.mxu0 }
 0x20a   : > { %v1899_v27 = vpop.f32.mrf.mxu3 }
 0x20b   : > { %v1919_v12 = vadd.f32 %v1899_v27, %v1718_v5  ;;  %v471_v27 = vsel %vm4701_vm6, 0, %v470_v48  ;;  %v1720_v5 = vadd.f32 %v5218_v61, %v1631_v7 }
 0x20c   : > { %472 = vst [vmem:[#allocation3 + $0x1c] sm:$0x1] %v471_v27 }
 0x20d   : > { %v2048_v6 = vadd.f32 %v2028_v16, %v1919_v12 }
 0x20e   : > { %v2319_v1 = vpop.f32.mrf.mxu2  ;;  %v2123_v53 = vpop.f32.mrf.mxu1 }
 0x20f   : > { %v2138_v39 = vadd.f32 %v2118_v55, %v2048_v6  ;;  %v2035_v15 = vpop.f32.mrf.mxu0 }
 0x211   : > { %v2339_v59 = vadd.f32 %v2319_v1, %v2138_v39  ;;  %v461_v39 = vld [vmem:[#allocation3 + $0x4] sm:$0x1] }
 0x212   : > { %v1901_v33 = vpop.f32.mrf.mxu3 }
 0x213   : > { %v1920_v63 = vadd.f32 %v1901_v33, %v1719_v58  ;;  %v1496_v33 = vadd.f32 %v5224_v22, %v5201_v42  ;;  %v4535_v42 = vld [vmem:[%s5811_s7] sm:$0xff]  ;;  %v474_v22 = vsel %vm4701_vm6, 0, %v473_v3  ;;  %v476_v3 = vld [vmem:[#allocation3 + $0x2c] sm:$0x1] }
 0x214   : > { %475 = vst [vmem:[#allocation3 + $0x24] sm:$0x1] %v474_v22  ;;  %2915 = vmatpush.bf16.msra.mxu1 %v4535_v42 }
 0x215   : > { %v2049_v16 = vadd.f32 %v2030_v0, %v1920_v63  ;;  %v1632_v0 = vadd.f32 %v5220_v21, %v1493_v52  ;;  %v1633_v21 = vadd.f32 %v5228_v51, %v1496_v33  ;;  %v2589_v33 = vld [vmem:[#allocation3 + $0xc] sm:$0x1] }
 0x216   : > { %v2321_v37 = vpop.f32.mrf.mxu2 }
 0x217   : > { %v2139_v8 = vadd.f32 %v2120_v4, %v2049_v16  ;;  %v1721_v32 = vadd.f32 %v5226_v24, %v1632_v0  ;;  %v1722_v6 = vadd.f32 %v5235_v30, %v1633_v21  ;;  %v2038_v48 = vpop.f32.mrf.mxu0  ;;  %v4540_v24 = vld [vmem:[%s5811_s7 + $0x28] sm:$0xff]  ;;  %v4542_v30 = vld [vmem:[%s5811_s7 + $0x38] sm:$0xff] }
 0x218   : > { %3035 = vmatpush.bf16.msra.mxu2 %v4540_v24  ;;  %3124 = vmatpush.bf16.msra.mxu3 %v4542_v30 }
 0x219   : > { %v2340_v4 = vadd.f32 %v2321_v37, %v2139_v8 }
 0x21a   : > { %v5243_v14 = vpop.f32.mrf.mxu3 }
 0x21b   : > { %v1921_v1 = vadd.f32 %v5243_v14, %v1720_v5  ;;  %v2125_v14 = vpop.f32.mrf.mxu1 }
 0x21d   : > { %v2050_v12 = vadd.f32 %v2033_v38, %v1921_v1  ;;  %v431_v38 = vld [vmem:[#allocation3] sm:$0x1] }
 0x21e   : > { %v2324_v50 = vpop.f32.mrf.mxu2 }
 0x21f   : > { %v2140_v37 = vadd.f32 %v2123_v53, %v2050_v12  ;;  %v462_v53 = vsel %vm4701_vm6, 0, %v461_v39 }
 0x220   : > { %463 = vst [vmem:[#allocation3 + $0x4] sm:$0x1] %v462_v53 }
 0x222   : > { %v5251_v41 = vpop.f32.mrf.mxu3 }
 0x223   : > { %v1922_v58 = vadd.f32 %v5251_v41, %v1721_v32  ;;  %v432_v41 = vsel %vm4693_vm5, 0, %v431_v38  ;;  %v2128_v8 = vpop.f32.mrf.mxu1  ;;  %v477_v32 = vsel %vm4701_vm6, 0, %v476_v3 }
 0x224   : > { %433 = vst [vmem:[#allocation3] sm:$0x1] %v432_v41 }
 0x225   : > { %v2051_v16 = vadd.f32 %v2035_v15, %v1922_v58  ;;  %v2341_v15 = vadd.f32 %v2324_v50, %v2140_v37  ;;  %v1503_v50 = vadd.f32 %v5247_v31, %v5222_v9  ;;  %v2592_v9 = vld [vmem:[#allocation3 + $0x10] sm:$0xf]  ;;  %478 = vst [vmem:[#allocation3 + $0x2c] sm:$0x1] %v477_v32 }
 0x226   : > { %v5313_v49 = vpop.f32.mrf.mxu2 }
 0x227   : > { %v2141_v21 = vadd.f32 %v2125_v14, %v2051_v16  ;;  %v5361_v37 = vadd.f32 %v5253_v43, %v1503_v50 }
 0x22a   : > { %v5255_v26 = vpop.f32.mrf.mxu3 }
 0x22b   : > { %v1923_v46 = vadd.f32 %v5255_v26, %v1722_v6  ;;  %v1634_v26 = vadd.f32 %v5237_v17, %v1498_v11  ;;  %v446_v17 = vld [vmem:[#allocation3 + $0x28] sm:$0x1]  ;;  %v4544_v6 = vld [vmem:[%s5811_s7 + $0x48] sm:$0xff]  ;;  %v2671_v14 = vld [vmem:[#allocation3] sm:$0xf] }
 0x22c   : > { %v447_v2 = vsel %vm4693_vm5, 0, %v446_v17  ;;  %v2688_v24 = vshrl.u32 %v2671_v14, 16  ;;  %v2691_v38 = vshll.u32 %v2671_v14, 16  ;;  %3325 = vmatpush.bf16.msra.mxu0 %v4544_v6  ;;  %v452_v14 = vld [vmem:[#allocation3 + $0x38] sm:$0x1] }
 0x22d   : > { %v2052_v1 = vadd.f32 %v2038_v48, %v1923_v46  ;;  %448 = vst [vmem:[#allocation3 + $0x28] sm:$0x1] %v447_v2  ;;  %v2595_v46 = vld [vmem:[#allocation3 + $0x14] sm:$0x1] }
 0x22e   : > { %v2329_v48 = vpop.f32.mrf.mxu2  ;;  %v2693_v16 = vrot.slane %v2691_v38, 5  ;;  %v482_v38 = vld [vmem:[#allocation3 + $0x3c] sm:$0x1] }
 0x22f   : > { %v2142_v11 = vadd.f32 %v2128_v8, %v2052_v1  ;;  %v2130_v8 = vpop.f32.mrf.mxu1 }
 0x231   : > { %v5364_v53 = vadd.f32 %v2329_v48, %v2142_v11 }
 0x232   : > { %v5263_v60 = vpop.f32.mrf.mxu3 }
 0x236   : > { %v2331_v48 = vpop.f32.mrf.mxu2 }
 0x23a   : > { %v5266_v44 = vpop.f32.mrf.mxu3 }
 0x242   : > { %v5277_v13 = vpop.f32.mrf.mxu3 }
 0x24a   : > { %v2448_v55 = vpop.f32.mrf.mxu3 }
 0x24b   : > { %v2468_v18 = vadd.f32 %v2448_v55, %v2339_v59  ;;  %v4539_v59 = vld [vmem:[%s5811_s7 + $0x20] sm:$0xff]  ;;  %v4541_v55 = vld [vmem:[%s5811_s7 + $0x30] sm:$0xff] }
 0x24c   : > { %3036 = vmatpush.bf16.msra.mxu2 %v4539_v59  ;;  %3125 = vmatpush.bf16.msra.mxu3 %v4541_v55  ;;  %v449_v59 = vld [vmem:[#allocation3 + $0x30] sm:$0x1]  ;;  %v479_v55 = vld [vmem:[#allocation3 + $0x34] sm:$0x1] }
 0x24d   : > { %v2479_v61 = vadd.f32 %v5289_v25, %v2468_v18  ;;  %v1501_v18 = vadd.f32 %v5239_v34, %v5214_v62  ;;  %v2937_v62 = vld [vmem:[#allocation3] sm:$0xe]  ;;  %v1723_v34 = vadd.f32 %v5241_v35, %v1634_v26  ;;  %v450_v3 = vsel %vm4693_vm5, 0, %v449_v59 }
 0x24e   : > { %v4340_v31 = vrot.slane %v2937_v62, 9  ;;  %v480_v62 = vsel %vm4701_vm6, 0, %v479_v55  ;;  %451 = vst [vmem:[#allocation3 + $0x30] sm:$0x1] %v450_v3 }
 0x24f   : > { %v2487_v10 = vmax.f32 %v2479_v61, 0.0  ;;  %v1635_v12 = vadd.f32 %v5245_v36, %v1501_v18  ;;  %v1924_v35 = vadd.f32 %v5263_v60, %v1723_v34  ;;  %v2342_v60 = vadd.f32 %v5313_v49, %v2141_v21  ;;  %v2598_v21 = vld [vmem:[#allocation3 + $0x18] sm:$0xf]  ;;  %481 = vst [vmem:[#allocation3 + $0x34] sm:$0x1] %v480_v62 }
 0x251   : > { %v2495_v47 = vpack.c.bf16 %v2487_v10, %v2487_v10  ;;  %v1724_v30 = vadd.f32 %v5249_v40, %v1635_v12 }
 0x252   : > { %v2450_v28 = vpop.f32.mrf.mxu3 }
 0x253   : > { %v2504_v51 = vshrl.u32 %v2495_v47, 16  ;;  %v2469_v27 = vadd.f32 %v2450_v28, %v2340_v4  ;;  %v2507_v7 = vshll.u32 %v2495_v47, 16  ;;  %v2040_v28 = vpop.f32.mrf.mxu0  ;;  %v1925_v34 = vadd.f32 %v5266_v44, %v1724_v30 }
 0x254   : > { %v2053_v26 = vadd.f32 %v2040_v28, %v1924_v35 }
 0x255   : > { %v2506_v63 = vrot.slane %v2504_v51, 7  ;;  %v2480_v52 = vadd.f32 %v5289_v25, %v2469_v27  ;;  %v2679_v27 = vld [vmem:[#allocation3 + $0x4] sm:$0x1] }
 0x256   : > { %v2963_v41 = vrot.slane %v2679_v27, 5 }
 0x257   : > { %v2509_v56 = vor.u32 %v2507_v7, %v2506_v63  ;;  %v2510_v19 = vrot.slane %v2506_v63, 4  ;;  %v2488_v0 = vmax.f32 %v2480_v52, 0.0  ;;  %v2690_v52 = vrot.slane %v2688_v24, 4 }
 0x259   : > { %v2587_v61 = vsel %vm5333_vm9, %v2509_v56, %v2586_v29  ;;  %v2590_v42 = vsel %vm4693_vm5, %v2510_v19, %v2589_v33  ;;  %v2496_v22 = vpack.c.bf16 %v2488_v0, %v2488_v0  ;;  %v4314_v29 = vld [vmem:[#allocation3] sm:$0xf]  ;;  %v2697_v33 = vshll.u32 %v2679_v27, 16 }
 0x25a   : > { %2588 = vst [vmem:[#allocation3 + $0x8] sm:$0xf] %v2587_v61  ;;  %v2453_v10 = vpop.f32.mrf.mxu3  ;;  %v2964_v19 = vsel %vm4915_vm2, %v4340_v31, %v2963_v41  ;;  %v2694_v2 = vor.u32 %v2693_v16, %v2690_v52 }
 0x25b   : > { %2591 = vst [vmem:[#allocation3 + $0xc] sm:$0x1] %v2590_v42  ;;  %v2512_v4 = vshrl.u32 %v2496_v22, 16  ;;  %v2470_v47 = vadd.f32 %v2453_v10, %v2341_v15  ;;  %v2515_v58 = vshll.u32 %v2496_v22, 16  ;;  %v2993_v10 = vunpack.c.l.b16 %v2964_v19  ;;  %v2043_v28 = vpop.f32.mrf.mxu0 }
 0x25c   : > { %v2699_v12 = vrot.slane %v2697_v33, 5  ;;  %v2695_v31 = vrot.slane %v2694_v2, 4  ;;  %v2054_v30 = vadd.f32 %v2043_v28, %v1925_v34 }
 0x25d   : > { %v2514_v51 = vrot.slane %v2512_v4, 7  ;;  %v2481_v36 = vadd.f32 %v5289_v25, %v2470_v47  ;;  %v2601_v47 = vld [vmem:[#allocation3 + $0x1c] sm:$0x1] }
 0x25e   : > { %v2700_v55 = vsel %vm4925_vm12, %v2695_v31, %v2699_v12 }
 0x25f   : > { %v2517_v39 = vor.u32 %v2515_v58, %v2514_v51  ;;  %v2518_v63 = vrot.slane %v2514_v51, 4  ;;  %v2489_v7 = vmax.f32 %v2481_v36, 0.0  ;;  %v2143_v58 = vadd.f32 %v2130_v8, %v2053_v26  ;;  %v2133_v8 = vpop.f32.mrf.mxu1 }
 0x260   : > { %v453_v26 = vsel %vm4693_vm5, 0, %v452_v14  ;;  %v2144_v62 = vadd.f32 %v2133_v8, %v2054_v30 }
 0x261   : > { %v2593_v40 = vsel %vm5333_vm9, %v2517_v39, %v2592_v9  ;;  %v2596_v43 = vsel %vm4693_vm5, %v2518_v63, %v2595_v46  ;;  %v2497_v49 = vpack.c.bf16 %v2489_v7, %v2489_v7  ;;  %v4553_v18 = vld [vmem:[#allocation3 + $0x4] sm:$0xf0]  ;;  %454 = vst [vmem:[#allocation3 + $0x38] sm:$0x1] %v453_v26 }
 0x262   : > { %v2938_v56 = vld [vmem:[#allocation3 + $0x8] sm:$0xe]  ;;  %2594 = vst [vmem:[#allocation3 + $0x10] sm:$0xf] %v2593_v40  ;;  %v2455_v0 = vpop.f32.mrf.mxu3  ;;  %v4315_v17 = vor.u32 %v4553_v18, %v4314_v29  ;;  %v5372_v15 = vld [vmem:[#allocation3 + $0xc] sm:$0x1]  ;;  %v1725_v18 = vadd.f32 %v5261_v54, %v5361_v37  ;;  %v2799_v37 = vunpack.c.l.b16 %v2700_v55 }
 0x263   : > { %v4341_v1 = vrot.slane %v2938_v56, 9  ;;  %2597 = vst [vmem:[#allocation3 + $0x14] sm:$0x1] %v2596_v43  ;;  %v2520_v61 = vshrl.u32 %v2497_v49, 16  ;;  %v2471_v42 = vadd.f32 %v2455_v0, %v2342_v60  ;;  %v2967_v22 = vrot.slane %v5372_v15, 5 }
 0x264   : > { %v2523_v50 = vshll.u32 %v2497_v49, 16  ;;  %4336 = vmatmul.msk.bf16.vlgmr.msra.gmra.mxu1 %vm1390_vm8, %v4315_v17  ;;  %v2672_v32 = vld [vmem:[#allocation3 + $0x8] sm:$0xf]  ;;  %v2711_v41 = vshll.u32 %v5372_v15, 16  ;;  %v483_v49 = vsel %vm4701_vm6, 0, %v482_v38  ;;  %v2344_v56 = vadd.f32 %v2331_v48, %v2143_v58 }
 0x265   : > { %v2522_v4 = vrot.slane %v2520_v61, 7  ;;  %v2482_v6 = vadd.f32 %v5289_v25, %v2471_v42  ;;  %v2968_v11 = vsel %vm4915_vm2, %v4341_v1, %v2967_v22  ;;  %v2702_v35 = vshrl.u32 %v2672_v32, 16  ;;  %v4362_v46 = vld [vmem:[#allocation3 + $0x8] sm:$0xf]  ;;  %v2604_v17 = vld [vmem:[#allocation3 + $0x20] sm:$0xf] }
 0x266   : > { %v2994_v9 = vunpack.c.l.b16 %v2968_v11  ;;  %v2705_v44 = vshll.u32 %v2672_v32, 16  ;;  %v2713_v1 = vrot.slane %v2711_v41, 5  ;;  %v2607_v22 = vld [vmem:[#allocation3 + $0x24] sm:$0x1]  ;;  %484 = vst [vmem:[#allocation3 + $0x3c] sm:$0x1] %v483_v49 }
 0x267   : > { %v2525_v51 = vor.u32 %v2523_v50, %v2522_v4  ;;  %v2526_v36 = vrot.slane %v2522_v4, 4  ;;  %v2490_v27 = vmax.f32 %v2482_v6, 0.0  ;;  %v2704_v24 = vrot.slane %v2702_v35, 4  ;;  %v485_v6 = vld [vmem:[#allocation3 + $0x44] sm:$0x1] }
 0x268   : > { %v3001_v60 = vpack.c.b16 %v2994_v9, %v2993_v10  ;;  %v2707_v29 = vrot.slane %v2705_v44, 5  ;;  %v455_v10 = vld [vmem:[#allocation3 + $0x40] sm:$0x1]  ;;  %v2334_v9 = vpop.f32.mrf.mxu2 }
 0x269   : > { %v2599_v39 = vsel %vm5333_vm9, %v2525_v51, %v2598_v21  ;;  %v2602_v63 = vsel %vm4693_vm5, %v2526_v36, %v2601_v47  ;;  %v2498_v7 = vpack.c.bf16 %v2490_v27, %v2490_v27  ;;  %v4557_v52 = vld [vmem:[#allocation3 + $0xc] sm:$0xf0] }
 0x26a   : > { %v2939_v59 = vld [vmem:[#allocation3 + $0x10] sm:$0xe]  ;;  %2600 = vst [vmem:[#allocation3 + $0x18] sm:$0xf] %v2599_v39  ;;  %4356 = vmatmul.msk.bf16.vlgmr.msra.gmra.mxu2 %vm1390_vm8, %v3001_v60  ;;  %v2458_v16 = vpop.f32.mrf.mxu3  ;;  %v4363_v33 = vor.u32 %v4557_v52, %v4362_v46  ;;  %v2708_v40 = vor.u32 %v2707_v29, %v2704_v24  ;;  %v5394_v43 = vld [vmem:[#allocation3 + $0x14] sm:$0x1]  ;;  %v2045_v46 = vpop.f32.mrf.mxu0  ;;  %v2345_v52 = vadd.f32 %v2334_v9, %v2144_v62 }
 0x26b   : > { %2603 = vst [vmem:[#allocation3 + $0x1c] sm:$0x1] %v2602_v63  ;;  %v2528_v19 = vshrl.u32 %v2498_v7, 16  ;;  %v2472_v0 = vadd.f32 %v2458_v16, %v5364_v53  ;;  %v4342_v2 = vrot.slane %v2939_v59, 9  ;;  %v2971_v3 = vrot.slane %v5394_v43, 5 }
 0x26c   : > { %4384 = vmatmul.msk.bf16.vlgmr.msra.gmra.mxu3 %vm1390_vm8, %v4363_v33  ;;  %v2709_v15 = vrot.slane %v2708_v40, 4  ;;  %v2531_v42 = vshll.u32 %v2498_v7, 16  ;;  %v1926_v53 = vadd.f32 %v5277_v13, %v1725_v18  ;;  %v2673_v50 = vld [vmem:[#allocation3 + $0x10] sm:$0xf]  ;;  %v2725_v21 = vshll.u32 %v5394_v43, 16 }
 0x26d   : > { %v2530_v61 = vrot.slane %v2528_v19, 7  ;;  %v2483_v54 = vadd.f32 %v5289_v25, %v2472_v0  ;;  %v2972_v11 = vsel %vm4915_vm2, %v4342_v2, %v2971_v3  ;;  %v2716_v35 = vshrl.u32 %v2673_v50, 16  ;;  %v4318_v48 = vld [vmem:[#allocation3 + $0x10] sm:$0xf]  ;;  %v2610_v16 = vld [vmem:[#allocation3 + $0x28] sm:$0xf] }
 0x26e   : > { %v2714_v34 = vsel %vm4925_vm12, %v2709_v15, %v2713_v1  ;;  %v2719_v58 = vshll.u32 %v2673_v50, 16  ;;  %v456_v13 = vsel %vm4693_vm5, 0, %v455_v10  ;;  %v486_v60 = vsel %vm4701_vm6, 0, %v485_v6  ;;  %v4543_v7 = vld [vmem:[%s5811_s7 + $0x40] sm:$0xff]  ;;  %v2613_v43 = vld [vmem:[#allocation3 + $0x2c] sm:$0x1]  ;;  %v2135_v6 = vpop.f32.mrf.mxu1 }
 0x26f   : > { %v2533_v32 = vor.u32 %v2531_v42, %v2530_v61  ;;  %v2534_v12 = vrot.slane %v2530_v61, 4  ;;  %v2491_v4 = vmax.f32 %v2483_v54, 0.0  ;;  %v2800_v47 = vunpack.c.l.b16 %v2714_v34  ;;  %457 = vst [vmem:[#allocation3 + $0x40] sm:$0x1] %v456_v13  ;;  %3326 = vmatpush.bf16.msra.mxu0 %v4543_v7 }
 0x270   : > { %v2718_v63 = vrot.slane %v2716_v35, 4  ;;  %v2055_v59 = vadd.f32 %v2045_v46, %v1926_v53  ;;  %v2995_v33 = vunpack.c.l.b16 %v2972_v11  ;;  %v2727_v0 = vrot.slane %v2725_v21, 5  ;;  %487 = vst [vmem:[#allocation3 + $0x44] sm:$0x1] %v486_v60 }
 0x271   : > { %v2605_v31 = vsel %vm5333_vm9, %v2533_v32, %v2604_v17  ;;  %v2608_v44 = vsel %vm4693_vm5, %v2534_v12, %v2607_v22  ;;  %v2499_v14 = vpack.c.bf16 %v2491_v4, %v2491_v4  ;;  %v2807_v28 = vpack.c.b16 %v2800_v47, %v2799_v37  ;;  %v4554_v51 = vld [vmem:[#allocation3 + $0x14] sm:$0xf0] }
 0x272   : > { %v2940_v36 = vld [vmem:[#allocation3 + $0x18] sm:$0xe]  ;;  %2606 = vst [vmem:[#allocation3 + $0x20] sm:$0xf] %v2605_v31  ;;  %v2460_v27 = vpop.f32.mrf.mxu3  ;;  %v4319_v24 = vor.u32 %v4554_v51, %v4318_v48  ;;  %v2682_v38 = vld [vmem:[#allocation3 + $0x1c] sm:$0x1]  ;;  %v2145_v9 = vadd.f32 %v2135_v6, %v2055_v59  ;;  %v2336_v48 = vpop.f32.mrf.mxu2 }
 0x273   : > { %v4343_v30 = vrot.slane %v2940_v36, 9  ;;  %2609 = vst [vmem:[#allocation3 + $0x24] sm:$0x1] %v2608_v44  ;;  %v2536_v29 = vshrl.u32 %v2499_v14, 16  ;;  %4308 = vmatmul.msk.bf16.vlgmr.msrb.gmra.mxu0 %vm1390_vm8, %v2807_v28  ;;  %v2473_v41 = vadd.f32 %v2460_v27, %v2344_v56  ;;  %v2975_v39 = vrot.slane %v2682_v38, 5  ;;  %v4546_v28 = vld [vmem:[%s5811_s7 + $0x58] sm:$0xff] }
 0x274   : > { %v2539_v26 = vshll.u32 %v2499_v14, 16  ;;  %4337 = vmatmul.msk.bf16.gmra.mxu1 %vm1390_vm8, %v4319_v24  ;;  %v2674_v55 = vld [vmem:[#allocation3 + $0x18] sm:$0xf]  ;;  %v2721_v56 = vrot.slane %v2719_v58, 5  ;;  %v2739_v54 = vshll.u32 %v2682_v38, 16  ;;  %v2346_v59 = vadd.f32 %v2336_v48, %v2145_v9  ;;  %v4547_v9 = vld [vmem:[%s5811_s7 + $0x60] sm:$0xff] }
 0x275   : > { %v2538_v40 = vrot.slane %v2536_v29, 7  ;;  %v2484_v49 = vadd.f32 %v5289_v25, %v2473_v41  ;;  %v2976_v18 = vsel %vm4915_vm2, %v4343_v30, %v2975_v39  ;;  %v2730_v17 = vshrl.u32 %v2674_v55, 16  ;;  %v4366_v34 = vld [vmem:[#allocation3 + $0x18] sm:$0xf]  ;;  %v2616_v38 = vld [vmem:[#allocation3 + $0x30] sm:$0xf]  ;;  %3454 = vmatpush.bf16.msrb.mxu1 %v4546_v28 }
 0x276   : > { %v2996_v19 = vunpack.c.l.b16 %v2976_v18  ;;  %v2733_v15 = vshll.u32 %v2674_v55, 16  ;;  %v2722_v8 = vor.u32 %v2721_v56, %v2718_v63  ;;  %v2741_v14 = vrot.slane %v2739_v54, 5  ;;  %v2619_v30 = vld [vmem:[#allocation3 + $0x34] sm:$0x1]  ;;  %v5467_v28 = vld [vmem:[#allocation3 + $0x8] sm:$0xe] }
 0x277   : > { %v2541_v1 = vor.u32 %v2539_v26, %v2538_v40  ;;  %v2542_v2 = vrot.slane %v2538_v40, 4  ;;  %v2492_v3 = vmax.f32 %v2484_v49, 0.0  ;;  %v2732_v42 = vrot.slane %v2730_v17, 4 }
 0x278   : > { %v3002_v61 = vpack.c.b16 %v2996_v19, %v2995_v33  ;;  %v2735_v22 = vrot.slane %v2733_v15, 5  ;;  %v2723_v21 = vrot.slane %v2722_v8, 4 }
 0x279   : > { %v2611_v37 = vsel %vm5333_vm9, %v2541_v1, %v2610_v16  ;;  %v2614_v62 = vsel %vm4693_vm5, %v2542_v2, %v2613_v43  ;;  %v2500_v53 = vpack.c.bf16 %v2492_v3, %v2492_v3  ;;  %v4558_v50 = vld [vmem:[#allocation3 + $0x1c] sm:$0xf0] }
 0x27a   : > { %2612 = vst [vmem:[#allocation3 + $0x28] sm:$0xf] %v2611_v37  ;;  %4357 = vmatmul.msk.bf16.gmra.mxu2 %vm1390_vm8, %v3002_v61  ;;  %v2463_v10 = vpop.f32.mrf.mxu3  ;;  %v4367_v32 = vor.u32 %v4558_v50, %v4366_v34  ;;  %v2736_v12 = vor.u32 %v2735_v22, %v2732_v42  ;;  %v5431_v4 = vld [vmem:[#allocation3 + $0x24] sm:$0x1]  ;;  %v2941_v47 = vld [vmem:[#allocation3 + $0x20] sm:$0xe]  ;;  %v2728_v58 = vsel %vm4925_vm12, %v2723_v21, %v2727_v0 }
 0x27b   : > { %2615 = vst [vmem:[#allocation3 + $0x2c] sm:$0x1] %v2614_v62  ;;  %v2544_v11 = vshrl.u32 %v2500_v53, 16  ;;  %v2474_v35 = vadd.f32 %v2463_v10, %v2345_v52  ;;  %v2675_v13 = vld [vmem:[#allocation3 + $0x20] sm:$0xf]  ;;  %v2547_v31 = vshll.u32 %v2500_v53, 16  ;;  %v2801_v46 = vunpack.c.l.b16 %v2728_v58 }
 0x27c   : > { %4385 = vmatmul.msk.bf16.gmra.mxu3 %vm1390_vm8, %v4367_v32  ;;  %v2737_v44 = vrot.slane %v2736_v12, 4  ;;  %v2744_v27 = vshrl.u32 %v2675_v13, 16  ;;  %v2747_v24 = vshll.u32 %v2675_v13, 16  ;;  %v4344_v29 = vrot.slane %v2941_v47, 9  ;;  %v4322_v49 = vld [vmem:[#allocation3 + $0x20] sm:$0xf] }
 0x27d   : > { %v2546_v51 = vrot.slane %v2544_v11, 7  ;;  %v2485_v36 = vadd.f32 %v5289_v25, %v2474_v35  ;;  %v2979_v41 = vrot.slane %v5431_v4, 5  ;;  %v4545_v42 = vld [vmem:[%s5811_s7 + $0x50] sm:$0xff]  ;;  %v2753_v37 = vshll.u32 %v5431_v4, 16  ;;  %v4548_v62 = vld [vmem:[%s5811_s7 + $0x68] sm:$0xff]  ;;  %v4550_v10 = vld [vmem:[%s5811_s7 + $0x78] sm:$0xff] }
 0x27e   : > { %v2742_v60 = vsel %vm4925_vm12, %v2737_v44, %v2741_v14  ;;  %v2746_v26 = vrot.slane %v2744_v27, 4  ;;  %v2749_v16 = vrot.slane %v2747_v24, 5  ;;  %3455 = vmatpush.bf16.msrb.mxu1 %v4545_v42  ;;  %v2622_v32 = vld [vmem:[#allocation3 + $0x38] sm:$0xf]  ;;  %v2625_v12 = vld [vmem:[#allocation3 + $0x3c] sm:$0x1]  ;;  %3544 = vmatpush.bf16.msrb.mxu2 %v4548_v62 }
 0x27f   : > { %v2549_v39 = vor.u32 %v2547_v31, %v2546_v51  ;;  %v2550_v63 = vrot.slane %v2546_v51, 4  ;;  %v2493_v7 = vmax.f32 %v2485_v36, 0.0  ;;  %v2802_v52 = vunpack.c.l.b16 %v2742_v60  ;;  %3745 = vmatpush.bf16.msrb.mxu3 %v4550_v10 }
 0x280   : > { %v2750_v1 = vor.u32 %v2749_v16, %v2746_v26  ;;  %v2980_v8 = vsel %vm4915_vm2, %v4344_v29, %v2979_v41  ;;  %v4549_v29 = vld [vmem:[%s5811_s7 + $0x70] sm:$0xff]  ;;  %v5483_v16 = vld [vmem:[#allocation3 + $0x10] sm:$0xe] }
 0x281   : > { %v2617_v33 = vsel %vm5333_vm9, %v2549_v39, %v2616_v38  ;;  %v2620_v55 = vsel %vm4693_vm5, %v2550_v63, %v2619_v30  ;;  %v2501_v40 = vpack.c.bf16 %v2493_v7, %v2493_v7  ;;  %v2808_v43 = vpack.c.b16 %v2802_v52, %v2801_v46  ;;  %v4555_v18 = vld [vmem:[#allocation3 + $0x24] sm:$0xf0] }
 0x282   : > { %v2942_v56 = vld [vmem:[#allocation3 + $0x28] sm:$0xe]  ;;  %2618 = vst [vmem:[#allocation3 + $0x30] sm:$0xf] %v2617_v33  ;;  %v2465_v19 = vpop.f32.mrf.mxu3  ;;  %v4323_v0 = vor.u32 %v4555_v18, %v4322_v49  ;;  %v2684_v17 = vld [vmem:[#allocation3 + $0x2c] sm:$0x1]  ;;  %v2997_v47 = vunpack.c.l.b16 %v2980_v8  ;;  %3545 = vmatpush.bf16.msrb.mxu2 %v4547_v9 }
 0x283   : > { %v4345_v15 = vrot.slane %v2942_v56, 9  ;;  %2621 = vst [vmem:[#allocation3 + $0x34] sm:$0x1] %v2620_v55  ;;  %v2552_v2 = vshrl.u32 %v2501_v40, 16  ;;  %4309 = vmatmul.msk.bf16.gmra.mxu0 %vm1390_vm8, %v2808_v43  ;;  %v2475_v3 = vadd.f32 %v2465_v19, %v2346_v59  ;;  %v2983_v61 = vrot.slane %v2684_v17, 5  ;;  %3746 = vmatpush.bf16.msrb.mxu3 %v4549_v29 }
 0x284   : > { %v2555_v22 = vshll.u32 %v2501_v40, 16  ;;  %4338 = vmatmul.msk.bf16.gmra.mxu1 %vm1390_vm8, %v4323_v0  ;;  %v2676_v54 = vld [vmem:[#allocation3 + $0x28] sm:$0xf]  ;;  %v2751_v6 = vrot.slane %v2750_v1, 4  ;;  %v2767_v14 = vshll.u32 %v2684_v17, 16  ;;  %v2755_v38 = vrot.slane %v2753_v37, 5 }
 0x285   : > { %v2554_v53 = vrot.slane %v2552_v2, 7  ;;  %v2486_v34 = vadd.f32 %v5289_v25, %v2475_v3  ;;  %v2984_v50 = vsel %vm4915_vm2, %v4345_v15, %v2983_v61  ;;  %v2758_v21 = vshrl.u32 %v2676_v54, 16  ;;  %v4370_v27 = vld [vmem:[#allocation3 + $0x28] sm:$0xf]  ;;  %v3575_v49 = vld [vmem:[#allocation3 + $0x10] sm:$0xf] }
 0x286   : > { %v2998_v4 = vunpack.c.l.b16 %v2984_v50  ;;  %v2761_v11 = vshll.u32 %v2676_v54, 16  ;;  %v2756_v39 = vsel %vm4925_vm12, %v2751_v6, %v2755_v38  ;;  %v4400_v7 = vrot.slane %v5467_v28, 9  ;;  %v2628_v18 = vld [vmem:[#allocation3 + $0x40] sm:$0xf]  ;;  %v2631_v56 = vld [vmem:[#allocation3 + $0x44] sm:$0x1] }
 0x287   : > { %v2557_v35 = vor.u32 %v2555_v22, %v2554_v53  ;;  %v2558_v58 = vrot.slane %v2554_v53, 4  ;;  %v2494_v13 = vmax.f32 %v2486_v34, 0.0  ;;  %v2760_v25 = vrot.slane %v2758_v21, 4  ;;  %v5488_v61 = vld [vmem:[#allocation3 + $0x14] sm:$0x1] }
 0x288   : > { %v3003_v31 = vpack.c.b16 %v2998_v4, %v2997_v47  ;;  %v2763_v44 = vrot.slane %v2761_v11, 5  ;;  %v2769_v59 = vrot.slane %v2767_v14, 5  ;;  %v2803_v0 = vunpack.c.l.b16 %v2756_v39  ;;  %v3577_v54 = vld [vmem:[#allocation3 + $0x18] sm:$0xf]  ;;  %v5495_v11 = vld [vmem:[#allocation3 + $0xc] sm:$0x1] }
 0x289   : > { %v2623_v48 = vsel %vm5333_vm9, %v2557_v35, %v2622_v32  ;;  %v2626_v51 = vsel %vm4693_vm5, %v2558_v58, %v2625_v12  ;;  %v2502_v36 = vpack.c.bf16 %v2494_v13, %v2494_v13  ;;  %v4559_v24 = vld [vmem:[#allocation3 + $0x2c] sm:$0xf0]  ;;  %v4401_v22 = vrot.slane %v5483_v16, 9 }
 0x28a   : > { %2624 = vst [vmem:[#allocation3 + $0x38] sm:$0xf] %v2623_v48  ;;  %4358 = vmatmul.msk.bf16.gmra.mxu2 %vm1390_vm8, %v3003_v31  ;;  %v4371_v30 = vor.u32 %v4559_v24, %v4370_v27  ;;  %v2764_v60 = vor.u32 %v2763_v44, %v2760_v25  ;;  %v2943_v46 = vld [vmem:[#allocation3 + $0x30] sm:$0xe]  ;;  %v5479_v63 = vld [vmem:[#allocation3 + $0x34] sm:$0x1] }
 0x28b   : > { %2627 = vst [vmem:[#allocation3 + $0x3c] sm:$0x1] %v2626_v51  ;;  %v2560_v41 = vshrl.u32 %v2502_v36, 16  ;;  %v2677_v26 = vld [vmem:[#allocation3 + $0x30] sm:$0xf]  ;;  %v2563_v55 = vshll.u32 %v2502_v36, 16 }
 0x28c   : > { %4386 = vmatmul.msk.bf16.gmra.mxu3 %vm1390_vm8, %v4371_v30  ;;  %v2765_v52 = vrot.slane %v2764_v60, 4  ;;  %v2772_v40 = vshrl.u32 %v2677_v26, 16  ;;  %v2775_v43 = vshll.u32 %v2677_v26, 16  ;;  %v4346_v17 = vrot.slane %v2943_v46, 9  ;;  %v4326_v21 = vld [vmem:[#allocation3 + $0x30] sm:$0xf] }
 0x28d   : > { %v2562_v33 = vrot.slane %v2560_v41, 7  ;;  %v2987_v15 = vrot.slane %v5479_v63, 5  ;;  %v3592_v37 = vshrl.u32 %v3575_v49, 16  ;;  %v3595_v62 = vshll.u32 %v3575_v49, 16  ;;  %v4552_v48 = vld [vmem:[%s5811_s7 + $0x88] sm:$0xff] }
 0x28e   : > { %v2770_v19 = vsel %vm4925_vm12, %v2765_v52, %v2769_v59  ;;  %v2774_v8 = vrot.slane %v2772_v40, 4  ;;  %v2777_v42 = vrot.slane %v2775_v43, 5  ;;  %v3386_v35 = vrot.slane %v5488_v61, 5  ;;  %3874 = vmatpush.bf16.msrb.mxu0 %v4552_v48  ;;  %v3155_v52 = vld [vmem:[#allocation3 + $0x8] sm:$0xf] }
 0x28f   : > { %v2565_v1 = vor.u32 %v2563_v55, %v2562_v33  ;;  %v2566_v2 = vrot.slane %v2562_v33, 4  ;;  %v2804_v3 = vunpack.c.l.b16 %v2770_v19  ;;  %v2988_v5 = vsel %vm4915_vm2, %v4346_v17, %v2987_v15  ;;  %v5511_v33 = vld [vmem:[#allocation3 + $0x14] sm:$0x1]  ;;  %v3157_v55 = vld [vmem:[#allocation3 + $0x10] sm:$0xf] }
 0x290   : > { %v2778_v6 = vor.u32 %v2777_v42, %v2774_v8  ;;  %v2781_v25 = vshll.u32 %v5479_v63, 16  ;;  %v3594_v44 = vrot.slane %v3592_v37, 4  ;;  %v3597_v14 = vrot.slane %v3595_v62, 5  ;;  %v5516_v15 = vld [vmem:[#allocation3 + $0x1c] sm:$0x1] }
 0x291   : > { %v2629_v53 = vsel %vm5333_vm9, %v2565_v1, %v2628_v18  ;;  %v2632_v34 = vsel %vm4693_vm5, %v2566_v2, %v2631_v56  ;;  %v2809_v50 = vpack.c.b16 %v2804_v3, %v2803_v0  ;;  %v4556_v10 = vld [vmem:[#allocation3 + $0x34] sm:$0xf0]  ;;  %v3606_v24 = vshrl.u32 %v3577_v54, 16 }
 0x292   : > { %v2944_v32 = vld [vmem:[#allocation3 + $0x38] sm:$0xe]  ;;  %2630 = vst [vmem:[#allocation3 + $0x40] sm:$0xf] %v2629_v53  ;;  %v4327_v12 = vor.u32 %v4556_v10, %v4326_v21  ;;  %v2686_v47 = vld [vmem:[#allocation3 + $0x3c] sm:$0x1]  ;;  %v2999_v38 = vunpack.c.l.b16 %v2988_v5  ;;  %v3387_v16 = vsel %vm4915_vm2, %v4401_v22, %v3386_v35  ;;  %v3598_v56 = vor.u32 %v3597_v14, %v3594_v44 }
 0x293   : > { %v4347_v4 = vrot.slane %v2944_v32, 9  ;;  %2633 = vst [vmem:[#allocation3 + $0x44] sm:$0x1] %v2632_v34  ;;  %4310 = vmatmul.msk.bf16.gmra.mxu0 %vm1390_vm8, %v2809_v50  ;;  %v2991_v58 = vrot.slane %v2686_v47, 5  ;;  %v2678_v13 = vld [vmem:[#allocation3 + $0x38] sm:$0xf] }
 0x294   : > { %4339 = vmatmul.msk.bf16.gmra.mxu1 %vm1390_vm8, %v4327_v12  ;;  %v2786_v9 = vshrl.u32 %v2678_v13, 16  ;;  %v2789_v31 = vshll.u32 %v2678_v13, 16  ;;  %v2779_v36 = vrot.slane %v2778_v6, 4  ;;  %v2795_v27 = vshll.u32 %v2686_v47, 16  ;;  %v4374_v40 = vld [vmem:[#allocation3 + $0x38] sm:$0xf] }
 0x295   : > { %v2992_v51 = vsel %vm4915_vm2, %v4347_v4, %v2991_v58  ;;  %v2783_v29 = vrot.slane %v2781_v25, 5  ;;  %v3382_v41 = vrot.slane %v5495_v11, 5  ;;  %v3608_v39 = vrot.slane %v3606_v24, 4  ;;  %v5527_v35 = vld [vmem:[#allocation3 + $0x24] sm:$0x1] }
 0x296   : > { %v3000_v30 = vunpack.c.l.b16 %v2992_v51  ;;  %v2788_v60 = vrot.slane %v2786_v9, 4  ;;  %v2791_v46 = vrot.slane %v2789_v31, 5  ;;  %v3609_v63 = vshll.u32 %v3577_v54, 16  ;;  %v3359_v5 = vld [vmem:[#allocation3 + $0x20] sm:$0xe] }
 0x297   : > { %v2784_v49 = vsel %vm4925_vm12, %v2779_v36, %v2783_v29  ;;  %v2797_v18 = vrot.slane %v2795_v27, 5  ;;  %v3172_v1 = vshrl.u32 %v3155_v52, 16  ;;  %v3175_v2 = vshll.u32 %v3155_v52, 16  ;;  %v3579_v58 = vld [vmem:[#allocation3 + $0x20] sm:$0xf] }
 0x298   : > { %v3004_v59 = vpack.c.b16 %v3000_v30, %v2999_v38  ;;  %v2792_v26 = vor.u32 %v2791_v46, %v2788_v60  ;;  %v3611_v19 = vrot.slane %v3609_v63, 5  ;;  %v3383_v3 = vsel %vm4915_vm2, %v4400_v7, %v3382_v41  ;;  %v4561_v25 = vld [vmem:[#allocation3 + $0x14] sm:$0xf0]  ;;  %v3581_v44 = vld [vmem:[#allocation3 + $0x28] sm:$0xf] }
 0x299   : > { %v4560_v43 = vld [vmem:[#allocation3 + $0x3c] sm:$0xf0]  ;;  %v3601_v8 = vshll.u32 %v5511_v33, 16  ;;  %v3413_v54 = vunpack.c.l.b16 %v3387_v16  ;;  %v3186_v37 = vshrl.u32 %v3157_v55, 16  ;;  %v3189_v62 = vshll.u32 %v3157_v55, 16 }
 0x29a   : > { %4359 = vmatmul.msk.bf16.gmra.mxu2 %vm1390_vm8, %v3004_v59  ;;  %v4375_v0 = vor.u32 %v4560_v43, %v4374_v40  ;;  %v2793_v17 = vrot.slane %v2792_v26, 4  ;;  %v3612_v42 = vor.u32 %v3611_v19, %v3608_v39  ;;  %v2805_v53 = vunpack.c.l.b16 %v2784_v49  ;;  %v5531_v51 = vld [vmem:[#allocation3 + $0x1c] sm:$0x1]  ;;  %v3358_v36 = vld [vmem:[#allocation3 + $0x18] sm:$0xe] }
 0x29b   : > { %v3599_v50 = vrot.slane %v3598_v56, 4  ;;  %v3615_v21 = vshll.u32 %v5516_v15, 16  ;;  %v3174_v28 = vrot.slane %v3172_v1, 4  ;;  %v3177_v10 = vrot.slane %v3175_v2, 5  ;;  %v4422_v46 = vld [vmem:[#allocation3 + $0x10] sm:$0xf] }
 0x29c   : > { %4387 = vmatmul.msk.bf16.gmra.mxu3 %vm1390_vm8, %v4375_v0  ;;  %v2798_v22 = vsel %vm4925_vm12, %v2793_v17, %v2797_v18  ;;  %v3188_v32 = vrot.slane %v3186_v37, 4  ;;  %v3191_v7 = vrot.slane %v3189_v62, 5  ;;  %v3412_v47 = vunpack.c.l.b16 %v3383_v3  ;;  %v3161_v55 = vld [vmem:[#allocation3 + $0x20] sm:$0xf]  ;;  %v3159_v1 = vld [vmem:[#allocation3 + $0x18] sm:$0xf] }
 0x29d   : > { %v2806_v34 = vunpack.c.l.b16 %v2798_v22  ;;  %v3603_v4 = vrot.slane %v3601_v8, 5  ;;  %v3613_v6 = vrot.slane %v3612_v42, 4  ;;  %v3617_v31 = vrot.slane %v3615_v21, 5  ;;  %v5545_v42 = vld [vmem:[#allocation3 + $0x24] sm:$0x1] }
 0x29e   : > { %v3420_v13 = vpack.c.b16 %v3413_v54, %v3412_v47  ;;  %v3178_v14 = vor.u32 %v3177_v10, %v3174_v28  ;;  %v3192_v48 = vor.u32 %v3191_v7, %v3188_v32  ;;  %v4403_v27 = vrot.slane %v3359_v5, 9  ;;  %v5547_v22 = vld [vmem:[#allocation3 + $0x2c] sm:$0x1]  ;;  %v5600_v20 = vld [vmem:[#allocation3 + $0x44] sm:$0x1] }
 0x29f   : > { %v2810_v12 = vpack.c.b16 %v2806_v34, %v2805_v53  ;;  %v3604_v9 = vsel %vm4925_vm12, %v3599_v50, %v3603_v4  ;;  %v3394_v24 = vrot.slane %v5527_v35, 5  ;;  %v3618_v38 = vsel %vm4925_vm12, %v3613_v6, %v3617_v31  ;;  %v5554_v34 = vld [vmem:[#allocation3 + $0x24] sm:$0xf0]  ;;  %v5559_v6 = vld [vmem:[#allocation3 + $0x20] sm:$0xf] }
 0x2a0   : > { %v3620_v30 = vshrl.u32 %v3579_v58, 16  ;;  %v3623_v60 = vshll.u32 %v3579_v58, 16  ;;  %v3181_v29 = vshll.u32 %v5495_v11, 16  ;;  %v3195_v41 = vshll.u32 %v5488_v61, 16 }
 0x2a1   : > { %v3634_v39 = vshrl.u32 %v3581_v44, 16  ;;  %v3637_v63 = vshll.u32 %v3581_v44, 16  ;;  %v4423_v52 = vor.u32 %v4561_v25, %v4422_v46  ;;  %v3703_v59 = vunpack.c.l.b16 %v3604_v9  ;;  %v3583_v25 = vld [vmem:[#allocation3 + $0x30] sm:$0xf]  ;;  %v3585_v9 = vld [vmem:[#allocation3 + $0x38] sm:$0xf] }
 0x2a2   : > { %v4402_v26 = vrot.slane %v3358_v36, 9  ;;  %v3390_v16 = vrot.slane %v5531_v51, 5  ;;  %v3704_v40 = vunpack.c.l.b16 %v3618_v38  ;;  %v3179_v43 = vrot.slane %v3178_v14, 4  ;;  %v3360_v36 = vld [vmem:[#allocation3 + $0x28] sm:$0xe] }
 0x2a3   : > { %4311 = vmatmul.msk.bf16.gmra.mxu0 %vm1390_vm8, %v2810_v12  ;;  %v3193_v49 = vrot.slane %v3192_v48, 4  ;;  %v3395_v18 = vsel %vm4915_vm2, %v4403_v27, %v3394_v24  ;;  %v3622_v56 = vrot.slane %v3620_v30, 4  ;;  %v3625_v19 = vrot.slane %v3623_v60, 5 }
 0x2a4   : > { %4416 = vmatmul.msk.bf16.vlgmr.msrb.gmra.mxu1 %vm1390_vm8, %v3420_v13  ;;  %v3636_v0 = vrot.slane %v3634_v39, 4  ;;  %v3639_v11 = vrot.slane %v3637_v63, 5  ;;  %v3183_v17 = vrot.slane %v3181_v29, 5  ;;  %v3197_v61 = vrot.slane %v3195_v41, 5  ;;  %v3163_v39 = vld [vmem:[#allocation3 + $0x28] sm:$0xf] }
 0x2a5   : > { %v3214_v2 = vshrl.u32 %v3161_v55, 16  ;;  %v3217_v3 = vshll.u32 %v3161_v55, 16  ;;  %v3391_v8 = vsel %vm4915_vm2, %v4402_v26, %v3390_v16  ;;  %v3711_v54 = vpack.c.b16 %v3704_v40, %v3703_v59  ;;  %v3165_v16 = vld [vmem:[#allocation3 + $0x30] sm:$0xf] }
 0x2a6   : > { %v3184_v37 = vsel %vm4925_vm12, %v3179_v43, %v3183_v17  ;;  %v3198_v62 = vsel %vm4925_vm12, %v3193_v49, %v3197_v61  ;;  %v3415_v53 = vunpack.c.l.b16 %v3395_v18  ;;  %v3626_v50 = vor.u32 %v3625_v19, %v3622_v56  ;;  %v5570_v49 = vld [vmem:[#allocation3 + $0x2c] sm:$0x1]  ;;  %v5572_v18 = vld [vmem:[#allocation3 + $0x34] sm:$0x1]  ;;  %v3361_v19 = vld [vmem:[#allocation3 + $0x30] sm:$0xe] }
 0x2a7   : > { %v3640_v21 = vor.u32 %v3639_v11, %v3636_v0  ;;  %v3200_v28 = vshrl.u32 %v3159_v1, 16  ;;  %v3203_v10 = vshll.u32 %v3159_v1, 16  ;;  %v3629_v32 = vshll.u32 %v5545_v42, 16 }
 0x2a8   : > { %v3643_v7 = vshll.u32 %v5547_v22, 16  ;;  %v3216_v12 = vrot.slane %v3214_v2, 4  ;;  %v3219_v47 = vrot.slane %v3217_v3, 5  ;;  %v3284_v4 = vunpack.c.l.b16 %v3198_v62 }
 0x2a9   : > { %v3283_v5 = vunpack.c.l.b16 %v3184_v37  ;;  %v3414_v58 = vunpack.c.l.b16 %v3391_v8  ;;  %v4427_v13 = vor.u32 %v5554_v34, %v5559_v6  ;;  %v3627_v31 = vrot.slane %v3626_v50, 4  ;;  %v458_v34 = vld [vmem:[#allocation3 + $0x48] sm:$0x1] }
 0x2aa   : > { %4444 = vmatmul.msk.bf16.vlgmr.msrb.gmra.mxu2 %vm1390_vm8, %v4423_v52  ;;  %v3641_v44 = vrot.slane %v3640_v21, 4  ;;  %v3202_v14 = vrot.slane %v3200_v28, 4  ;;  %v3205_v48 = vrot.slane %v3203_v10, 5  ;;  %v3631_v24 = vrot.slane %v3629_v32, 5  ;;  %v488_v32 = vld [vmem:[#allocation3 + $0x4c] sm:$0x1] }
 0x2ab   : > { %v3421_v27 = vpack.c.b16 %v3415_v53, %v3414_v58  ;;  %v3645_v38 = vrot.slane %v3643_v7, 5  ;;  %v3220_v30 = vor.u32 %v3219_v47, %v3216_v12  ;;  %v3291_v60 = vpack.c.b16 %v3284_v4, %v3283_v5  ;;  %v5579_v53 = vld [vmem:[#allocation3 + $0x3c] sm:$0x1]  ;;  %v5582_v7 = vld [vmem:[#allocation3 + $0x34] sm:$0x1] }
 0x2ac   : > { %4456 = vmatmul.msk.bf16.vlgmr.msrb.gmra.mxu3 %vm1390_vm8, %v3711_v54  ;;  %v3648_v46 = vshrl.u32 %v3583_v25, 16  ;;  %v3651_v29 = vshll.u32 %v3583_v25, 16  ;;  %v3662_v41 = vshrl.u32 %v3585_v9, 16  ;;  %v3209_v63 = vshll.u32 %v5531_v51, 16 }
 0x2ad   : > { %v3223_v52 = vshll.u32 %v5527_v35, 16  ;;  %v4404_v59 = vrot.slane %v3360_v36, 9  ;;  %v3665_v26 = vshll.u32 %v3585_v9, 16  ;;  %v3632_v55 = vsel %vm4925_vm12, %v3627_v31, %v3631_v24  ;;  %v4551_v35 = vld [vmem:[%s5811_s7 + $0x80] sm:$0xff] }
 0x2ae   : > { %v3646_v40 = vsel %vm4925_vm12, %v3641_v44, %v3645_v38  ;;  %v3206_v43 = vor.u32 %v3205_v48, %v3202_v14  ;;  %v3664_v56 = vrot.slane %v3662_v41, 4  ;;  %v3221_v51 = vrot.slane %v3220_v30, 4  ;;  %3875 = vmatpush.bf16.msrb.mxu0 %v4551_v35 }
 0x2af   : > { %v3667_v0 = vrot.slane %v3665_v26, 5  ;;  %v3228_v11 = vshrl.u32 %v3163_v39, 16  ;;  %v3231_v17 = vshll.u32 %v3163_v39, 16  ;;  %v3650_v61 = vrot.slane %v3648_v46, 4  ;;  %v3363_v46 = vld [vmem:[#allocation3 + $0x40] sm:$0xe] }
 0x2b0   : > { %v3653_v1 = vrot.slane %v3651_v29, 5  ;;  %v3242_v2 = vshrl.u32 %v3165_v16, 16  ;;  %v3245_v3 = vshll.u32 %v3165_v16, 16  ;;  %v3705_v8 = vunpack.c.l.b16 %v3632_v55  ;;  %v3362_v39 = vld [vmem:[#allocation3 + $0x38] sm:$0xe] }
 0x2b1   : > { %v3706_v54 = vunpack.c.l.b16 %v3646_v40  ;;  %v3225_v37 = vrot.slane %v3223_v52, 5  ;;  %v3398_v62 = vrot.slane %v5570_v49, 5  ;;  %v3207_v50 = vrot.slane %v3206_v43, 4  ;;  %v5604_v16 = vld [vmem:[#allocation3 + $0x3c] sm:$0x1] }
 0x2b2   : > { %v4405_v21 = vrot.slane %v3361_v19, 9  ;;  %v3402_v28 = vrot.slane %v5572_v18, 5  ;;  %v3668_v10 = vor.u32 %v3667_v0, %v3664_v56  ;;  %v3230_v12 = vrot.slane %v3228_v11, 4  ;;  %v3587_v55 = vld [vmem:[#allocation3 + $0x40] sm:$0xf] }
 0x2b3   : > { %4396 = vmatmul.msk.bf16.vlgmr.msra.gmra.mxu0 %vm1390_vm8, %v3291_v60  ;;  %v3233_v47 = vrot.slane %v3231_v17, 5  ;;  %v3244_v4 = vrot.slane %v3242_v2, 4  ;;  %v3247_v6 = vrot.slane %v3245_v3, 5  ;;  %v3211_v5 = vrot.slane %v3209_v63, 5  ;;  %v4563_v17 = vld [vmem:[#allocation3 + $0x34] sm:$0xf0] }
 0x2b4   : > { %4417 = vmatmul.msk.bf16.gmra.mxu1 %vm1390_vm8, %v3421_v27  ;;  %v3226_v58 = vsel %vm4925_vm12, %v3221_v51, %v3225_v37  ;;  %v3654_v25 = vor.u32 %v3653_v1, %v3650_v61  ;;  %v3671_v9 = vshll.u32 %v5579_v53, 16  ;;  %v3712_v31 = vpack.c.b16 %v3706_v54, %v3705_v8 }
 0x2b5   : > { %v3399_v44 = vsel %vm4915_vm2, %v4404_v59, %v3398_v62  ;;  %v459_v14 = vsel %vm4693_vm5, 0, %v458_v34  ;;  %v489_v48 = vsel %vm4701_vm6, 0, %v488_v32  ;;  %v3212_v36 = vsel %vm4925_vm12, %v3207_v50, %v3211_v5  ;;  %v3776_v62 = vld [vmem:[#allocation3 + $0x10] sm:$0xe] }
 0x2b6   : > { %v3403_v27 = vsel %vm4915_vm2, %v4405_v21, %v3402_v28  ;;  %v3657_v24 = vshll.u32 %v5582_v7, 16  ;;  %v3669_v38 = vrot.slane %v3668_v10, 4  ;;  %460 = vst [vmem:[#allocation3 + $0x48] sm:$0x1] %v459_v14  ;;  %v3234_v30 = vor.u32 %v3233_v47, %v3230_v12  ;;  %v4430_v34 = vld [vmem:[#allocation3 + $0x30] sm:$0xf] }
 0x2b7   : > { %v3248_v60 = vor.u32 %v3247_v6, %v3244_v4  ;;  %490 = vst [vmem:[#allocation3 + $0x4c] sm:$0x1] %v489_v48  ;;  %v3416_v23 = vunpack.c.l.b16 %v3399_v44  ;;  %v3655_v29 = vrot.slane %v3654_v25, 4  ;;  %v3673_v41 = vrot.slane %v3671_v9, 5  ;;  %v3169_v4 = vld [vmem:[#allocation3 + $0x40] sm:$0xf] }
 0x2b8   : > { %v3285_v63 = vunpack.c.l.b16 %v3212_v36  ;;  %v3417_v52 = vunpack.c.l.b16 %v3403_v27  ;;  %v3237_v59 = vshll.u32 %v5570_v49, 16  ;;  %v3251_v26 = vshll.u32 %v5572_v18, 16  ;;  %v3777_v6 = vld [vmem:[#allocation3 + $0x18] sm:$0xe]  ;;  %v5625_v48 = vld [vmem:[#allocation3 + $0x44] sm:$0x1] }
 0x2b9   : > { %v3659_v40 = vrot.slane %v3657_v24, 5  ;;  %v3674_v43 = vsel %vm4925_vm12, %v3669_v38, %v3673_v41  ;;  %v4407_v56 = vrot.slane %v3363_v46, 9  ;;  %v3410_v35 = vrot.slane %v5600_v20, 5 }
 0x2ba   : > { %4445 = vmatmul.msk.bf16.gmra.mxu2 %vm1390_vm8, %v4427_v13  ;;  %v3286_v13 = vunpack.c.l.b16 %v3226_v58  ;;  %v3235_v19 = vrot.slane %v3234_v30, 4  ;;  %v3249_v0 = vrot.slane %v3248_v60, 4  ;;  %v4406_v11 = vrot.slane %v3362_v39, 9 }
 0x2bb   : > { %v3660_v49 = vsel %vm4925_vm12, %v3655_v29, %v3659_v40  ;;  %v3406_v18 = vrot.slane %v5604_v16, 5  ;;  %v3676_v61 = vshrl.u32 %v3587_v55, 16  ;;  %v3679_v1 = vshll.u32 %v3587_v55, 16  ;;  %v3779_v29 = vld [vmem:[#allocation3 + $0x28] sm:$0xe] }
 0x2bc   : > { %4457 = vmatmul.msk.bf16.gmra.mxu3 %vm1390_vm8, %v3712_v31  ;;  %v3292_v51 = vpack.c.b16 %v3286_v13, %v3285_v63  ;;  %v3422_v2 = vpack.c.b16 %v3417_v52, %v3416_v23  ;;  %v3708_v3 = vunpack.c.l.b16 %v3674_v43  ;;  %v3239_v8 = vrot.slane %v3237_v59, 5  ;;  %v3778_v31 = vld [vmem:[#allocation3 + $0x20] sm:$0xe]  ;;  %v3167_v13 = vld [vmem:[#allocation3 + $0x38] sm:$0xf] }
 0x2bd   : > { %v3253_v54 = vrot.slane %v3251_v26, 5  ;;  %v3589_v37 = vld [vmem:[#allocation3 + $0x48] sm:$0xf]  ;;  %v5615_v50 = vsel %vm4915_vm2, %v4407_v56, %v3410_v35  ;;  %v4431_v10 = vor.u32 %v4563_v17, %v4430_v34  ;;  %v3707_v32 = vunpack.c.l.b16 %v3660_v49  ;;  %v3780_v40 = vld [vmem:[#allocation3 + $0x30] sm:$0xe] }
 0x2be   : > { %v3690_v21 = vshrl.u32 %v3589_v37, 16  ;;  %v3693_v28 = vshll.u32 %v3589_v37, 16  ;;  %v3240_v12 = vsel %vm4925_vm12, %v3235_v19, %v3239_v8  ;;  %v3407_v5 = vsel %vm4915_vm2, %v4406_v11, %v3406_v18  ;;  %v5630_v63 = vld [vmem:[#allocation3 + $0x4c] sm:$0x1] }
 0x2bf   : > { %v3254_v47 = vsel %vm4925_vm12, %v3249_v0, %v3253_v54  ;;  %v3678_v58 = vrot.slane %v3676_v61, 4  ;;  %v3681_v25 = vrot.slane %v3679_v1, 5  ;;  %v4460_v9 = vrot.slane %v3776_v62, 9  ;;  %v3781_v62 = vld [vmem:[#allocation3 + $0x38] sm:$0xe] }
 0x2c0   : > { %v3713_v44 = vpack.c.b16 %v3708_v3, %v3707_v32  ;;  %v3419_v14 = vunpack.c.l.b16 %v5615_v50  ;;  %v3692_v36 = vrot.slane %v3690_v21, 4  ;;  %v3695_v27 = vrot.slane %v3693_v28, 5 }
 0x2c1   : > { %v3287_v24 = vunpack.c.l.b16 %v3240_v12  ;;  %v3288_v38 = vunpack.c.l.b16 %v3254_v47  ;;  %v3802_v30 = vrot.slane %v5511_v33, 5  ;;  %v4461_v60 = vrot.slane %v3777_v6, 9 }
 0x2c2   : > { %v3270_v46 = vshrl.u32 %v3169_v4, 16  ;;  %v3806_v23 = vrot.slane %v5516_v15, 5  ;;  %v4462_v41 = vrot.slane %v3778_v31, 9  ;;  %v3810_v39 = vrot.slane %v5545_v42, 5 }
 0x2c3   : > { %4397 = vmatmul.msk.bf16.gmra.mxu0 %vm1390_vm8, %v3292_v51  ;;  %v3682_v52 = vor.u32 %v3681_v25, %v3678_v58  ;;  %v3685_v59 = vshll.u32 %v5625_v48, 16  ;;  %v3273_v26 = vshll.u32 %v3169_v4, 16  ;;  %v3803_v55 = vsel %vm4915_vm2, %v4460_v9, %v3802_v30 }
 0x2c4   : > { %4418 = vmatmul.msk.bf16.gmra.mxu1 %vm1390_vm8, %v3422_v2  ;;  %v3696_v33 = vor.u32 %v3695_v27, %v3692_v36  ;;  %v3699_v43 = vshll.u32 %v5630_v63, 16  ;;  %v3807_v15 = vsel %vm4915_vm2, %v4461_v60, %v3806_v23  ;;  %v3832_v56 = vunpack.c.l.b16 %v3803_v55  ;;  %v4434_v27 = vld [vmem:[#allocation3 + $0x40] sm:$0xf] }
 0x2c5   : > { %v3833_v42 = vunpack.c.l.b16 %v3807_v15  ;;  %v3811_v35 = vsel %vm4915_vm2, %v4462_v41, %v3810_v39  ;;  %v4463_v51 = vrot.slane %v3779_v29, 9  ;;  %v3814_v19 = vrot.slane %v5547_v22, 5  ;;  %v3782_v60 = vld [vmem:[#allocation3 + $0x40] sm:$0xe] }
 0x2c6   : > { %v3256_v0 = vshrl.u32 %v3167_v13, 16  ;;  %v3259_v11 = vshll.u32 %v3167_v13, 16  ;;  %v3272_v17 = vrot.slane %v3270_v46, 4  ;;  %v4464_v49 = vrot.slane %v3780_v40, 9  ;;  %v3783_v46 = vld [vmem:[#allocation3 + $0x48] sm:$0xe] }
 0x2c7   : > { %v3275_v18 = vrot.slane %v3273_v26, 5  ;;  %v3840_v61 = vpack.c.b16 %v3833_v42, %v3832_v56  ;;  %v3815_v1 = vsel %vm4915_vm2, %v4463_v51, %v3814_v19  ;;  %v3818_v2 = vrot.slane %v5582_v7, 5 }
 0x2c8   : > { %v3683_v3 = vrot.slane %v3682_v52, 4  ;;  %v3701_v8 = vrot.slane %v3699_v43, 5  ;;  %v3834_v54 = vunpack.c.l.b16 %v3811_v35  ;;  %v3835_v37 = vunpack.c.l.b16 %v3815_v1 }
 0x2c9   : > { %v3697_v34 = vrot.slane %v3696_v33, 4  ;;  %v3819_v22 = vsel %vm4915_vm2, %v4464_v49, %v3818_v2  ;;  %v4465_v50 = vrot.slane %v3781_v62, 9  ;;  %v3822_v21 = vrot.slane %v5579_v53, 5 }
 0x2ca   : > { %4446 = vmatmul.msk.bf16.gmra.mxu2 %vm1390_vm8, %v4431_v10  ;;  %v3418_v28 = vunpack.c.l.b16 %v3407_v5  ;;  %v3258_v10 = vrot.slane %v3256_v0, 4  ;;  %v3261_v32 = vrot.slane %v3259_v11, 5  ;;  %v3841_v12 = vpack.c.b16 %v3835_v37, %v3834_v54 }
 0x2cb   : > { %v3293_v47 = vpack.c.b16 %v3288_v38, %v3287_v24  ;;  %v3687_v4 = vrot.slane %v3685_v59, 5  ;;  %v3823_v7 = vsel %vm4915_vm2, %v4465_v50, %v3822_v21  ;;  %v3276_v58 = vor.u32 %v3275_v18, %v3272_v17  ;;  %v4564_v24 = vld [vmem:[#allocation3 + $0x44] sm:$0xf0] }
 0x2cc   : > { %4458 = vmatmul.msk.bf16.gmra.mxu3 %vm1390_vm8, %v3713_v44  ;;  %v3423_v6 = vpack.c.b16 %v3419_v14, %v3418_v28  ;;  %v3836_v25 = vunpack.c.l.b16 %v3819_v22  ;;  %v3837_v9 = vunpack.c.l.b16 %v3823_v7  ;;  %v3702_v53 = vsel %vm4925_vm12, %v3697_v34, %v3701_v8 }
 0x2cd   : > { %v3688_v31 = vsel %vm4925_vm12, %v3683_v3, %v3687_v4  ;;  %v3262_v5 = vor.u32 %v3261_v32, %v3258_v10  ;;  %v3279_v44 = vshll.u32 %v5600_v20, 16  ;;  %v3265_v14 = vshll.u32 %v5604_v16, 16 }
 0x2ce   : > { %v3842_v36 = vpack.c.b16 %v3837_v9, %v3836_v25  ;;  %v3709_v38 = vunpack.c.l.b16 %v3688_v31  ;;  %v3710_v13 = vunpack.c.l.b16 %v3702_v53  ;;  %v3277_v30 = vrot.slane %v3276_v58, 4 }
 0x2cf   : > { %v4466_v23 = vrot.slane %v3782_v60, 9  ;;  %v3826_v29 = vrot.slane %v5625_v48, 5  ;;  %v4467_v41 = vrot.slane %v3783_v46, 9  ;;  %v3830_v39 = vrot.slane %v5630_v63, 5 }
 0x2d0   : > { %v4435_v52 = vor.u32 %v4564_v24, %v4434_v27  ;;  %v3263_v59 = vrot.slane %v3262_v5, 4  ;;  %v3281_v26 = vrot.slane %v3279_v44, 5  ;;  %v3267_v20 = vrot.slane %v3265_v14, 5 }
 0x2d1   : > { %v3827_v55 = vsel %vm4915_vm2, %v4466_v23, %v3826_v29  ;;  %v3831_v16 = vsel %vm4915_vm2, %v4467_v41, %v3830_v39  ;;  %v3714_v40 = vpack.c.b16 %v3710_v13, %v3709_v38 }
 0x2d2   : > { %v3282_v33 = vsel %vm4925_vm12, %v3277_v30, %v3281_v26  ;;  %v3838_v48 = vunpack.c.l.b16 %v3827_v55  ;;  %v3839_v43 = vunpack.c.l.b16 %v3831_v16  ;;  %v3268_v63 = vsel %vm4925_vm12, %v3263_v59, %v3267_v20 }
 0x2d3   : > { %4398 = vmatmul.msk.bf16.gmra.mxu0 %vm1390_vm8, %v3293_v47  ;;  %v3290_v56 = vunpack.c.l.b16 %v3282_v33  ;;  %v3289_v42 = vunpack.c.l.b16 %v3268_v63 }
 0x2d4   : > { %4419 = vmatmul.msk.bf16.gmra.mxu1 %vm1390_vm8, %v3423_v6  ;;  %v3843_v15 = vpack.c.b16 %v3839_v43, %v3838_v48 }
 0x2d5   : > { %v3294_v35 = vpack.c.b16 %v3290_v56, %v3289_v42  ;;  %v5723_v56 = vld [vmem:[%s5812_s8] ss:$0 sm:$0xff] }
 0x2da   : > { %4447 = vmatmul.msk.bf16.gmra.mxu2 %vm1390_vm8, %v4435_v52 }
 0x2dc   : > { %4459 = vmatmul.msk.bf16.gmra.mxu3 %vm1390_vm8, %v3714_v40 }
 0x2e1   : > { %v2917_v0 = vpop.f32.mrf.mxu1 }
 0x2e3   : > { %4399 = vmatmul.msk.bf16.gmra.mxu0 %vm1390_vm8, %v3294_v35 }
 0x2e9   : > { %v2919_v18 = vpop.f32.mrf.mxu1 }
 0x2ed   : > { %v3038_v17 = vpop.f32.mrf.mxu2 }
 0x2ef   : > { %v3127_v49 = vpop.f32.mrf.mxu3 }
 0x2f0   : > { %v2844_v45 = vpop.f32.mrf.mxu0 }
 0x2f1   : > { %v2922_v8 = vpop.f32.mrf.mxu1  ;;  %v2918_v14 = vadd.f32 %v2917_v0, %v2844_v45 }
 0x2f3   : > { %4476 = vmatmul.msk.bf16.vlgmr.msrb.gmra.mxu0 %vm1390_vm8, %v3840_v61  ;;  %v3058_v13 = vadd.f32 %v3038_v17, %v2918_v14 }
 0x2f5   : > { %v3040_v1 = vpop.f32.mrf.mxu2  ;;  %v3147_v46 = vadd.f32 %v3127_v49, %v3058_v13 }
 0x2f7   : > { %v3129_v3 = vpop.f32.mrf.mxu3 }
 0x2f8   : > { %v2846_v51 = vpop.f32.mrf.mxu0 }
 0x2f9   : > { %v2924_v62 = vpop.f32.mrf.mxu1  ;;  %v2920_v23 = vadd.f32 %v2919_v18, %v2846_v51 }
 0x2fb   : > { %v3059_v39 = vadd.f32 %v3040_v1, %v2920_v23 }
 0x2fd   : > { %v3043_v61 = vpop.f32.mrf.mxu2  ;;  %v3148_v20 = vadd.f32 %v3129_v3, %v3059_v39 }
 0x2ff   : > { %v3132_v37 = vpop.f32.mrf.mxu3 }
 0x300   : > { %v2849_v19 = vpop.f32.mrf.mxu0 }
 0x301   : > { %v5688_v21 = vpop.f32.mrf.mxu1  ;;  %v2923_v55 = vadd.f32 %v2922_v8, %v2849_v19 }
 0x303   : > { %4477 = vmatmul.msk.bf16.gmra.mxu0 %vm1390_vm8, %v3841_v12  ;;  %v3060_v43 = vadd.f32 %v3043_v61, %v2923_v55 }
 0x305   : > { %v3045_v22 = vpop.f32.mrf.mxu2  ;;  %v3149_v45 = vadd.f32 %v3132_v37, %v3060_v43 }
 0x307   : > { %v5686_v50 = vpop.f32.mrf.mxu3 }
 0x308   : > { %v5674_v11 = vpop.f32.mrf.mxu0 }
 0x309   : > { %v5694_v47 = vpop.f32.mrf.mxu1  ;;  %v2925_v51 = vadd.f32 %v2924_v62, %v5674_v11 }
 0x30b   : > { %v3061_v1 = vadd.f32 %v3045_v22, %v2925_v51 }
 0x30d   : > { %v5690_v10 = vpop.f32.mrf.mxu2  ;;  %v3150_v62 = vadd.f32 %v5686_v50, %v3061_v1 }
 0x30f   : > { %v5692_v32 = vpop.f32.mrf.mxu3 }
 0x310   : > { %v5676_v57 = vpop.f32.mrf.mxu0 }
 0x311   : > { %v5700_v58 = vpop.f32.mrf.mxu1 }
 0x313   : > { %4478 = vmatmul.msk.bf16.gmra.mxu0 %vm1390_vm8, %v3842_v36 }
 0x315   : > { %v5696_v4 = vpop.f32.mrf.mxu2 }
 0x317   : > { %v5698_v6 = vpop.f32.mrf.mxu3 }
 0x318   : > { %v5679_v2 = vpop.f32.mrf.mxu0 }
 0x319   : > { %v5706_v53 = vpop.f32.mrf.mxu1 }
 0x31d   : > { %v5702_v25 = vpop.f32.mrf.mxu2 }
 0x31f   : > { %v5704_v31 = vpop.f32.mrf.mxu3 }
 0x320   : > { %v5681_v54 = vpop.f32.mrf.mxu0 }
 0x321   : > { %v3457_v27 = vpop.f32.mrf.mxu1 }
 0x323   : > { %4479 = vmatmul.msk.bf16.gmra.mxu0 %vm1390_vm8, %v3843_v15 }
 0x325   : > { %v5710_v44 = vpop.f32.mrf.mxu2 }
 0x327   : > { %v5712_v36 = vpop.f32.mrf.mxu3 }
 0x328   : > { %v5684_v34 = vpop.f32.mrf.mxu0 }
 0x329   : > { %v3459_v29 = vpop.f32.mrf.mxu1 }
 0x32d   : > { %v3547_v38 = vpop.f32.mrf.mxu2 }
 0x32f   : > { %v3748_v30 = vpop.f32.mrf.mxu3 }
 0x330   : > { %v3328_v28 = vpop.f32.mrf.mxu0 }
 0x331   : > { %v3348_v41 = vadd.f32 %v3328_v28, %v3147_v46  ;;  %v3462_v48 = vpop.f32.mrf.mxu1  ;;  %v2928_v28 = vadd.f32 %v5688_v21, %v5676_v57  ;;  %v2930_v21 = vadd.f32 %v5694_v47, %v5679_v2  ;;  %v2933_v47 = vadd.f32 %v5700_v58, %v5681_v54 }
 0x332   : > { %v2935_v58 = vadd.f32 %v5706_v53, %v5684_v34 }
 0x333   : > { %v3477_v59 = vadd.f32 %v3457_v27, %v3348_v41 }
 0x335   : > { %v3549_v52 = vpop.f32.mrf.mxu2  ;;  %v3567_v40 = vadd.f32 %v3547_v38, %v3477_v59  ;;  %v3062_v38 = vadd.f32 %v5690_v10, %v2928_v28  ;;  %v3063_v59 = vadd.f32 %v5696_v4, %v2930_v21 }
 0x337   : > { %v3750_v16 = vpop.f32.mrf.mxu3  ;;  %v3768_v63 = vadd.f32 %v3748_v30, %v3567_v40  ;;  %v3151_v57 = vadd.f32 %v5692_v32, %v3062_v38  ;;  %v3152_v2 = vadd.f32 %v5698_v6, %v3063_v59 }
 0x338   : > { %v3330_v12 = vpop.f32.mrf.mxu0 }
 0x339   : > { %v3349_v33 = vadd.f32 %v3330_v12, %v3148_v20  ;;  %v3464_v8 = vpop.f32.mrf.mxu1 }
 0x33b   : > { %v3478_v15 = vadd.f32 %v3459_v29, %v3349_v33 }
 0x33d   : > { %v3552_v42 = vpop.f32.mrf.mxu2  ;;  %v3568_v19 = vadd.f32 %v3549_v52, %v3478_v15 }
 0x33f   : > { %v3753_v18 = vpop.f32.mrf.mxu3  ;;  %v3769_v61 = vadd.f32 %v3750_v16, %v3568_v19 }
 0x340   : > { %v3333_v7 = vpop.f32.mrf.mxu0 }
 0x341   : > { %v3350_v17 = vadd.f32 %v3333_v7, %v3149_v45  ;;  %v3467_v50 = vpop.f32.mrf.mxu1 }
 0x343   : > { %v3479_v37 = vadd.f32 %v3462_v48, %v3350_v17 }
 0x345   : > { %v3554_v7 = vpop.f32.mrf.mxu2  ;;  %v3569_v27 = vadd.f32 %v3552_v42, %v3479_v37 }
 0x347   : > { %v3755_v30 = vpop.f32.mrf.mxu3  ;;  %v3770_v46 = vadd.f32 %v3753_v18, %v3569_v27 }
 0x348   : > { %v3335_v9 = vpop.f32.mrf.mxu0 }
 0x349   : > { %v3351_v22 = vadd.f32 %v3335_v9, %v3150_v62  ;;  %v3469_v33 = vpop.f32.mrf.mxu1 }
 0x34b   : > { %v3480_v23 = vadd.f32 %v3464_v8, %v3351_v22 }
 0x34d   : > { %v3570_v41 = vadd.f32 %v3554_v7, %v3480_v23  ;;  %v3557_v52 = vpop.f32.mrf.mxu2 }
 0x34f   : > { %v3771_v55 = vadd.f32 %v3755_v30, %v3570_v41  ;;  %v3758_v32 = vpop.f32.mrf.mxu3 }
 0x350   : > { %v5708_v5 = vpop.f32.mrf.mxu0 }
 0x351   : > { %v3352_v10 = vadd.f32 %v5708_v5, %v3151_v57  ;;  %v3472_v17 = vpop.f32.mrf.mxu1 }
 0x353   : > { %v3481_v16 = vadd.f32 %v3467_v50, %v3352_v10 }
 0x355   : > { %v3571_v48 = vadd.f32 %v3557_v52, %v3481_v16  ;;  %v3559_v42 = vpop.f32.mrf.mxu2 }
 0x357   : > { %v3760_v51 = vpop.f32.mrf.mxu3 }
 0x358   : > { %v5714_v24 = vpop.f32.mrf.mxu0 }
 0x359   : > { %v3353_v4 = vadd.f32 %v5714_v24, %v3152_v2  ;;  %v3474_v62 = vpop.f32.mrf.mxu1 }
 0x35b   : > { %v3482_v45 = vadd.f32 %v3469_v33, %v3353_v4 }
 0x360   : > { %v5716_v60 = vpop.f32.mrf.mxu0 }
 0x368   : > { %v5718_v26 = vpop.f32.mrf.mxu0 }
 0x370   : > { %v3877_v35 = vpop.f32.mrf.mxu0 }
 0x371   : > { %v3897_v0 = vadd.f32 %v3877_v35, %v3768_v63  ;;  %v3064_v63 = vadd.f32 %v5702_v25, %v2933_v47  ;;  %v3772_v35 = vadd.f32 %v3758_v32, %v3571_v48 }
 0x373   : > { %v3908_v49 = vadd.f32 %v5723_v56, %v3897_v0  ;;  %v3153_v54 = vadd.f32 %v5704_v31, %v3064_v63  ;;  %v3572_v0 = vadd.f32 %v3559_v42, %v3482_v45  ;;  %v3562_v31 = vpop.f32.mrf.mxu2 }
 0x375   : > { %v3916_v3 = vmax.f32 %v3908_v49, 0.0  ;;  %v3354_v25 = vadd.f32 %v5716_v60, %v3153_v54  ;;  %v3065_v49 = vadd.f32 %v5710_v44, %v2935_v58  ;;  %v3773_v1 = vadd.f32 %v3760_v51, %v3572_v0  ;;  %v3763_v44 = vpop.f32.mrf.mxu3 }
 0x377   : > { %3925 = vst.msk [vmem:[%s5731_s11] sm:$0xff] %vm3924_vm4, %v3916_v3  ;;  %3941 = vrot.lane.b32.xlu2 %v3916_v3, %s4594_s10  ;;  %v3483_v3 = vadd.f32 %v3472_v17, %v3354_v25  ;;  %v3154_v53 = vadd.f32 %v5712_v36, %v3065_v49 }
 0x378   : > { %v3879_v11 = vpop.f32.mrf.mxu0 }
 0x379   : > { %v3898_v12 = vadd.f32 %v3879_v11, %v3769_v61  ;;  %v3573_v61 = vadd.f32 %v3562_v31, %v3483_v3  ;;  %v3355_v60 = vadd.f32 %v5718_v26, %v3154_v53 }
 0x37b   : > { %v3909_v14 = vadd.f32 %v5723_v56, %v3898_v12  ;;  %v3774_v28 = vadd.f32 %v3763_v44, %v3573_v61  ;;  %v3484_v12 = vadd.f32 %v3474_v62, %v3355_v60  ;;  %v3564_v36 = vpop.f32.mrf.mxu2 }
 0x37d   : > { %v3917_v13 = vmax.f32 %v3909_v14, 0.0  ;;  %v3574_v22 = vadd.f32 %v3564_v36, %v3484_v12  ;;  %v3765_v38 = vpop.f32.mrf.mxu3 }
 0x37f   : > { %3926 = vst.msk [vmem:[%s5731_s11 + $0x10] sm:$0xff] %vm3924_vm4, %v3917_v13  ;;  %3943 = vrot.lane.b32.xlu0 %v3917_v13, %s4594_s10  ;;  %v3775_v13 = vadd.f32 %v3765_v38, %v3574_v22 }
 0x380   : > { %v3882_v29 = vpop.f32.mrf.mxu0 }
 0x381   : > { %v3899_v9 = vadd.f32 %v3882_v29, %v3770_v46 }
 0x383   : > { %v3910_v39 = vadd.f32 %v5723_v56, %v3899_v9 }
 0x385   : > { %v3918_v20 = vmax.f32 %v3910_v39, 0.0 }
 0x387   : > { %3927 = vst.msk [vmem:[%s5731_s11 + $0x20] sm:$0xff] %vm3924_vm4, %v3918_v20  ;;  %3945 = vrot.lane.b32.xlu1 %v3918_v20, %s4594_s10 }
 0x388   : > { %v3884_v40 = vpop.f32.mrf.mxu0 }
 0x389   : > { %v3900_v5 = vadd.f32 %v3884_v40, %v3771_v55 }
 0x38b   : > { %v3911_v43 = vadd.f32 %v5723_v56, %v3900_v5 }
 0x38d   : > { %v3919_v15 = vmax.f32 %v3911_v43, 0.0 }
 0x38f   : > { %3928 = vst.msk [vmem:[%s5731_s11 + $0x30] sm:$0xff] %vm3924_vm4, %v3919_v15  ;;  %3947 = vrot.lane.b32.xlu2 %v3919_v15, %s4594_s10 }
 0x390   : > { %v3887_v6 = vpop.f32.mrf.mxu0 }
 0x391   : > { %v3901_v24 = vadd.f32 %v3887_v6, %v3772_v35 }
 0x393   : > { %v3912_v19 = vadd.f32 %v5723_v56, %v3901_v24 }
 0x395   : > { %v3920_v18 = vmax.f32 %v3912_v19, 0.0 }
 0x397   : > { %3929 = vst.msk [vmem:[%s5731_s11 + $0x40] sm:$0xff] %vm3924_vm4, %v3920_v18  ;;  %3949 = vrot.lane.b32.xlu0 %v3920_v18, %s4594_s10 }
 0x398   : > { %v3889_v34 = vpop.f32.mrf.mxu0 }
 0x399   : > { %v3902_v8 = vadd.f32 %v3889_v34, %v3773_v1 }
 0x39b   : > { %v3913_v37 = vadd.f32 %v5723_v56, %v3902_v8 }
 0x39d   : > { %v3921_v11 = vmax.f32 %v3913_v37, 0.0 }
 0x39f   : > { %3930 = vst.msk [vmem:[%s5731_s11 + $0x50] sm:$0xff] %vm3924_vm4, %v3921_v11  ;;  %3951 = vrot.lane.b32.xlu1 %v3921_v11, %s4594_s10 }
 0x3a0   : > { %v3892_v7 = vpop.f32.mrf.mxu0 }
 0x3a1   : > { %v3903_v27 = vadd.f32 %v3892_v7, %v3774_v28 }
 0x3a3   : > { %v3914_v26 = vadd.f32 %v5723_v56, %v3903_v27 }
 0x3a5   : > { %v3922_v14 = vmax.f32 %v3914_v26, 0.0 }
 0x3a7   : > { %3931 = vst.msk [vmem:[%s5731_s11 + $0x60] sm:$0xff] %vm3924_vm4, %v3922_v14  ;;  %3953 = vrot.lane.b32.xlu2 %v3922_v14, %s4594_s10 }
 0x3a8   : > { %v3894_v30 = vpop.f32.mrf.mxu0 }
 0x3a9   : > { %v3904_v46 = vadd.f32 %v3894_v30, %v3775_v13 }
 0x3ab   : > { %v3915_v23 = vadd.f32 %v5723_v56, %v3904_v46 }
 0x3ad   : > { %v3923_v50 = vmax.f32 %v3915_v23, 0.0 }
 0x3af   : > { %3932 = vst.msk [vmem:[%s5731_s11 + $0x70] sm:$0xff] %vm3924_vm4, %v3923_v50  ;;  %3955 = vrot.lane.b32.xlu0 %v3923_v50, %s4594_s10 }
 0x3d1   : > { %v3942_v29 = vpop.permute.xlu2 %3941 }
 0x3d2   : > { %4480 = vst.msk [vmem:[%s5731_s11 + $0x8] sm:$0xff] %vm3924_vm4, %v3942_v29 }
 0x3e9   : > { %v3948_v57 = vpop.permute.xlu2 %3947 }
 0x3ea   : > { %4483 = vst.msk [vmem:[%s5731_s11 + $0x38] sm:$0xff] %vm3924_vm4, %v3948_v57 }
 0x3f1   : > { %v3944_v21 = vpop.permute.xlu0 %3943 }
 0x3f2   : > { %4481 = vst.msk [vmem:[%s5731_s11 + $0x18] sm:$0xff] %vm3924_vm4, %v3944_v21 }
 0x3f9   : > { %v3946_v9 = vpop.permute.xlu1 %3945 }
 0x3fa   : > { %4482 = vst.msk [vmem:[%s5731_s11 + $0x28] sm:$0xff] %vm3924_vm4, %v3946_v9 }
 0x401   : > { %v3954_v56 = vpop.permute.xlu2 %3953 }
 0x402   : > { %4486 = vst.msk [vmem:[%s5731_s11 + $0x68] sm:$0xff] %vm3924_vm4, %v3954_v56 }
 0x409   : > { %v3950_v41 = vpop.permute.xlu0 %3949 }
 0x40a   : > { %4484 = vst.msk [vmem:[%s5731_s11 + $0x48] sm:$0xff] %vm3924_vm4, %v3950_v41 }
 0x411   : > { %v3952_v10 = vpop.permute.xlu1 %3951 }
 0x412   : > { %4485 = vst.msk [vmem:[%s5731_s11 + $0x58] sm:$0xff] %vm3924_vm4, %v3952_v10 }
 0x421   : > { %v3956_v39 = vpop.permute.xlu0 %3955 }
 0x422   : > { %4487 = vst.msk [vmem:[%s5731_s11 + $0x78] sm:$0xff] %vm3924_vm4, %v3956_v39 }
 0x423 PF: > { %s19_s30 = sadd.s32 1, %s4589_s30  }
 0x424   : > { %p16_p4 = scmp.ge.s32.totalorder %s19_s30, 4  }
 0x426   :  { %18 = sbr.rel (!%p16_p4) target bundleno = 1 (0x1), region = 97 }

</bundles_post_ra>
